<compile_context>
chip_gen: v5e
topology: v5e:2x2
jax: 0.10.0
libtpu: 0.0.40
codegen_flags: <defaults>
</compile_context>

<pallas_src>
import math

import jax
import jax.numpy as jnp
from jax.experimental import pallas as pl
from jax.experimental.pallas import tpu as pltpu

LN_EPS = 1e-5
_SQRT_2_OVER_PI = 0.7978845608028654


def _gelu(x):
    # tanh-approximate GELU: the transcendental (tanh) runs on the EUP slot
    # (idle here) instead of exact erf's VALU polynomial.  f32 in/out so it is
    # also the right choice on v5e (no bf16 VPU/EUP).  Numerics delta vs the
    # exact-erf PyTorch GELU is <~3e-3 and covered by the test tolerance.
    x3 = x * x * x
    return 0.5 * x * (1.0 + jnp.tanh(_SQRT_2_OVER_PI * (x + 0.044715 * x3)))


def _layer_norm(x, gamma, beta):
    # Fused single-pass LayerNorm over the channel (lane) axis, f32 stats:
    # one sweep computes sum(x) and sum(x*x); var = E[x^2] - mu^2.
    inv_c = 1.0 / x.shape[-1]
    mu = jnp.sum(x, axis=-1, keepdims=True) * inv_c
    ex2 = jnp.sum(x * x, axis=-1, keepdims=True) * inv_c
    var = ex2 - mu * mu
    return (x - mu) * jax.lax.rsqrt(var + LN_EPS) * gamma + beta


def _to_tokens_minor(x2, bb, t, c):
    """(bb*t, c) -> (bb*c, t): per-batch 2D transpose so the token MLP becomes
    one wide matmul per layer (M = bb*c) instead of 2*bb tiny K=t matmuls.
    Only plain 2D transposes + one sublane-axis concat (cheap XLU/copy work)."""
    parts = [x2[b * t:(b + 1) * t, :].T for b in range(bb)]        # each (c, t)
    return parts[0] if bb == 1 else jnp.concatenate(parts, axis=0)


def _to_channels_minor(xt, bb, t, c):
    """(bb*c, t) -> (bb*t, c): inverse of _to_tokens_minor."""
    parts = [xt[b * c:(b + 1) * c, :].T for b in range(bb)]        # each (t, c)
    return parts[0] if bb == 1 else jnp.concatenate(parts, axis=0)


def mixer_block_kernel(
    x_ref,                       # (BB, T, C) f32
    g1_ref, b1_ref,              # (1, C) f32   LayerNorm 1
    g2_ref, b2_ref,              # (1, C) f32   LayerNorm 2
    tw1t_ref, tb1_ref,           # (T, Dt) bf16, (1, Dt) f32   token Linear 1 (pre-T)
    tw2t_ref, tb2_ref,           # (Dt, T) bf16, (1, T)  f32   token Linear 2 (pre-T)
    cw1t_ref, cb1_ref,           # (C, Dc) bf16, (1, Dc) f32   channel Linear 1 (pre-T)
    cw2t_ref, cb2_ref,           # (Dc, C) bf16, (1, C)  f32   channel Linear 2 (pre-T)
    o_ref,                       # (BB, T, C)
):
    BB, T, C = x_ref.shape
    bf16 = jnp.bfloat16

    x = x_ref[...].reshape(BB * T, C)                              # (BB*T, C) f32

    # ---- LayerNorm 1 ---------------------------------------------------------
    xn = _layer_norm(x, g1_ref[...], b1_ref[...])                  # (BB*T, C)

    # ---- Token mixing: one wide matmul per MLP layer over all batches --------
    # PyTorch: (LN(x).permute(0,2,1) @ W1^T + b1 ->GELU-> @ W2^T + b2).permute(0,2,1)
    xt = _to_tokens_minor(xn, BB, T, C)                            # (BB*C, T)
    h = jnp.dot(xt.astype(bf16), tw1t_ref[...],
                preferred_element_type=jnp.float32) + tb1_ref[...]     # (BB*C, Dt)
    h = _gelu(h)
    tkn = jnp.dot(h.astype(bf16), tw2t_ref[...],
                  preferred_element_type=jnp.float32) + tb2_ref[...]   # (BB*C, T)
    y = _to_channels_minor(tkn, BB, T, C) + x                      # residual 1

    # ---- LayerNorm 2 + channel mixing on the fat (BB*T, C) slab --------------
    yn = _layer_norm(y, g2_ref[...], b2_ref[...])
    h2 = jnp.dot(yn.astype(bf16), cw1t_ref[...],
                 preferred_element_type=jnp.float32) + cb1_ref[...]    # (BB*T, Dc)
    h2 = _gelu(h2)
    c = jnp.dot(h2.astype(bf16), cw2t_ref[...],
                preferred_element_type=jnp.float32) + cb2_ref[...]     # (BB*T, C)

    o_ref[...] = (c + y).reshape(BB, T, C).astype(o_ref.dtype)      # residual 2


def _lane_pad(n):
    return ((n + 127) // 128) * 128


def _pick_batch_block(B, T, C, Dt, Dc, weight_bytes, vmem_budget=40 << 20):
    """Largest batch block (divisor of B) whose working set fits the VMEM budget.

    Per review: collapse to a single grid step whenever it fits (v5e/v6e are
    single-TensorCore, so extra steps are pure per-step overhead and thin out
    the channel-mixer M dim); the 40 MiB budget is sized against v7x's 64 MiB
    physical VMEM so the same choice stays safe there.
    """
    avail = max(vmem_budget - 2 * weight_bytes, 4 << 20)   # weights double-buffered
    def act_bytes(bb):
        rows = bb * T
        return 4 * (
            2 * 2 * rows * C                                  # dbl-buffered in+out blocks
            + 3 * rows * C                                    # xn / y / result live together
            + bb * C * (_lane_pad(T) + _lane_pad(Dt))         # token-minor slab + hidden
            + rows * _lane_pad(Dc))                           # channel-mixer hidden
    for bb in range(B, 0, -1):
        if B % bb == 0 and act_bytes(bb) <= avail:
            return bb
    return 1


def mixer_block(x, kp):
    """x: (B, T, C) float32.  kp: kernel-ready params from prepare_params()."""
    B, T, C = x.shape
    Dt = kp["tw1t"].shape[1]
    Dc = kp["cw1t"].shape[1]

    weights = (kp["g1"], kp["b1"], kp["g2"], kp["b2"],
               kp["tw1t"], kp["tb1"], kp["tw2t"], kp["tb2"],
               kp["cw1t"], kp["cb1"], kp["cw2t"], kp["cb2"])
    weight_bytes = sum(int(w.size) * w.dtype.itemsize for w in weights)

    BB = _pick_batch_block(B, T, C, Dt, Dc, weight_bytes)
    grid = (B // BB,)

    rep = lambda a: pl.BlockSpec(a.shape, lambda i: (0,) * a.ndim)   # constant block
    # TODO(synk): for multi-step grids on v7x, pipeline_mode=pl.Buffered(1) on these
    # constant-index weight specs would halve their VMEM footprint; with grid=(1,)
    # at demo shapes it buys nothing, so the default is kept for portability.

    flops = 4 * B * T * C * (Dt + Dc)              # 4 matmuls, 2 flops/MAC
    transcendentals = B * (C * Dt + T * Dc)        # tanh evaluations (GELU)
    bytes_accessed = 2 * int(x.size) * x.dtype.itemsize + weight_bytes

    out = pl.pallas_call(
        mixer_block_kernel,
        out_shape=jax.ShapeDtypeStruct((B, T, C), x.dtype),
        grid_spec=pltpu.PrefetchScalarGridSpec(
            num_scalar_prefetch=0,
            grid=grid,
            in_specs=[pl.BlockSpec((BB, T, C), lambda i: (i, 0, 0))]
                     + [rep(w) for w in weights],
            out_specs=pl.BlockSpec((BB, T, C), lambda i: (i, 0, 0)),
        ),
        compiler_params=pltpu.CompilerParams(
            # Single-TC chips (v5e/v6e) gain nothing from splitting the grid; on
            # v7x, CORE_PARALLEL on a >1 batch-block grid would shard across the
            # two TensorCores — here we collapse to one step instead.
            dimension_semantics=("arbitrary",),
            vmem_limit_bytes=48 << 20,
        ),
        cost_estimate=pl.CostEstimate(
            flops=flops,
            transcendentals=transcendentals,
            bytes_accessed=bytes_accessed),
    )(x, *weights)

    return out


def init_params(key, n_tokens, n_channels, token_mixing_dim, channel_mixing_dim):
    """Deterministic synthetic parameters with PyTorch-native layouts (f32)."""
    ks = jax.random.split(key, 8)
    u = lambda k, shape, fan_in: jax.random.uniform(
        k, shape, jnp.float32, -1.0 / math.sqrt(fan_in), 1.0 / math.sqrt(fan_in))
    return {
        "ln1_g": jnp.ones((n_channels,), jnp.float32),
        "ln1_b": jnp.zeros((n_channels,), jnp.float32),
        "ln2_g": jnp.ones((n_channels,), jnp.float32),
        "ln2_b": jnp.zeros((n_channels,), jnp.float32),
        # token mixer: Linear(n_tokens -> Dt), Linear(Dt -> n_tokens)
        "tw1": u(ks[0], (token_mixing_dim, n_tokens), n_tokens),
        "tb1": u(ks[1], (token_mixing_dim,), n_tokens),
        "tw2": u(ks[2], (n_tokens, token_mixing_dim), token_mixing_dim),
        "tb2": u(ks[3], (n_tokens,), token_mixing_dim),
        # channel mixer: Linear(n_channels -> Dc), Linear(Dc -> n_channels)
        "cw1": u(ks[4], (channel_mixing_dim, n_channels), n_channels),
        "cb1": u(ks[5], (channel_mixing_dim,), n_channels),
        "cw2": u(ks[6], (n_channels, channel_mixing_dim), channel_mixing_dim),
        "cb2": u(ks[7], (n_channels,), channel_mixing_dim),
    }


def prepare_params(p, compute_dtype=jnp.bfloat16):
    """One-time conversion to kernel-ready layouts (pre-transposed bf16 weights,
    lane-dense bias rows, f32 LayerNorm params)."""
    C = p["ln1_g"].shape[0]
    Dt, T = p["tw1"].shape
    Dc = p["cw1"].shape[0]
    f32 = jnp.float32
    return {
        "g1": p["ln1_g"].reshape(1, C).astype(f32),
        "b1": p["ln1_b"].reshape(1, C).astype(f32),
        "g2": p["ln2_g"].reshape(1, C).astype(f32),
        "b2": p["ln2_b"].reshape(1, C).astype(f32),
        # token mixer in the right-multiply orientation used by the kernel
        "tw1t": p["tw1"].T.astype(compute_dtype),          # (T, Dt)
        "tb1": p["tb1"].reshape(1, Dt).astype(f32),        # (1, Dt)
        "tw2t": p["tw2"].T.astype(compute_dtype),          # (Dt, T)
        "tb2": p["tb2"].reshape(1, T).astype(f32),         # (1, T)
        "cw1t": p["cw1"].T.astype(compute_dtype),          # (C, Dc)
        "cb1": p["cb1"].reshape(1, Dc).astype(f32),
        "cw2t": p["cw2"].T.astype(compute_dtype),          # (Dc, C)
        "cb2": p["cb2"].reshape(1, C).astype(f32),
    }


def mixer_block_ref(x, p):
    """Pure-JAX f32 reference mirroring the PyTorch forward exactly (erf GELU)."""
    def ln(v, g, b):
        mu = v.mean(-1, keepdims=True)
        var = ((v - mu) ** 2).mean(-1, keepdims=True)
        return (v - mu) / jnp.sqrt(var + LN_EPS) * g + b

    gelu = lambda v: 0.5 * v * (1.0 + jax.lax.erf(v / math.sqrt(2.0)))

    x1 = ln(x, p["ln1_g"], p["ln1_b"])
    xt = jnp.transpose(x1, (0, 2, 1))                               # (B, C, T)
    h = gelu(xt @ p["tw1"].T + p["tb1"])                            # (B, C, Dt)
    tm = jnp.transpose(h @ p["tw2"].T + p["tb2"], (0, 2, 1))        # (B, T, C)
    y = tm + x
    y1 = ln(y, p["ln2_g"], p["ln2_b"])
    h2 = gelu(y1 @ p["cw1"].T + p["cb1"])                           # (B, T, Dc)
    return h2 @ p["cw2"].T + p["cb2"] + y


if __name__ == "__main__":
    # Small but TPU-friendly (lane-dense) shapes: C=128, Dc=256, T=16, B*T=128.
    B, n_tokens, n_channels = 8, 16, 128
    token_mixing_dim, channel_mixing_dim = 64, 256

    key = jax.random.PRNGKey(0)
    kx, kp_key = jax.random.split(key)
    x = jax.random.normal(kx, (B, n_tokens, n_channels), jnp.float32)
    params = init_params(kp_key, n_tokens, n_channels,
                         token_mixing_dim, channel_mixing_dim)
    kparams = prepare_params(params)          # one-time layout/dtype conversion

    fwd = jax.jit(mixer_block)
    out = jax.block_until_ready(fwd(x, kparams))

    ref = mixer_block_ref(x, params)
    assert out.shape == (B, n_tokens, n_channels)
    assert bool(jnp.all(jnp.isfinite(out)))
    # Tolerance covers bf16 matmul operands (f32 accumulation, f32 LN/residuals)
    # plus the tanh-approximate GELU vs the exact-erf PyTorch reference.
    assert jnp.allclose(out, ref, atol=2.5e-2, rtol=2.5e-2)

    print("KERNEL_OK")
</pallas_src>

<mosaic_0001>
module attributes {stable_mosaic.version = 11 : i64} {
  func.func @mixer_block_kernel(%arg0: i32, %arg1: memref<8x16x128xf32, #tpu.memory_space<vmem>>, %arg2: memref<1x128xf32, #tpu.memory_space<vmem>>, %arg3: memref<1x128xf32, #tpu.memory_space<vmem>>, %arg4: memref<1x128xf32, #tpu.memory_space<vmem>>, %arg5: memref<1x128xf32, #tpu.memory_space<vmem>>, %arg6: memref<16x64xbf16, #tpu.memory_space<vmem>>, %arg7: memref<1x64xf32, #tpu.memory_space<vmem>>, %arg8: memref<64x16xbf16, #tpu.memory_space<vmem>>, %arg9: memref<1x16xf32, #tpu.memory_space<vmem>>, %arg10: memref<128x256xbf16, #tpu.memory_space<vmem>>, %arg11: memref<1x256xf32, #tpu.memory_space<vmem>>, %arg12: memref<256x128xbf16, #tpu.memory_space<vmem>>, %arg13: memref<1x128xf32, #tpu.memory_space<vmem>>, %arg14: memref<8x16x128xf32, #tpu.memory_space<vmem>>) attributes {dimension_semantics = [#tpu.dimension_semantics<arbitrary>], iteration_bounds = array<i64: 1>, scalar_prefetch = 0 : i64, scratch_operands = 0 : i64, tpu.core_type = #tpu.core_type<tc>, window_params = [{transform_indices = @transform_0, window_bounds = array<i64: 8, 16, 128>}, {pipeline_mode = #tpu.pipeline_mode<synchronous>, transform_indices = @transform_1, window_bounds = array<i64: 1, 128>}, {pipeline_mode = #tpu.pipeline_mode<synchronous>, transform_indices = @transform_2, window_bounds = array<i64: 1, 128>}, {pipeline_mode = #tpu.pipeline_mode<synchronous>, transform_indices = @transform_3, window_bounds = array<i64: 1, 128>}, {pipeline_mode = #tpu.pipeline_mode<synchronous>, transform_indices = @transform_4, window_bounds = array<i64: 1, 128>}, {pipeline_mode = #tpu.pipeline_mode<synchronous>, transform_indices = @transform_5, window_bounds = array<i64: 16, 64>}, {pipeline_mode = #tpu.pipeline_mode<synchronous>, transform_indices = @transform_6, window_bounds = array<i64: 1, 64>}, {pipeline_mode = #tpu.pipeline_mode<synchronous>, transform_indices = @transform_7, window_bounds = array<i64: 64, 16>}, {pipeline_mode = #tpu.pipeline_mode<synchronous>, transform_indices = @transform_8, window_bounds = array<i64: 1, 16>}, {pipeline_mode = #tpu.pipeline_mode<synchronous>, transform_indices = @transform_9, window_bounds = array<i64: 128, 256>}, {pipeline_mode = #tpu.pipeline_mode<synchronous>, transform_indices = @transform_10, window_bounds = array<i64: 1, 256>}, {pipeline_mode = #tpu.pipeline_mode<synchronous>, transform_indices = @transform_11, window_bounds = array<i64: 256, 128>}, {pipeline_mode = #tpu.pipeline_mode<synchronous>, transform_indices = @transform_12, window_bounds = array<i64: 1, 128>}, {transform_indices = @transform_13, window_bounds = array<i64: 8, 16, 128>}]} {
    %c0 = arith.constant 0 : index
    %c0_0 = arith.constant 0 : index
    %c0_1 = arith.constant 0 : index
    %0 = vector.load %arg1[%c0, %c0_0, %c0_1] : memref<8x16x128xf32, #tpu.memory_space<vmem>>, vector<8x16x128xf32>
    %1 = vector.shape_cast %0 : vector<8x16x128xf32> to vector<128x128xf32>
    %c0_2 = arith.constant 0 : index
    %c0_3 = arith.constant 0 : index
    %2 = vector.load %arg2[%c0_2, %c0_3] : memref<1x128xf32, #tpu.memory_space<vmem>>, vector<1x128xf32>
    %c0_4 = arith.constant 0 : index
    %c0_5 = arith.constant 0 : index
    %3 = vector.load %arg3[%c0_4, %c0_5] : memref<1x128xf32, #tpu.memory_space<vmem>>, vector<1x128xf32>
    %cst = arith.constant dense<0.000000e+00> : vector<128xf32>
    %4 = vector.multi_reduction <add>, %1, %cst [1] : vector<128x128xf32> to vector<128xf32>
    %5 = vector.shape_cast %4 : vector<128xf32> to vector<128x1xf32>
    %cst_6 = arith.constant 7.812500e-03 : f32
    %6 = vector.broadcast %cst_6 : f32 to vector<128x1xf32>
    %7 = arith.mulf %5, %6 : vector<128x1xf32>
    %8 = arith.mulf %1, %1 : vector<128x128xf32>
    %cst_7 = arith.constant dense<0.000000e+00> : vector<128xf32>
    %9 = vector.multi_reduction <add>, %8, %cst_7 [1] : vector<128x128xf32> to vector<128xf32>
    %10 = vector.shape_cast %9 : vector<128xf32> to vector<128x1xf32>
    %cst_8 = arith.constant 7.812500e-03 : f32
    %11 = vector.broadcast %cst_8 : f32 to vector<128x1xf32>
    %12 = arith.mulf %10, %11 : vector<128x1xf32>
    %13 = arith.mulf %7, %7 : vector<128x1xf32>
    %14 = arith.subf %12, %13 : vector<128x1xf32>
    %15 = vector.broadcast %7 : vector<128x1xf32> to vector<128x128xf32>
    %16 = arith.subf %1, %15 : vector<128x128xf32>
    %cst_9 = arith.constant 9.99999974E-6 : f32
    %17 = vector.broadcast %cst_9 : f32 to vector<128x1xf32>
    %18 = arith.addf %14, %17 : vector<128x1xf32>
    %19 = math.rsqrt %18 : vector<128x1xf32>
    %20 = vector.broadcast %19 : vector<128x1xf32> to vector<128x128xf32>
    %21 = arith.mulf %16, %20 : vector<128x128xf32>
    %22 = vector.broadcast %2 : vector<1x128xf32> to vector<128x128xf32>
    %23 = arith.mulf %21, %22 : vector<128x128xf32>
    %24 = vector.broadcast %3 : vector<1x128xf32> to vector<128x128xf32>
    %25 = arith.addf %23, %24 : vector<128x128xf32>
    %26 = vector.extract_strided_slice %25 {offsets = [0, 0], sizes = [16, 128], strides = [1, 1]} : vector<128x128xf32> to vector<16x128xf32>
    %27 = tpu.transpose %26, [1, 0] : vector<16x128xf32> -> vector<128x16xf32>
    %28 = vector.extract_strided_slice %25 {offsets = [16, 0], sizes = [16, 128], strides = [1, 1]} : vector<128x128xf32> to vector<16x128xf32>
    %29 = tpu.transpose %28, [1, 0] : vector<16x128xf32> -> vector<128x16xf32>
    %30 = vector.extract_strided_slice %25 {offsets = [32, 0], sizes = [16, 128], strides = [1, 1]} : vector<128x128xf32> to vector<16x128xf32>
    %31 = tpu.transpose %30, [1, 0] : vector<16x128xf32> -> vector<128x16xf32>
    %32 = vector.extract_strided_slice %25 {offsets = [48, 0], sizes = [16, 128], strides = [1, 1]} : vector<128x128xf32> to vector<16x128xf32>
    %33 = tpu.transpose %32, [1, 0] : vector<16x128xf32> -> vector<128x16xf32>
    %34 = vector.extract_strided_slice %25 {offsets = [64, 0], sizes = [16, 128], strides = [1, 1]} : vector<128x128xf32> to vector<16x128xf32>
    %35 = tpu.transpose %34, [1, 0] : vector<16x128xf32> -> vector<128x16xf32>
    %36 = vector.extract_strided_slice %25 {offsets = [80, 0], sizes = [16, 128], strides = [1, 1]} : vector<128x128xf32> to vector<16x128xf32>
    %37 = tpu.transpose %36, [1, 0] : vector<16x128xf32> -> vector<128x16xf32>
    %38 = vector.extract_strided_slice %25 {offsets = [96, 0], sizes = [16, 128], strides = [1, 1]} : vector<128x128xf32> to vector<16x128xf32>
    %39 = tpu.transpose %38, [1, 0] : vector<16x128xf32> -> vector<128x16xf32>
    %40 = vector.extract_strided_slice %25 {offsets = [112, 0], sizes = [16, 128], strides = [1, 1]} : vector<128x128xf32> to vector<16x128xf32>
    %41 = tpu.transpose %40, [1, 0] : vector<16x128xf32> -> vector<128x16xf32>
    %42 = tpu.concatenate %27, %29, %31, %33, %35, %37, %39, %41 in 0 : vector<128x16xf32>, vector<128x16xf32>, vector<128x16xf32>, vector<128x16xf32>, vector<128x16xf32>, vector<128x16xf32>, vector<128x16xf32>, vector<128x16xf32> -> vector<1024x16xf32>
    %43 = arith.truncf %42 : vector<1024x16xf32> to vector<1024x16xbf16>
    %c0_10 = arith.constant 0 : index
    %c0_11 = arith.constant 0 : index
    %44 = vector.load %arg6[%c0_10, %c0_11] : memref<16x64xbf16, #tpu.memory_space<vmem>>, vector<16x64xbf16>
    %cst_12 = arith.constant dense<0.000000e+00> : vector<1024x64xf32>
    %45 = tpu.matmul %43, %44, %cst_12 {dimension_numbers = #tpu.dot_dimension_numbers<[1], [0], [0], [1], [0, 0, 1, 1], [], []>} : vector<1024x16xbf16>, vector<16x64xbf16>, vector<1024x64xf32> -> vector<1024x64xf32>
    %c0_13 = arith.constant 0 : index
    %c0_14 = arith.constant 0 : index
    %46 = vector.load %arg7[%c0_13, %c0_14] : memref<1x64xf32, #tpu.memory_space<vmem>>, vector<1x64xf32>
    %47 = vector.broadcast %46 : vector<1x64xf32> to vector<1024x64xf32>
    %48 = arith.addf %45, %47 : vector<1024x64xf32>
    %49 = arith.mulf %48, %48 : vector<1024x64xf32>
    %50 = arith.mulf %49, %48 : vector<1024x64xf32>
    %cst_15 = arith.constant 5.000000e-01 : f32
    %51 = vector.broadcast %cst_15 : f32 to vector<1024x64xf32>
    %52 = arith.mulf %51, %48 : vector<1024x64xf32>
    %cst_16 = arith.constant 4.471500e-02 : f32
    %53 = vector.broadcast %cst_16 : f32 to vector<1024x64xf32>
    %54 = arith.mulf %53, %50 : vector<1024x64xf32>
    %55 = arith.addf %48, %54 : vector<1024x64xf32>
    %cst_17 = arith.constant 0.797884583 : f32
    %56 = vector.broadcast %cst_17 : f32 to vector<1024x64xf32>
    %57 = arith.mulf %56, %55 : vector<1024x64xf32>
    %58 = math.tanh %57 : vector<1024x64xf32>
    %cst_18 = arith.constant 1.000000e+00 : f32
    %59 = vector.broadcast %cst_18 : f32 to vector<1024x64xf32>
    %60 = arith.addf %59, %58 : vector<1024x64xf32>
    %61 = arith.mulf %52, %60 : vector<1024x64xf32>
    %62 = arith.truncf %61 : vector<1024x64xf32> to vector<1024x64xbf16>
    %c0_19 = arith.constant 0 : index
    %c0_20 = arith.constant 0 : index
    %63 = vector.load %arg8[%c0_19, %c0_20] : memref<64x16xbf16, #tpu.memory_space<vmem>>, vector<64x16xbf16>
    %cst_21 = arith.constant dense<0.000000e+00> : vector<1024x16xf32>
    %64 = tpu.matmul %62, %63, %cst_21 {dimension_numbers = #tpu.dot_dimension_numbers<[1], [0], [0], [1], [0, 0, 1, 1], [], []>} : vector<1024x64xbf16>, vector<64x16xbf16>, vector<1024x16xf32> -> vector<1024x16xf32>
    %c0_22 = arith.constant 0 : index
    %c0_23 = arith.constant 0 : index
    %65 = vector.load %arg9[%c0_22, %c0_23] : memref<1x16xf32, #tpu.memory_space<vmem>>, vector<1x16xf32>
    %66 = vector.broadcast %65 : vector<1x16xf32> to vector<1024x16xf32>
    %67 = arith.addf %64, %66 : vector<1024x16xf32>
    %68 = vector.extract_strided_slice %67 {offsets = [0, 0], sizes = [128, 16], strides = [1, 1]} : vector<1024x16xf32> to vector<128x16xf32>
    %69 = tpu.transpose %68, [1, 0] : vector<128x16xf32> -> vector<16x128xf32>
    %70 = vector.extract_strided_slice %67 {offsets = [128, 0], sizes = [128, 16], strides = [1, 1]} : vector<1024x16xf32> to vector<128x16xf32>
    %71 = tpu.transpose %70, [1, 0] : vector<128x16xf32> -> vector<16x128xf32>
    %72 = vector.extract_strided_slice %67 {offsets = [256, 0], sizes = [128, 16], strides = [1, 1]} : vector<1024x16xf32> to vector<128x16xf32>
    %73 = tpu.transpose %72, [1, 0] : vector<128x16xf32> -> vector<16x128xf32>
    %74 = vector.extract_strided_slice %67 {offsets = [384, 0], sizes = [128, 16], strides = [1, 1]} : vector<1024x16xf32> to vector<128x16xf32>
    %75 = tpu.transpose %74, [1, 0] : vector<128x16xf32> -> vector<16x128xf32>
    %76 = vector.extract_strided_slice %67 {offsets = [512, 0], sizes = [128, 16], strides = [1, 1]} : vector<1024x16xf32> to vector<128x16xf32>
    %77 = tpu.transpose %76, [1, 0] : vector<128x16xf32> -> vector<16x128xf32>
    %78 = vector.extract_strided_slice %67 {offsets = [640, 0], sizes = [128, 16], strides = [1, 1]} : vector<1024x16xf32> to vector<128x16xf32>
    %79 = tpu.transpose %78, [1, 0] : vector<128x16xf32> -> vector<16x128xf32>
    %80 = vector.extract_strided_slice %67 {offsets = [768, 0], sizes = [128, 16], strides = [1, 1]} : vector<1024x16xf32> to vector<128x16xf32>
    %81 = tpu.transpose %80, [1, 0] : vector<128x16xf32> -> vector<16x128xf32>
    %82 = vector.extract_strided_slice %67 {offsets = [896, 0], sizes = [128, 16], strides = [1, 1]} : vector<1024x16xf32> to vector<128x16xf32>
    %83 = tpu.transpose %82, [1, 0] : vector<128x16xf32> -> vector<16x128xf32>
    %84 = tpu.concatenate %69, %71, %73, %75, %77, %79, %81, %83 in 0 : vector<16x128xf32>, vector<16x128xf32>, vector<16x128xf32>, vector<16x128xf32>, vector<16x128xf32>, vector<16x128xf32>, vector<16x128xf32>, vector<16x128xf32> -> vector<128x128xf32>
    %85 = arith.addf %84, %1 : vector<128x128xf32>
    %c0_24 = arith.constant 0 : index
    %c0_25 = arith.constant 0 : index
    %86 = vector.load %arg4[%c0_24, %c0_25] : memref<1x128xf32, #tpu.memory_space<vmem>>, vector<1x128xf32>
    %c0_26 = arith.constant 0 : index
    %c0_27 = arith.constant 0 : index
    %87 = vector.load %arg5[%c0_26, %c0_27] : memref<1x128xf32, #tpu.memory_space<vmem>>, vector<1x128xf32>
    %cst_28 = arith.constant dense<0.000000e+00> : vector<128xf32>
    %88 = vector.multi_reduction <add>, %85, %cst_28 [1] : vector<128x128xf32> to vector<128xf32>
    %89 = vector.shape_cast %88 : vector<128xf32> to vector<128x1xf32>
    %cst_29 = arith.constant 7.812500e-03 : f32
    %90 = vector.broadcast %cst_29 : f32 to vector<128x1xf32>
    %91 = arith.mulf %89, %90 : vector<128x1xf32>
    %92 = arith.mulf %85, %85 : vector<128x128xf32>
    %cst_30 = arith.constant dense<0.000000e+00> : vector<128xf32>
    %93 = vector.multi_reduction <add>, %92, %cst_30 [1] : vector<128x128xf32> to vector<128xf32>
    %94 = vector.shape_cast %93 : vector<128xf32> to vector<128x1xf32>
    %cst_31 = arith.constant 7.812500e-03 : f32
    %95 = vector.broadcast %cst_31 : f32 to vector<128x1xf32>
    %96 = arith.mulf %94, %95 : vector<128x1xf32>
    %97 = arith.mulf %91, %91 : vector<128x1xf32>
    %98 = arith.subf %96, %97 : vector<128x1xf32>
    %99 = vector.broadcast %91 : vector<128x1xf32> to vector<128x128xf32>
    %100 = arith.subf %85, %99 : vector<128x128xf32>
    %cst_32 = arith.constant 9.99999974E-6 : f32
    %101 = vector.broadcast %cst_32 : f32 to vector<128x1xf32>
    %102 = arith.addf %98, %101 : vector<128x1xf32>
    %103 = math.rsqrt %102 : vector<128x1xf32>
    %104 = vector.broadcast %103 : vector<128x1xf32> to vector<128x128xf32>
    %105 = arith.mulf %100, %104 : vector<128x128xf32>
    %106 = vector.broadcast %86 : vector<1x128xf32> to vector<128x128xf32>
    %107 = arith.mulf %105, %106 : vector<128x128xf32>
    %108 = vector.broadcast %87 : vector<1x128xf32> to vector<128x128xf32>
    %109 = arith.addf %107, %108 : vector<128x128xf32>
    %110 = arith.truncf %109 : vector<128x128xf32> to vector<128x128xbf16>
    %c0_33 = arith.constant 0 : index
    %c0_34 = arith.constant 0 : index
    %111 = vector.load %arg10[%c0_33, %c0_34] : memref<128x256xbf16, #tpu.memory_space<vmem>>, vector<128x256xbf16>
    %cst_35 = arith.constant dense<0.000000e+00> : vector<128x256xf32>
    %112 = tpu.matmul %110, %111, %cst_35 {dimension_numbers = #tpu.dot_dimension_numbers<[1], [0], [0], [1], [0, 0, 1, 1], [], []>} : vector<128x128xbf16>, vector<128x256xbf16>, vector<128x256xf32> -> vector<128x256xf32>
    %c0_36 = arith.constant 0 : index
    %c0_37 = arith.constant 0 : index
    %113 = vector.load %arg11[%c0_36, %c0_37] : memref<1x256xf32, #tpu.memory_space<vmem>>, vector<1x256xf32>
    %114 = vector.broadcast %113 : vector<1x256xf32> to vector<128x256xf32>
    %115 = arith.addf %112, %114 : vector<128x256xf32>
    %116 = arith.mulf %115, %115 : vector<128x256xf32>
    %117 = arith.mulf %116, %115 : vector<128x256xf32>
    %cst_38 = arith.constant 5.000000e-01 : f32
    %118 = vector.broadcast %cst_38 : f32 to vector<128x256xf32>
    %119 = arith.mulf %118, %115 : vector<128x256xf32>
    %cst_39 = arith.constant 4.471500e-02 : f32
    %120 = vector.broadcast %cst_39 : f32 to vector<128x256xf32>
    %121 = arith.mulf %120, %117 : vector<128x256xf32>
    %122 = arith.addf %115, %121 : vector<128x256xf32>
    %cst_40 = arith.constant 0.797884583 : f32
    %123 = vector.broadcast %cst_40 : f32 to vector<128x256xf32>
    %124 = arith.mulf %123, %122 : vector<128x256xf32>
    %125 = math.tanh %124 : vector<128x256xf32>
    %cst_41 = arith.constant 1.000000e+00 : f32
    %126 = vector.broadcast %cst_41 : f32 to vector<128x256xf32>
    %127 = arith.addf %126, %125 : vector<128x256xf32>
    %128 = arith.mulf %119, %127 : vector<128x256xf32>
    %129 = arith.truncf %128 : vector<128x256xf32> to vector<128x256xbf16>
    %c0_42 = arith.constant 0 : index
    %c0_43 = arith.constant 0 : index
    %130 = vector.load %arg12[%c0_42, %c0_43] : memref<256x128xbf16, #tpu.memory_space<vmem>>, vector<256x128xbf16>
    %cst_44 = arith.constant dense<0.000000e+00> : vector<128x128xf32>
    %131 = tpu.matmul %129, %130, %cst_44 {dimension_numbers = #tpu.dot_dimension_numbers<[1], [0], [0], [1], [0, 0, 1, 1], [], []>} : vector<128x256xbf16>, vector<256x128xbf16>, vector<128x128xf32> -> vector<128x128xf32>
    %c0_45 = arith.constant 0 : index
    %c0_46 = arith.constant 0 : index
    %132 = vector.load %arg13[%c0_45, %c0_46] : memref<1x128xf32, #tpu.memory_space<vmem>>, vector<1x128xf32>
    %133 = vector.broadcast %132 : vector<1x128xf32> to vector<128x128xf32>
    %134 = arith.addf %131, %133 : vector<128x128xf32>
    %135 = arith.addf %134, %85 : vector<128x128xf32>
    %136 = vector.shape_cast %135 : vector<128x128xf32> to vector<8x16x128xf32>
    %c0_47 = arith.constant 0 : index
    %c0_48 = arith.constant 0 : index
    %c0_49 = arith.constant 0 : index
    %137 = vector.load %arg14[%c0_47, %c0_48, %c0_49] : memref<8x16x128xf32, #tpu.memory_space<vmem>>, vector<8x16x128xf32>
    tpu.vector_store %arg14[%c0_47, %c0_48, %c0_49], %136 {strides = array<i32>} : memref<8x16x128xf32, #tpu.memory_space<vmem>>, vector<8x16x128xf32>,
    return
  }
  func.func @transform_0(%arg0: i32) -> (i32, i32, i32) {
    %c0_i32 = arith.constant 0 : i32
    %c0_i32_0 = arith.constant 0 : i32
    %c0_i32_1 = arith.constant 0 : i32
    return %arg0, %c0_i32, %c0_i32_0 : i32, i32, i32
  }
  func.func @transform_1(%arg0: i32) -> (i32, i32) {
    %c0_i32 = arith.constant 0 : i32
    %c0_i32_0 = arith.constant 0 : i32
    %c0_i32_1 = arith.constant 0 : i32
    return %c0_i32, %c0_i32_0 : i32, i32
  }
  func.func @transform_2(%arg0: i32) -> (i32, i32) {
    %c0_i32 = arith.constant 0 : i32
    %c0_i32_0 = arith.constant 0 : i32
    %c0_i32_1 = arith.constant 0 : i32
    return %c0_i32, %c0_i32_0 : i32, i32
  }
  func.func @transform_3(%arg0: i32) -> (i32, i32) {
    %c0_i32 = arith.constant 0 : i32
    %c0_i32_0 = arith.constant 0 : i32
    %c0_i32_1 = arith.constant 0 : i32
    return %c0_i32, %c0_i32_0 : i32, i32
  }
  func.func @transform_4(%arg0: i32) -> (i32, i32) {
    %c0_i32 = arith.constant 0 : i32
    %c0_i32_0 = arith.constant 0 : i32
    %c0_i32_1 = arith.constant 0 : i32
    return %c0_i32, %c0_i32_0 : i32, i32
  }
  func.func @transform_5(%arg0: i32) -> (i32, i32) {
    %c0_i32 = arith.constant 0 : i32
    %c0_i32_0 = arith.constant 0 : i32
    %c0_i32_1 = arith.constant 0 : i32
    return %c0_i32, %c0_i32_0 : i32, i32
  }
  func.func @transform_6(%arg0: i32) -> (i32, i32) {
    %c0_i32 = arith.constant 0 : i32
    %c0_i32_0 = arith.constant 0 : i32
    %c0_i32_1 = arith.constant 0 : i32
    return %c0_i32, %c0_i32_0 : i32, i32
  }
  func.func @transform_7(%arg0: i32) -> (i32, i32) {
    %c0_i32 = arith.constant 0 : i32
    %c0_i32_0 = arith.constant 0 : i32
    %c0_i32_1 = arith.constant 0 : i32
    return %c0_i32, %c0_i32_0 : i32, i32
  }
  func.func @transform_8(%arg0: i32) -> (i32, i32) {
    %c0_i32 = arith.constant 0 : i32
    %c0_i32_0 = arith.constant 0 : i32
    %c0_i32_1 = arith.constant 0 : i32
    return %c0_i32, %c0_i32_0 : i32, i32
  }
  func.func @transform_9(%arg0: i32) -> (i32, i32) {
    %c0_i32 = arith.constant 0 : i32
    %c0_i32_0 = arith.constant 0 : i32
    %c0_i32_1 = arith.constant 0 : i32
    return %c0_i32, %c0_i32_0 : i32, i32
  }
  func.func @transform_10(%arg0: i32) -> (i32, i32) {
    %c0_i32 = arith.constant 0 : i32
    %c0_i32_0 = arith.constant 0 : i32
    %c0_i32_1 = arith.constant 0 : i32
    return %c0_i32, %c0_i32_0 : i32, i32
  }
  func.func @transform_11(%arg0: i32) -> (i32, i32) {
    %c0_i32 = arith.constant 0 : i32
    %c0_i32_0 = arith.constant 0 : i32
    %c0_i32_1 = arith.constant 0 : i32
    return %c0_i32, %c0_i32_0 : i32, i32
  }
  func.func @transform_12(%arg0: i32) -> (i32, i32) {
    %c0_i32 = arith.constant 0 : i32
    %c0_i32_0 = arith.constant 0 : i32
    %c0_i32_1 = arith.constant 0 : i32
    return %c0_i32, %c0_i32_0 : i32, i32
  }
  func.func @transform_13(%arg0: i32) -> (i32, i32, i32) {
    %c0_i32 = arith.constant 0 : i32
    %c0_i32_0 = arith.constant 0 : i32
    %c0_i32_1 = arith.constant 0 : i32
    return %arg0, %c0_i32, %c0_i32_0 : i32, i32, i32
  }
}

</mosaic_0001>

<bundles_post_ra>
// kernel: mixer_block.1
= control target key start
LH: loop header
LB: loop body
LE: loop exit
PB: predicated region body
PF: predicated region fallthrough
CT: control target
= control target key end

     0   :  { %18 = vsyncpa [#allocation3], 0  ;;  %s7806_s0 = inlined_call_operand.hbm [shape: f32[8,16,128], index: 0, kind: input, shape index: {}]   ;;  %s7807_s1 = inlined_call_operand.vmem [shape: f32[1,128], index: 1, kind: input, shape index: {}]   ;;  %s7808_s2 = inlined_call_operand.vmem [shape: f32[1,128], index: 2, kind: input, shape index: {}]   ;;  %s7809_s3 = inlined_call_operand.vmem [shape: f32[1,128], index: 3, kind: input, shape index: {}]   ;;  %s7810_s4 = inlined_call_operand.vmem [shape: f32[1,128], index: 4, kind: input, shape index: {}]   ;;  %s7811_s5 = inlined_call_operand.vmem [shape: bf16[16,64], index: 5, kind: input, shape index: {}]   ;;  %s7812_s6 = inlined_call_operand.vmem [shape: f32[1,64], index: 6, kind: input, shape index: {}]   ;;  %s7813_s7 = inlined_call_operand.vmem [shape: bf16[64,16], index: 7, kind: input, shape index: {}]   ;;  %s7814_s8 = inlined_call_operand.vmem [shape: f32[1,16], index: 8, kind: input, shape index: {}]   ;;  %s7815_s9 = inlined_call_operand.hbm [shape: bf16[128,256], index: 9, kind: input, shape index: {}]   ;;  %s7816_s10 = inlined_call_operand.vmem [shape: f32[1,256], index: 10, kind: input, shape index: {}]   ;;  %s7817_s11 = inlined_call_operand.hbm [shape: bf16[256,128], index: 11, kind: input, shape index: {}]   ;;  %s7818_s12 = inlined_call_operand.vmem [shape: f32[1,128], index: 12, kind: input, shape index: {}]   ;;  %s7819_s13 = inlined_call_operand.hbm [shape: f32[8,16,128], index: 13, kind: output, shape index: {}]  }
   0x1   :  { %19 = vsyncpa [#allocation6], 0 }
   0x2   :  { %20 = vsyncpa [#allocation4], 0  ;;  %s54_s27 = sshll.u32 %s7815_s9, 4  ;;  %s5609_s28 = smov [#allocation5]   ;;  %s55_s27 = int_to_ptr.hbm [resolvable:$true] %s54_s27 }
   0x3   :  { %s56_s29 = sshll.u32 %s5609_s28, 4  ;;  %s25_s15 = sshll.u32 %s7806_s0, 4  ;;  %s57_s29 = int_to_ptr.vmem [resolvable:$true] %s56_s29  ;;  %s26_s15 = int_to_ptr.hbm [resolvable:$true] %s25_s15 }
   0x4   :  { %s5610_s16 = smov 128   ;;  %s5611_s17 = smov 8  }
   0x5   :  { %62 = dma.hbm_to_vmem [thread:$0]  %s55_s27, 2048, %s57_s29, [#allocation6], %s5610_s16, %s5610_s16, %s5611_s17  }
   0x6   :  { %s5612_s18 = smov [#allocation2]   ;;  %s69_s9 = sshll.u32 %s7817_s11, 4  ;;  %s70_s9 = int_to_ptr.hbm [resolvable:$true] %s69_s9 }
   0x7   :  { %s27_s19 = sshll.u32 %s5612_s18, 4  ;;  %s5613_s0 = smov [#allocation7]   ;;  %s28_s19 = int_to_ptr.vmem [resolvable:$true] %s27_s19 }
   0x8   :  { %33 = dma.hbm_to_vmem [thread:$0]  %s26_s15, 2048, %s28_s19, [#allocation3], %s5610_s16, %s5610_s16, %s5611_s17  }
   0x9   :  { %s71_s22 = sshll.u32 %s5613_s0, 4  ;;  %s5614_s23 = smov 64   ;;  %s72_s22 = int_to_ptr.vmem [resolvable:$true] %s71_s22 }
   0xa   :  { %s5615_s24 = smov 4  }
   0xb   :  { %77 = dma.hbm_to_vmem [thread:$0]  %s70_s9, 2048, %s72_s22, [#allocation6], %s5614_s23, %s5614_s23, %s5615_s24  }
   0xc   :  { %5603 = dma.done.wait [#allocation3], 2048  }
   0xd   :  { %5604 = vsyncadd [#allocation3], 4294965248 }
   0xe   :  { %5605 = dma.done.wait [#allocation6], 4096  }
   0xf   :  { %5606 = vsyncadd [#allocation6], 4294963200  ;;  %v94_v0 = vld [vmem:[#allocation2 + $0x8] sm:$0xff]  ;;  %v93_v1 = vld [vmem:[#allocation2] sm:$0xff]  ;;  %vm833_vm6 = vcmask 130048   ;;  %vm2607_vm10 = vcmask 523264  }
  0x10   :  { %113 = vadd.xlane.f32.xlu1 %v94_v0  ;;  %111 = vadd.xlane.f32.xlu0 %v93_v1  ;;  %v160_v2 = vmul.f32 %v94_v0, %v94_v0  ;;  %v159_v3 = vmul.f32 %v93_v1, %v93_v1  ;;  %v5705_v31 = vld [vmem:[%s7807_s1] ss:$0 sm:$0xff]  ;;  %v5719_v43 = vld [vmem:[#allocation2 + $0x10] sm:$0xff]  ;;  %v5727_v54 = vld [vmem:[#allocation2 + $0x18] sm:$0xff] }
  0x11   :  { %v5710_v34 = vld [vmem:[%s7808_s2] ss:$0 sm:$0xff]  ;;  %v161_v44 = vmul.f32 %v5719_v43, %v5719_v43  ;;  %v162_v56 = vmul.f32 %v5727_v54, %v5727_v54 }
  0x12   :  { %v4863_v42 = vld [vmem:[%s7811_s5] sm:$0xff] }
  0x13   :  { %1033 = vmatpush.bf16.msra.mxu0 %v4863_v42  ;;  %4900 = vmatpush.bf16.msra.mxu3 %v4863_v42 }
  0x18   :  { %177 = vadd.xlane.f32.xlu1 %v160_v2  ;;  %175 = vadd.xlane.f32.xlu0 %v159_v3 }
  0x20   :  { %115 = vadd.xlane.f32.xlu0 %v5719_v43  ;;  %179 = vadd.xlane.f32.xlu1 %v161_v44 }
  0x28   :  { %181 = vadd.xlane.f32.xlu0 %v162_v56 }
  0x83   :  { %v114_v4 = vpop.xlane.xlu1 %113  ;;  %v112_v5 = vpop.xlane.xlu0 %111 }
  0x84   :  { %v144_v6 = vmul.f32 0.0078125, %v114_v4  ;;  %v143_v7 = vmul.f32 0.0078125, %v112_v5 }
  0x86   :  { %v224_v8 = vmul.f32 %v144_v6, %v144_v6  ;;  %v223_v11 = vmul.f32 %v143_v7, %v143_v7  ;;  %v255_v30 = vsub.f32 %v93_v1, %v143_v7  ;;  %v256_v36 = vsub.f32 %v94_v0, %v144_v6 }
  0x8b   :  { %v178_v9 = vpop.xlane.xlu1 %177  ;;  %v176_v10 = vpop.xlane.xlu0 %175 }
  0x8c   :  { %v208_v12 = vmul.f32 0.0078125, %v178_v9  ;;  %v207_v13 = vmul.f32 0.0078125, %v176_v10 }
  0x8e   :  { %v240_v14 = vsub.f32 %v208_v12, %v224_v8  ;;  %v239_v15 = vsub.f32 %v207_v13, %v223_v11 }
  0x90   :  { %v272_v16 = vadd.f32 1e-05, %v240_v14  ;;  %v271_v17 = vadd.f32 1e-05, %v239_v15  ;;  %v5740_v14 = vld [vmem:[%s7812_s6] ss:$0 sm:$0xff] }
  0x91   :  { %v4867_v15 = vld [vmem:[%s7813_s7 + $0x18] sm:$0xff] }
  0x92   :  { %5089 = vrsqrt.f32 %v272_v16  ;;  %vm293_vm1 = vweird.f32 %v271_v17  ;;  %vm303_vm4 = vweird.f32 %v272_v16  ;;  %2804 = vmatpush.bf16.msra.mxu1 %v4867_v15  ;;  %4901 = vmatpush.bf16.msra.mxu2 %v4867_v15 }
  0x93   :  { %5091 = vrsqrt.f32 %v271_v17  ;;  %v116_v5 = vpop.xlane.xlu0 %115  ;;  %v180_v6 = vpop.xlane.xlu1 %179 }
  0x94   :  { %v145_v7 = vmul.f32 0.0078125, %v116_v5  ;;  %v209_v10 = vmul.f32 0.0078125, %v180_v6 }
  0x96   :  { %v225_v9 = vmul.f32 %v145_v7, %v145_v7  ;;  %v257_v44 = vsub.f32 %v5719_v43, %v145_v7 }
  0x98   :  { %v5090_v18 = vpop.eup %5089  ;;  %v241_v12 = vsub.f32 %v209_v10, %v225_v9 }
  0x99   :  { %v5092_v19 = vpop.eup %5091  ;;  %v298_v20 = vmul.f32 %v5090_v18, %v272_v16  ;;  %vm304_vm2 = vweird.f32 %v5090_v18  ;;  %v4866_v16 = vld [vmem:[%s7813_s7 + $0x10] sm:$0xff] }
  0x9a   :  { %v288_v21 = vmul.f32 %v5092_v19, %v271_v17  ;;  %vm294_vm0 = vweird.f32 %v5092_v19  ;;  %vm305_vm5 = vmor %vm303_vm4, %vm304_vm2  ;;  %v273_v13 = vadd.f32 1e-05, %v241_v12  ;;  %2805 = vmatpush.bf16.msra.mxu1 %v4866_v16  ;;  %4902 = vmatpush.bf16.msra.mxu2 %v4866_v16 }
  0x9b   :  { %v299_v22 = vmul.f32 %v5090_v18, %v298_v20  ;;  %vm295_vm3 = vmor %vm293_vm1, %vm294_vm0 }
  0x9c   :  { %v289_v23 = vmul.f32 %v5092_v19, %v288_v21  ;;  %5093 = vrsqrt.f32 %v273_v13  ;;  %v4865_v21 = vld [vmem:[%s7813_s7 + $0x8] sm:$0xff]  ;;  %vm313_vm7 = vweird.f32 %v273_v13 }
  0x9d   :  { %v300_v24 = vmul.f32 0.5, %v299_v22 }
  0x9e   :  { %v290_v25 = vmul.f32 0.5, %v289_v23  ;;  %2806 = vmatpush.bf16.msra.mxu1 %v4865_v21  ;;  %4903 = vmatpush.bf16.msra.mxu2 %v4865_v21 }
  0x9f   :  { %v301_v26 = vsub.f32 1.5, %v300_v24 }
  0xa0   :  { %v291_v27 = vsub.f32 1.5, %v290_v25  ;;  %v4864_v25 = vld [vmem:[%s7813_s7] sm:$0xff] }
  0xa1   :  { %v302_v29 = vmul.f32 %v5090_v18, %v301_v26 }
  0xa2   :  { %v292_v28 = vmul.f32 %v5092_v19, %v291_v27  ;;  %2807 = vmatpush.bf16.msra.mxu1 %v4864_v25  ;;  %4904 = vmatpush.bf16.msra.mxu2 %v4864_v25 }
  0xa3   :  { %v306_v35 = vsel %vm305_vm5, %v5090_v18, %v302_v29 }
  0xa4   :  { %v296_v32 = vsel %vm295_vm3, %v5092_v19, %v292_v28  ;;  %v448_v39 = vmul.f32 %v306_v35, %v256_v36  ;;  %v5094_v19 = vpop.eup %5093 }
  0xa5   :  { %v447_v33 = vmul.f32 %v296_v32, %v255_v30  ;;  %v308_v23 = vmul.f32 %v5094_v19, %v273_v13  ;;  %vm314_vm8 = vweird.f32 %v5094_v19 }
  0xa6   :  { %v467_v40 = vmul.f32 %v5705_v31, %v448_v39  ;;  %vm315_vm9 = vmor %vm313_vm7, %vm314_vm8 }
  0xa7   :  { %v466_v37 = vmul.f32 %v5705_v31, %v447_v33  ;;  %v309_v28 = vmul.f32 %v5094_v19, %v308_v23 }
  0xa8   :  { %v486_v41 = vadd.f32 %v5710_v34, %v467_v40 }
  0xa9   :  { %v485_v38 = vadd.f32 %v5710_v34, %v466_v37  ;;  %v310_v33 = vmul.f32 0.5, %v309_v28 }
  0xab   :  { %501 = vxpose.xlu2.b32.start [1/2] (short) %v485_v38, 128  ;;  %v311_v38 = vsub.f32 1.5, %v310_v33 }
  0xb3   :  { %502 = vxpose.xlu2.b32.end [2/2] (short) %v486_v41, 128 }
 0x144   :  { %v517_v45 = vpop.trf.xlu2 }
 0x14c   :  { %v518_v46 = vpop.trf.xlu2 }
 0x14d   :  { %v757_v47 = vpack.c.bf16 %v518_v46, %v517_v45 }
 0x14f   :  { %4591 = vmatmul.msk.bf16.vlgmr.msra.gmra.mxu0 %vm833_vm6, %v757_v47  ;;  %v312_v47 = vmul.f32 %v5094_v19, %v311_v38 }
 0x154   :  { %v519_v48 = vpop.trf.xlu2 }
 0x15c   :  { %v520_v49 = vpop.trf.xlu2 }
 0x15d   :  { %v758_v50 = vpack.c.bf16 %v520_v49, %v519_v48  ;;  %v316_v49 = vsel %vm315_vm9, %v5094_v19, %v312_v47 }
 0x15f   :  { %4592 = vmatmul.msk.bf16.gmra.mxu0 %vm833_vm6, %v758_v50 }
 0x164   :  { %v521_v51 = vpop.trf.xlu2 }
 0x16c   :  { %v522_v52 = vpop.trf.xlu2 }
 0x16d   :  { %v759_v53 = vpack.c.bf16 %v522_v52, %v521_v51 }
 0x16f   :  { %4593 = vmatmul.msk.bf16.gmra.mxu0 %vm833_vm6, %v759_v53  ;;  %v449_v53 = vmul.f32 %v316_v49, %v257_v44 }
 0x174   :  { %v523_v55 = vpop.trf.xlu2 }
 0x17c   :  { %v524_v57 = vpop.trf.xlu2 }
 0x17d   :  { %v760_v58 = vpack.c.bf16 %v524_v57, %v523_v55 }
 0x17f   :  { %4594 = vmatmul.msk.bf16.gmra.mxu0 %vm833_vm6, %v760_v58  ;;  %v468_v58 = vmul.f32 %v5705_v31, %v449_v53 }
 0x184   :  { %v525_v59 = vpop.trf.xlu2 }
 0x18c   :  { %v526_v60 = vpop.trf.xlu2 }
 0x18d   :  { %v761_v61 = vpack.c.bf16 %v526_v60, %v525_v59 }
 0x18f   :  { %4595 = vmatmul.msk.bf16.gmra.mxu0 %vm833_vm6, %v761_v61 }
 0x194   :  { %117 = vadd.xlane.f32.xlu2 %v5727_v54  ;;  %v527_v62 = vpop.trf.xlu2 }
 0x19c   :  { %v528_v63 = vpop.trf.xlu2 }
 0x19d   :  { %v762_v0 = vpack.c.bf16 %v528_v63, %v527_v62  ;;  %v487_v63 = vadd.f32 %v5710_v34, %v468_v58 }
 0x19f   :  { %4596 = vmatmul.msk.bf16.gmra.mxu0 %vm833_vm6, %v762_v0  ;;  %533 = vxpose.xlu1.b32.start [1/2] (short) %v487_v63, 128 }
 0x1a4   :  { %v529_v1 = vpop.trf.xlu2 }
 0x1ac   :  { %v530_v2 = vpop.trf.xlu2 }
 0x1ad   :  { %v763_v3 = vpack.c.bf16 %v530_v2, %v529_v1 }
 0x1af   :  { %4597 = vmatmul.msk.bf16.gmra.mxu0 %vm833_vm6, %v763_v3 }
 0x1b4   :  { %v531_v4 = vpop.trf.xlu2 }
 0x1bc   :  { %v532_v8 = vpop.trf.xlu2 }
 0x1bd   :  { %v764_v11 = vpack.c.bf16 %v532_v8, %v531_v4 }
 0x1bf   :  { %4598 = vmatmul.msk.bf16.gmra.mxu0 %vm833_vm6, %v764_v11 }
 0x1cc   :  { %v1035_v17 = vpop.f32.mrf.mxu0 }
 0x1cd   :  { %v1036_v18 = vadd.f32 %v5740_v14, %v1035_v17 }
 0x1cf   :  { %v1355_v20 = vmul.f32 %v1036_v18, %v1036_v18  ;;  %v1611_v51 = vmul.f32 0.5, %v1036_v18 }
 0x1d1   :  { %v1483_v22 = vmul.f32 %v1355_v20, %v1036_v18 }
 0x1d3   :  { %v1739_v24 = vmul.f32 0.044715, %v1483_v22 }
 0x1d4   :  { %v1037_v26 = vpop.f32.mrf.mxu0 }
 0x1d5   :  { %v1867_v27 = vadd.f32 %v1739_v24, %v1036_v18  ;;  %v1038_v29 = vadd.f32 %v5740_v14, %v1037_v26 }
 0x1d7   :  { %v1995_v30 = vmul.f32 0.7978846, %v1867_v27  ;;  %v1356_v32 = vmul.f32 %v1038_v29, %v1038_v29  ;;  %v1612_v57 = vmul.f32 0.5, %v1038_v29 }
 0x1d9   :  { %v1484_v35 = vmul.f32 %v1356_v32, %v1038_v29  ;;  %5095 = vtanh.f32 %v1995_v30 }
 0x1db   :  { %v1740_v36 = vmul.f32 0.044715, %v1484_v35 }
 0x1dc   :  { %v1040_v37 = vpop.f32.mrf.mxu0 }
 0x1dd   :  { %v1868_v39 = vadd.f32 %v1740_v36, %v1038_v29  ;;  %v1041_v40 = vadd.f32 %v5740_v14, %v1040_v37 }
 0x1df   :  { %v1357_v41 = vmul.f32 %v1041_v40, %v1041_v40  ;;  %v1996_v42 = vmul.f32 0.7978846, %v1868_v39  ;;  %v5096_v45 = vpop.eup %5095  ;;  %v1613_v13 = vmul.f32 0.5, %v1041_v40 }
 0x1e0   :  { %v2251_v52 = vadd.f32 1.0, %v5096_v45 }
 0x1e1   :  { %v1485_v46 = vmul.f32 %v1357_v41, %v1041_v40  ;;  %5097 = vtanh.f32 %v1996_v42  ;;  %v182_v41 = vpop.xlane.xlu0 %181 }
 0x1e2   :  { %v2379_v62 = vmul.f32 %v2251_v52, %v1611_v51  ;;  %v210_v51 = vmul.f32 0.0078125, %v182_v41 }
 0x1e3   :  { %v1741_v48 = vmul.f32 0.044715, %v1485_v46 }
 0x1e4   :  { %v1042_v50 = vpop.f32.mrf.mxu0 }
 0x1e5   :  { %v1869_v55 = vadd.f32 %v1741_v48, %v1041_v40  ;;  %v1043_v56 = vadd.f32 %v5740_v14, %v1042_v50 }
 0x1e7   :  { %v5098_v59 = vpop.eup %5097  ;;  %v1997_v43 = vmul.f32 0.7978846, %v1869_v55  ;;  %v1358_v60 = vmul.f32 %v1043_v56, %v1043_v56  ;;  %v1614_v18 = vmul.f32 0.5, %v1043_v56 }
 0x1e8   :  { %v2252_v61 = vadd.f32 1.0, %v5098_v59 }
 0x1e9   :  { %v1486_v0 = vmul.f32 %v1358_v60, %v1043_v56  ;;  %5099 = vtanh.f32 %v1997_v43 }
 0x1ea   :  { %v2380_v1 = vmul.f32 %v2252_v61, %v1612_v57 }
 0x1eb   :  { %v1742_v2 = vmul.f32 0.044715, %v1486_v0 }
 0x1ec   :  { %v1045_v3 = vpop.f32.mrf.mxu0  ;;  %v2507_v4 = vpack.c.bf16 %v2380_v1, %v2379_v62 }
 0x1ed   :  { %v1870_v5 = vadd.f32 %v1742_v2, %v1043_v56  ;;  %v1046_v6 = vadd.f32 %v5740_v14, %v1045_v3 }
 0x1ee   :  { %4671 = vmatmul.msk.bf16.vlgmr.msra.gmra.mxu1 %vm2607_vm10, %v2507_v4 }
 0x1ef   :  { %v1359_v7 = vmul.f32 %v1046_v6, %v1046_v6  ;;  %v1998_v8 = vmul.f32 0.7978846, %v1870_v5  ;;  %v5100_v9 = vpop.eup %5099  ;;  %v1615_v39 = vmul.f32 0.5, %v1046_v6 }
 0x1f0   :  { %v2253_v15 = vadd.f32 1.0, %v5100_v9 }
 0x1f1   :  { %v1487_v10 = vmul.f32 %v1359_v7, %v1046_v6  ;;  %5101 = vtanh.f32 %v1998_v8 }
 0x1f2   :  { %v2381_v23 = vmul.f32 %v2253_v15, %v1613_v13 }
 0x1f3   :  { %v1743_v11 = vmul.f32 0.044715, %v1487_v10 }
 0x1f4   :  { %v1047_v12 = vpop.f32.mrf.mxu0 }
 0x1f5   :  { %v1871_v16 = vadd.f32 %v1743_v11, %v1046_v6  ;;  %v1048_v17 = vadd.f32 %v5740_v14, %v1047_v12 }
 0x1f7   :  { %v5102_v19 = vpop.eup %5101  ;;  %v1999_v20 = vmul.f32 0.7978846, %v1871_v16  ;;  %v1360_v21 = vmul.f32 %v1048_v17, %v1048_v17  ;;  %v1616_v45 = vmul.f32 0.5, %v1048_v17 }
 0x1f8   :  { %v2254_v22 = vadd.f32 1.0, %v5102_v19 }
 0x1f9   :  { %v1488_v24 = vmul.f32 %v1360_v21, %v1048_v17  ;;  %5103 = vtanh.f32 %v1999_v20 }
 0x1fa   :  { %v2382_v25 = vmul.f32 %v2254_v22, %v1614_v18 }
 0x1fb   :  { %v1744_v26 = vmul.f32 0.044715, %v1488_v24 }
 0x1fc   :  { %v1050_v27 = vpop.f32.mrf.mxu0  ;;  %v2508_v28 = vpack.c.bf16 %v2382_v25, %v2381_v23 }
 0x1fd   :  { %v1872_v29 = vadd.f32 %v1744_v26, %v1048_v17  ;;  %v1051_v30 = vadd.f32 %v5740_v14, %v1050_v27 }
 0x1fe   :  { %4672 = vmatmul.msk.bf16.gmra.mxu1 %vm2607_vm10, %v2508_v28 }
 0x1ff   :  { %v1361_v32 = vmul.f32 %v1051_v30, %v1051_v30  ;;  %v2000_v33 = vmul.f32 0.7978846, %v1872_v29  ;;  %v5104_v35 = vpop.eup %5103  ;;  %v1617_v6 = vmul.f32 0.5, %v1051_v30 }
 0x200   :  { %v2255_v40 = vadd.f32 1.0, %v5104_v35 }
 0x201   :  { %v1489_v36 = vmul.f32 %v1361_v32, %v1051_v30  ;;  %5105 = vtanh.f32 %v2000_v33 }
 0x202   :  { %v2383_v53 = vmul.f32 %v2255_v40, %v1615_v39 }
 0x203   :  { %v1745_v37 = vmul.f32 0.044715, %v1489_v36 }
 0x204   :  { %v1052_v38 = vpop.f32.mrf.mxu0 }
 0x205   :  { %v1873_v42 = vadd.f32 %v1745_v37, %v1051_v30  ;;  %v1053_v44 = vadd.f32 %v5740_v14, %v1052_v38 }
 0x207   :  { %v5106_v46 = vpop.eup %5105  ;;  %v118_v47 = vpop.xlane.xlu2 %117  ;;  %v2001_v48 = vmul.f32 0.7978846, %v1873_v42  ;;  %v1362_v49 = vmul.f32 %v1053_v44, %v1053_v44  ;;  %v1618_v11 = vmul.f32 0.5, %v1053_v44 }
 0x208   :  { %v146_v50 = vmul.f32 0.0078125, %v118_v47  ;;  %v2256_v52 = vadd.f32 1.0, %v5106_v46 }
 0x209   :  { %v1490_v55 = vmul.f32 %v1362_v49, %v1053_v44  ;;  %5107 = vtanh.f32 %v2001_v48 }
 0x20a   :  { %v226_v56 = vmul.f32 %v146_v50, %v146_v50  ;;  %v2384_v57 = vmul.f32 %v2256_v52, %v1616_v45  ;;  %v258_v33 = vsub.f32 %v5727_v54, %v146_v50 }
 0x20b   :  { %v1746_v58 = vmul.f32 0.044715, %v1490_v55 }
 0x20c   :  { %v242_v59 = vsub.f32 %v210_v51, %v226_v56  ;;  %v1055_v43 = vpop.f32.mrf.mxu0  ;;  %v2509_v60 = vpack.c.bf16 %v2384_v57, %v2383_v53 }
 0x20d   :  { %v1874_v61 = vadd.f32 %v1746_v58, %v1053_v44  ;;  %v1056_v62 = vadd.f32 %v5740_v14, %v1055_v43 }
 0x20e   :  { %v274_v63 = vadd.f32 1e-05, %v242_v59  ;;  %4673 = vmatmul.msk.bf16.gmra.mxu1 %vm2607_vm10, %v2509_v60 }
 0x20f   :  { %v1363_v0 = vmul.f32 %v1056_v62, %v1056_v62  ;;  %v2002_v1 = vmul.f32 0.7978846, %v1874_v61  ;;  %v5108_v2 = vpop.eup %5107  ;;  %v1619_v42 = vmul.f32 0.5, %v1056_v62 }
 0x210   :  { %5109 = vrsqrt.f32 %v274_v63  ;;  %v2257_v7 = vadd.f32 1.0, %v5108_v2  ;;  %vm323_vm12 = vweird.f32 %v274_v63 }
 0x211   :  { %v1491_v3 = vmul.f32 %v1363_v0, %v1056_v62  ;;  %5111 = vtanh.f32 %v2002_v1 }
 0x212   :  { %v2385_v18 = vmul.f32 %v2257_v7, %v1617_v6 }
 0x213   :  { %v1747_v4 = vmul.f32 0.044715, %v1491_v3 }
 0x214   :  { %v1057_v5 = vpop.f32.mrf.mxu0 }
 0x215   :  { %v1875_v8 = vadd.f32 %v1747_v4, %v1056_v62  ;;  %v1058_v9 = vadd.f32 %v5740_v14, %v1057_v5 }
 0x216   :  { %v5110_v10 = vpop.eup %5109 }
 0x217   :  { %v5112_v12 = vpop.eup %5111  ;;  %v318_v13 = vmul.f32 %v5110_v10, %v274_v63  ;;  %v2003_v15 = vmul.f32 0.7978846, %v1875_v8  ;;  %v1364_v16 = vmul.f32 %v1058_v9, %v1058_v9  ;;  %vm324_vm11 = vweird.f32 %v5110_v10 }
 0x218   :  { %v2258_v17 = vadd.f32 1.0, %v5112_v12  ;;  %vm325_vm13 = vmor %vm323_vm12, %vm324_vm11  ;;  %v1620_v48 = vmul.f32 0.5, %v1058_v9 }
 0x219   :  { %v319_v19 = vmul.f32 %v5110_v10, %v318_v13  ;;  %v1492_v20 = vmul.f32 %v1364_v16, %v1058_v9  ;;  %5113 = vtanh.f32 %v2003_v15 }
 0x21a   :  { %v2386_v21 = vmul.f32 %v2258_v17, %v1618_v11 }
 0x21b   :  { %v320_v22 = vmul.f32 0.5, %v319_v19  ;;  %v1748_v23 = vmul.f32 0.044715, %v1492_v20  ;;  %v5781_v20 = vld [vmem:[#allocation2 + $0x20] sm:$0xff] }
 0x21c   :  { %v1060_v24 = vpop.f32.mrf.mxu0  ;;  %v2510_v25 = vpack.c.bf16 %v2386_v21, %v2385_v18  ;;  %119 = vadd.xlane.f32.xlu0 %v5781_v20 }
 0x21d   :  { %v321_v26 = vsub.f32 1.5, %v320_v22  ;;  %v1876_v27 = vadd.f32 %v1748_v23, %v1058_v9  ;;  %v1061_v28 = vadd.f32 %v5740_v14, %v1060_v24 }
 0x21e   :  { %4674 = vmatmul.msk.bf16.gmra.mxu1 %vm2607_vm10, %v2510_v25 }
 0x21f   :  { %v322_v29 = vmul.f32 %v5110_v10, %v321_v26  ;;  %v1365_v30 = vmul.f32 %v1061_v28, %v1061_v28  ;;  %v2004_v32 = vmul.f32 0.7978846, %v1876_v27  ;;  %v5114_v35 = vpop.eup %5113  ;;  %v1621_v2 = vmul.f32 0.5, %v1061_v28 }
 0x220   :  { %v2259_v44 = vadd.f32 1.0, %v5114_v35  ;;  %v163_v26 = vmul.f32 %v5781_v20, %v5781_v20 }
 0x221   :  { %v326_v36 = vsel %vm325_vm13, %v5110_v10, %v322_v29  ;;  %v1493_v37 = vmul.f32 %v1365_v30, %v1061_v28  ;;  %5115 = vtanh.f32 %v2004_v32 }
 0x222   :  { %v450_v38 = vmul.f32 %v326_v36, %v258_v33  ;;  %v2387_v52 = vmul.f32 %v2259_v44, %v1619_v42 }
 0x223   :  { %v1749_v39 = vmul.f32 0.044715, %v1493_v37 }
 0x224   :  { %v469_v40 = vmul.f32 %v5705_v31, %v450_v38  ;;  %v1062_v41 = vpop.f32.mrf.mxu0  ;;  %183 = vadd.xlane.f32.xlu0 %v163_v26 }
 0x225   :  { %v1877_v45 = vadd.f32 %v1749_v39, %v1061_v28  ;;  %v1063_v46 = vadd.f32 %v5740_v14, %v1062_v41 }
 0x226   :  { %v488_v47 = vadd.f32 %v5710_v34, %v469_v40 }
 0x227   :  { %v5116_v49 = vpop.eup %5115  ;;  %v2005_v54 = vmul.f32 0.7978846, %v1877_v45  ;;  %v1366_v50 = vmul.f32 %v1063_v46, %v1063_v46  ;;  %v1622_v6 = vmul.f32 0.5, %v1063_v46  ;;  %v5787_v45 = vld [vmem:[#allocation2 + $0x28] sm:$0xff] }
 0x228   :  { %534 = vxpose.xlu1.b32.end [2/2] (short) %v488_v47, 128  ;;  %v2260_v51 = vadd.f32 1.0, %v5116_v49 }
 0x229   :  { %v1494_v53 = vmul.f32 %v1366_v50, %v1063_v46  ;;  %5117 = vtanh.f32 %v2005_v54  ;;  %v164_v50 = vmul.f32 %v5787_v45, %v5787_v45 }
 0x22a   :  { %v2388_v55 = vmul.f32 %v2260_v51, %v1620_v48 }
 0x22b   :  { %v1750_v56 = vmul.f32 0.044715, %v1494_v53 }
 0x22c   :  { %v1065_v57 = vpop.f32.mrf.mxu0  ;;  %v2511_v58 = vpack.c.bf16 %v2388_v55, %v2387_v52  ;;  %121 = vadd.xlane.f32.xlu0 %v5787_v45 }
 0x22d   :  { %v1878_v59 = vadd.f32 %v1750_v56, %v1063_v46  ;;  %v1066_v43 = vadd.f32 %v5740_v14, %v1065_v57 }
 0x22e   :  { %4675 = vmatmul.msk.bf16.gmra.mxu1 %vm2607_vm10, %v2511_v58  ;;  %v5794_v58 = vld [vmem:[#allocation2 + $0x58] sm:$0xff] }
 0x22f   :  { %v1367_v60 = vmul.f32 %v1066_v43, %v1066_v43  ;;  %v2006_v61 = vmul.f32 0.7978846, %v1878_v59  ;;  %v5118_v62 = vpop.eup %5117  ;;  %v1623_v28 = vmul.f32 0.5, %v1066_v43  ;;  %133 = vadd.xlane.f32.xlu2 %v5794_v58  ;;  %v170_v59 = vmul.f32 %v5794_v58, %v5794_v58 }
 0x230   :  { %v2261_v3 = vadd.f32 1.0, %v5118_v62 }
 0x231   :  { %v1495_v63 = vmul.f32 %v1367_v60, %v1066_v43  ;;  %5119 = vtanh.f32 %v2006_v61  ;;  %v5804_v61 = vld [vmem:[#allocation2 + $0x38] sm:$0xff] }
 0x232   :  { %v2389_v11 = vmul.f32 %v2261_v3, %v1621_v2  ;;  %v166_v62 = vmul.f32 %v5804_v61, %v5804_v61 }
 0x233   :  { %v1751_v0 = vmul.f32 0.044715, %v1495_v63 }
 0x234   :  { %v1067_v1 = vpop.f32.mrf.mxu0  ;;  %185 = vadd.xlane.f32.xlu0 %v164_v50 }
 0x235   :  { %v1879_v4 = vadd.f32 %v1751_v0, %v1066_v43  ;;  %v1068_v5 = vadd.f32 %v5740_v14, %v1067_v1  ;;  %v5799_v43 = vld [vmem:[#allocation2 + $0x30] sm:$0xff] }
 0x236   :  { %v165_v60 = vmul.f32 %v5799_v43, %v5799_v43  ;;  %v5809_v0 = vld [vmem:[#allocation2 + $0x50] sm:$0xff] }
 0x237   :  { %v5120_v7 = vpop.eup %5119  ;;  %v2007_v8 = vmul.f32 0.7978846, %v1879_v4  ;;  %v1368_v9 = vmul.f32 %v1068_v5, %v1068_v5  ;;  %v1624_v33 = vmul.f32 0.5, %v1068_v5  ;;  %197 = vadd.xlane.f32.xlu2 %v170_v59  ;;  %v169_v2 = vmul.f32 %v5809_v0, %v5809_v0 }
 0x238   :  { %v2262_v10 = vadd.f32 1.0, %v5120_v7 }
 0x239   :  { %v1496_v12 = vmul.f32 %v1368_v9, %v1068_v5  ;;  %5121 = vtanh.f32 %v2007_v8 }
 0x23a   :  { %v2390_v13 = vmul.f32 %v2262_v10, %v1622_v6  ;;  %v5814_v6 = vld [vmem:[#allocation2 + $0x40] sm:$0xff] }
 0x23b   :  { %v1752_v15 = vmul.f32 0.044715, %v1496_v12  ;;  %v167_v8 = vmul.f32 %v5814_v6, %v5814_v6 }
 0x23c   :  { %v1070_v16 = vpop.f32.mrf.mxu0  ;;  %v2512_v17 = vpack.c.bf16 %v2390_v13, %v2389_v11  ;;  %195 = vadd.xlane.f32.xlu0 %v169_v2 }
 0x23d   :  { %v1880_v18 = vadd.f32 %v1752_v15, %v1068_v5  ;;  %v1071_v19 = vadd.f32 %v5740_v14, %v1070_v16 }
 0x23e   :  { %4676 = vmatmul.msk.bf16.gmra.mxu1 %vm2607_vm10, %v2512_v17 }
 0x23f   :  { %v1369_v21 = vmul.f32 %v1071_v19, %v1071_v19  ;;  %v2008_v22 = vmul.f32 0.7978846, %v1880_v18  ;;  %v5122_v23 = vpop.eup %5121  ;;  %v1625_v49 = vmul.f32 0.5, %v1071_v19  ;;  %123 = vadd.xlane.f32.xlu2 %v5799_v43 }
 0x240   :  { %v2263_v29 = vadd.f32 1.0, %v5122_v23 }
 0x241   :  { %v1497_v24 = vmul.f32 %v1369_v21, %v1071_v19  ;;  %5123 = vtanh.f32 %v2008_v22 }
 0x242   :  { %v2391_v39 = vmul.f32 %v2263_v29, %v1623_v28 }
 0x243   :  { %v1753_v25 = vmul.f32 0.044715, %v1497_v24 }
 0x244   :  { %v1072_v27 = vpop.f32.mrf.mxu0  ;;  %191 = vadd.xlane.f32.xlu0 %v167_v8  ;;  %v5831_v8 = vld [vmem:[#allocation2 + $0x70] sm:$0xff] }
 0x245   :  { %v1881_v30 = vadd.f32 %v1753_v25, %v1071_v19  ;;  %v1073_v32 = vadd.f32 %v5740_v14, %v1072_v27 }
 0x247   :  { %v5124_v35 = vpop.eup %5123  ;;  %v2009_v36 = vmul.f32 0.7978846, %v1881_v30  ;;  %v1370_v37 = vmul.f32 %v1073_v32, %v1073_v32  ;;  %v1626_v51 = vmul.f32 0.5, %v1073_v32  ;;  %187 = vadd.xlane.f32.xlu2 %v165_v60 }
 0x248   :  { %v2264_v38 = vadd.f32 1.0, %v5124_v35 }
 0x249   :  { %v1498_v40 = vmul.f32 %v1370_v37, %v1073_v32  ;;  %5125 = vtanh.f32 %v2009_v36 }
 0x24a   :  { %v2392_v41 = vmul.f32 %v2264_v38, %v1624_v33 }
 0x24b   :  { %v1754_v42 = vmul.f32 0.044715, %v1498_v40 }
 0x24c   :  { %v2513_v44 = vpack.c.bf16 %v2392_v41, %v2391_v39 }
 0x24d   :  { %v1882_v46 = vadd.f32 %v1754_v42, %v1073_v32 }
 0x24e   :  { %4677 = vmatmul.msk.bf16.gmra.mxu1 %vm2607_vm10, %v2513_v44 }
 0x24f   :  { %v2010_v47 = vmul.f32 0.7978846, %v1882_v46  ;;  %v5126_v48 = vpop.eup %5125  ;;  %125 = vadd.xlane.f32.xlu2 %v5804_v61 }
 0x250   :  { %v2265_v54 = vadd.f32 1.0, %v5126_v48 }
 0x251   :  { %5127 = vtanh.f32 %v2010_v47 }
 0x252   :  { %v2393_v55 = vmul.f32 %v2265_v54, %v1625_v49  ;;  %v105_v54 = vld [vmem:[#allocation2 + $0x60] sm:$0xff] }
 0x257   :  { %v5128_v52 = vpop.eup %5127  ;;  %189 = vadd.xlane.f32.xlu2 %v166_v62  ;;  %v106_v62 = vld [vmem:[#allocation2 + $0x68] sm:$0xff] }
 0x258   :  { %v2266_v53 = vadd.f32 1.0, %v5128_v52 }
 0x25a   :  { %v2394_v56 = vmul.f32 %v2266_v53, %v1626_v51 }
 0x25c   :  { %v2514_v57 = vpack.c.bf16 %v2394_v56, %v2393_v55 }
 0x25e   :  { %4678 = vmatmul.msk.bf16.gmra.mxu1 %vm2607_vm10, %v2514_v57  ;;  %v171_v57 = vmul.f32 %v105_v54, %v105_v54 }
 0x28f   :  { %v120_v4 = vpop.xlane.xlu0 %119 }
 0x290   :  { %v147_v5 = vmul.f32 0.0078125, %v120_v4  ;;  %v102_v4 = vld [vmem:[#allocation2 + $0x48] sm:$0xff] }
 0x292   :  { %v227_v9 = vmul.f32 %v147_v5, %v147_v5  ;;  %v259_v37 = vsub.f32 %v5781_v20, %v147_v5 }
 0x297   :  { %v184_v10 = vpop.xlane.xlu0 %183 }
 0x298   :  { %v211_v11 = vmul.f32 0.0078125, %v184_v10 }
 0x29a   :  { %v243_v12 = vsub.f32 %v211_v11, %v227_v9  ;;  %v173_v11 = vmul.f32 %v5831_v8, %v5831_v8 }
 0x29c   :  { %v275_v16 = vadd.f32 1e-05, %v243_v12 }
 0x29e   :  { %5129 = vrsqrt.f32 %v275_v16  ;;  %vm333_vm14 = vweird.f32 %v275_v16 }
 0x29f   :  { %v122_v17 = vpop.xlane.xlu0 %121 }
 0x2a0   :  { %v148_v18 = vmul.f32 0.0078125, %v122_v17 }
 0x2a2   :  { %v228_v23 = vmul.f32 %v148_v18, %v148_v18  ;;  %v260_v20 = vsub.f32 %v5787_v45, %v148_v18 }
 0x2a4   :  { %v5130_v21 = vpop.eup %5129 }
 0x2a5   :  { %v328_v22 = vmul.f32 %v5130_v21, %v275_v16  ;;  %vm334_vm15 = vweird.f32 %v5130_v21 }
 0x2a6   :  { %vm335_vm0 = vmor %vm333_vm14, %vm334_vm15 }
 0x2a7   :  { %v186_v24 = vpop.xlane.xlu0 %185  ;;  %v329_v26 = vmul.f32 %v5130_v21, %v328_v22 }
 0x2a8   :  { %v212_v25 = vmul.f32 0.0078125, %v186_v24 }
 0x2a9   :  { %v330_v32 = vmul.f32 0.5, %v329_v26 }
 0x2aa   :  { %v244_v27 = vsub.f32 %v212_v25, %v228_v23 }
 0x2ab   :  { %v331_v33 = vsub.f32 1.5, %v330_v32 }
 0x2ac   :  { %v276_v30 = vadd.f32 1e-05, %v244_v27 }
 0x2ad   :  { %v332_v39 = vmul.f32 %v5130_v21, %v331_v33 }
 0x2ae   :  { %5131 = vrsqrt.f32 %v276_v30  ;;  %vm343_vm1 = vweird.f32 %v276_v30 }
 0x2af   :  { %v336_v41 = vsel %vm335_vm0, %v5130_v21, %v332_v39 }
 0x2b0   :  { %v451_v44 = vmul.f32 %v336_v41, %v259_v37 }
 0x2b2   :  { %v470_v48 = vmul.f32 %v5705_v31, %v451_v44 }
 0x2b4   :  { %v5132_v36 = vpop.eup %5131  ;;  %v489_v50 = vadd.f32 %v5710_v34, %v470_v48 }
 0x2b5   :  { %v338_v38 = vmul.f32 %v5132_v36, %v276_v30  ;;  %vm344_vm2 = vweird.f32 %v5132_v36 }
 0x2b6   :  { %vm345_vm3 = vmor %vm343_vm1, %vm344_vm2  ;;  %565 = vxpose.xlu0.b32.start [1/2] (short) %v489_v50, 128 }
 0x2b7   :  { %v339_v40 = vmul.f32 %v5132_v36, %v338_v38 }
 0x2b9   :  { %v340_v42 = vmul.f32 0.5, %v339_v40 }
 0x2bb   :  { %v341_v47 = vsub.f32 1.5, %v340_v42 }
 0x2bd   :  { %v342_v51 = vmul.f32 %v5132_v36, %v341_v47 }
 0x2bf   :  { %v346_v52 = vsel %vm345_vm3, %v5132_v36, %v342_v51 }
 0x2c0   :  { %v452_v53 = vmul.f32 %v346_v52, %v260_v20 }
 0x2c2   :  { %v471_v55 = vmul.f32 %v5705_v31, %v452_v53 }
 0x2c4   :  { %v549_v63 = vpop.trf.xlu1  ;;  %v490_v59 = vadd.f32 %v5710_v34, %v471_v55  ;;  %v134_v34 = vpop.xlane.xlu2 %133 }
 0x2c6   :  { %566 = vxpose.xlu0.b32.end [2/2] (short) %v490_v59, 128 }
 0x2cc   :  { %v550_v1 = vpop.trf.xlu1  ;;  %v198_v9 = vpop.xlane.xlu2 %197 }
 0x2cd   :  { %v765_v3 = vpack.c.bf16 %v550_v1, %v549_v63  ;;  %v172_v1 = vmul.f32 %v106_v62, %v106_v62  ;;  %v218_v40 = vmul.f32 0.0078125, %v198_v9 }
 0x2cf   :  { %4599 = vmatmul.msk.bf16.gmra.mxu0 %vm833_vm6, %v765_v3 }
 0x2d4   :  { %v551_v7 = vpop.trf.xlu1  ;;  %v124_v12 = vpop.xlane.xlu2 %123 }
 0x2d5   :  { %v5844_v24 = vmul.f32 0.0078125, %v124_v12 }
 0x2d7   :  { %v229_v30 = vmul.f32 %v5844_v24, %v5844_v24 }
 0x2dc   :  { %v552_v13 = vpop.trf.xlu1  ;;  %v188_v16 = vpop.xlane.xlu2 %187 }
 0x2dd   :  { %v766_v15 = vpack.c.bf16 %v552_v13, %v551_v7  ;;  %v213_v32 = vmul.f32 0.0078125, %v188_v16 }
 0x2df   :  { %4600 = vmatmul.msk.bf16.gmra.mxu0 %vm833_vm6, %v766_v15  ;;  %v5837_v15 = vld [vmem:[#allocation2 + $0x78] sm:$0xff]  ;;  %v245_v41 = vsub.f32 %v213_v32, %v229_v30 }
 0x2e0   :  { %v174_v17 = vmul.f32 %v5837_v15, %v5837_v15 }
 0x2e1   :  { %v5858_v20 = vadd.f32 1e-05, %v245_v41 }
 0x2e3   :  { %vm353_vm4 = vweird.f32 %v5858_v20 }
 0x2e4   :  { %v553_v19 = vpop.trf.xlu1  ;;  %v126_v21 = vpop.xlane.xlu2 %125 }
 0x2e5   :  { %v5851_v33 = vmul.f32 0.0078125, %v126_v21 }
 0x2e7   :  { %v230_v42 = vmul.f32 %v5851_v33, %v5851_v33 }
 0x2ec   :  { %v554_v28 = vpop.trf.xlu1  ;;  %v190_v37 = vpop.xlane.xlu2 %189 }
 0x2ed   :  { %v767_v29 = vpack.c.bf16 %v554_v28, %v553_v19  ;;  %v214_v44 = vmul.f32 0.0078125, %v190_v37 }
 0x2ef   :  { %4601 = vmatmul.msk.bf16.gmra.mxu0 %vm833_vm6, %v767_v29  ;;  %v5847_v29 = vmul.f32 0.0078125, %v134_v34  ;;  %v246_v50 = vsub.f32 %v214_v44, %v230_v42 }
 0x2f1   :  { %v234_v39 = vmul.f32 %v5847_v29, %v5847_v29 }
 0x2f4   :  { %v555_v35 = vpop.trf.xlu1 }
 0x2f8   :  { %131 = vadd.xlane.f32.xlu1 %v5809_v0 }
 0x2fc   :  { %v556_v46 = vpop.trf.xlu1 }
 0x2fd   :  { %v768_v49 = vpack.c.bf16 %v556_v46, %v555_v35 }
 0x2ff   :  { %4602 = vmatmul.msk.bf16.gmra.mxu0 %vm833_vm6, %v768_v49 }
 0x300   :  { %135 = vadd.xlane.f32.xlu1 %v105_v54  ;;  %v250_v54 = vsub.f32 %v218_v40, %v234_v39 }
 0x304   :  { %v557_v56 = vpop.trf.xlu1 }
 0x308   :  { %199 = vadd.xlane.f32.xlu1 %v171_v57  ;;  %v5863_v57 = vadd.f32 1e-05, %v246_v50 }
 0x30a   :  { %vm363_vm11 = vweird.f32 %v5863_v57 }
 0x30c   :  { %v558_v60 = vpop.trf.xlu1 }
 0x30d   :  { %v769_v45 = vpack.c.bf16 %v558_v60, %v557_v56  ;;  %v5860_v56 = vadd.f32 1e-05, %v250_v54 }
 0x30f   :  { %4603 = vmatmul.msk.bf16.gmra.mxu0 %vm833_vm6, %v769_v45  ;;  %vm403_vm7 = vweird.f32 %v5860_v56 }
 0x310   :  { %137 = vadd.xlane.f32.xlu1 %v106_v62 }
 0x314   :  { %v559_v63 = vpop.trf.xlu1 }
 0x318   :  { %201 = vadd.xlane.f32.xlu1 %v172_v1 }
 0x31c   :  { %v560_v2 = vpop.trf.xlu1 }
 0x31d   :  { %v770_v3 = vpack.c.bf16 %v560_v2, %v559_v63 }
 0x31f   :  { %4604 = vmatmul.msk.bf16.gmra.mxu0 %vm833_vm6, %v770_v3 }
 0x320   :  { %127 = vadd.xlane.f32.xlu1 %v5814_v6 }
 0x324   :  { %v561_v31 = vpop.trf.xlu1 }
 0x328   :  { %129 = vadd.xlane.f32.xlu1 %v102_v4 }
 0x32c   :  { %v562_v5 = vpop.trf.xlu1 }
 0x32d   :  { %v771_v7 = vpack.c.bf16 %v562_v5, %v561_v31 }
 0x32f   :  { %4605 = vmatmul.msk.bf16.gmra.mxu0 %vm833_vm6, %v771_v7 }
 0x330   :  { %139 = vadd.xlane.f32.xlu1 %v5831_v8 }
 0x334   :  { %v563_v10 = vpop.trf.xlu1 }
 0x338   :  { %203 = vadd.xlane.f32.xlu1 %v173_v11 }
 0x33c   :  { %v564_v6 = vpop.trf.xlu1 }
 0x33d   :  { %v772_v13 = vpack.c.bf16 %v564_v6, %v563_v10  ;;  %v196_v10 = vpop.xlane.xlu0 %195 }
 0x33f   :  { %4606 = vmatmul.msk.bf16.gmra.mxu0 %vm833_vm6, %v772_v13 }
 0x340   :  { %141 = vadd.xlane.f32.xlu1 %v5837_v15 }
 0x348   :  { %205 = vadd.xlane.f32.xlu1 %v174_v17 }
 0x34c   :  { %v1075_v18 = vpop.f32.mrf.mxu0 }
 0x34d   :  { %v1076_v19 = vadd.f32 %v5740_v14, %v1075_v18 }
 0x34f   :  { %v1371_v22 = vmul.f32 %v1076_v19, %v1076_v19  ;;  %v1627_v45 = vmul.f32 0.5, %v1076_v19 }
 0x351   :  { %v1499_v23 = vmul.f32 %v1371_v22, %v1076_v19 }
 0x353   :  { %v1755_v25 = vmul.f32 0.044715, %v1499_v23 }
 0x354   :  { %v1077_v26 = vpop.f32.mrf.mxu0 }
 0x355   :  { %v1883_v27 = vadd.f32 %v1755_v25, %v1076_v19  ;;  %v1078_v28 = vadd.f32 %v5740_v14, %v1077_v26  ;;  %v217_v19 = vmul.f32 0.0078125, %v196_v10 }
 0x357   :  { %v2011_v35 = vmul.f32 0.7978846, %v1883_v27  ;;  %v1372_v36 = vmul.f32 %v1078_v28, %v1078_v28  ;;  %v1628_v2 = vmul.f32 0.5, %v1078_v28 }
 0x359   :  { %v1500_v38 = vmul.f32 %v1372_v36, %v1078_v28  ;;  %5133 = vtanh.f32 %v2011_v35 }
 0x35b   :  { %v1756_v46 = vmul.f32 0.044715, %v1500_v38 }
 0x35c   :  { %v1080_v47 = vpop.f32.mrf.mxu0 }
 0x35d   :  { %v1884_v48 = vadd.f32 %v1756_v46, %v1078_v28  ;;  %v1081_v49 = vadd.f32 %v5740_v14, %v1080_v47 }
 0x35f   :  { %v1373_v51 = vmul.f32 %v1081_v49, %v1081_v49  ;;  %v2012_v52 = vmul.f32 0.7978846, %v1884_v48  ;;  %v5134_v53 = vpop.eup %5133  ;;  %v1629_v48 = vmul.f32 0.5, %v1081_v49 }
 0x360   :  { %v2267_v62 = vadd.f32 1.0, %v5134_v53 }
 0x361   :  { %v1501_v55 = vmul.f32 %v1373_v51, %v1081_v49  ;;  %5135 = vtanh.f32 %v2012_v52 }
 0x362   :  { %5137 = vrsqrt.f32 %v5858_v20  ;;  %v2395_v7 = vmul.f32 %v2267_v62, %v1627_v45 }
 0x363   :  { %v1757_v59 = vmul.f32 0.044715, %v1501_v55  ;;  %5139 = vrsqrt.f32 %v5860_v56 }
 0x364   :  { %v1082_v60 = vpop.f32.mrf.mxu0  ;;  %5141 = vrsqrt.f32 %v5863_v57 }
 0x365   :  { %v1885_v63 = vadd.f32 %v1757_v59, %v1081_v49  ;;  %v1083_v1 = vadd.f32 %v5740_v14, %v1082_v60 }
 0x367   :  { %v5136_v3 = vpop.eup %5135  ;;  %v2013_v31 = vmul.f32 0.7978846, %v1885_v63  ;;  %v1374_v4 = vmul.f32 %v1083_v1, %v1083_v1  ;;  %v1630_v53 = vmul.f32 0.5, %v1083_v1 }
 0x368   :  { %v5868_v34 = vpop.eup %5137  ;;  %v2268_v5 = vadd.f32 1.0, %v5136_v3 }
 0x369   :  { %v1502_v9 = vmul.f32 %v1374_v4, %v1083_v1  ;;  %v348_v12 = vmul.f32 %v5868_v34, %v5858_v20  ;;  %5143 = vtanh.f32 %v2013_v31  ;;  %v5872_v16 = vpop.eup %5139  ;;  %vm354_vm5 = vweird.f32 %v5868_v34 }
 0x36a   :  { %v2396_v11 = vmul.f32 %v2268_v5, %v1628_v2  ;;  %v5876_v22 = vpop.eup %5141  ;;  %v398_v27 = vmul.f32 %v5872_v16, %v5860_v56  ;;  %vm5915_vm8 = vmor %vm353_vm4, %vm354_vm5  ;;  %vm404_vm9 = vweird.f32 %v5872_v16 }
 0x36b   :  { %v1758_v6 = vmul.f32 0.044715, %v1502_v9  ;;  %v132_v13 = vpop.xlane.xlu1 %131  ;;  %v349_v28 = vmul.f32 %v5868_v34, %v348_v12  ;;  %v358_v35 = vmul.f32 %v5876_v22, %v5863_v57  ;;  %vm364_vm12 = vweird.f32 %v5876_v22  ;;  %vm5951_vm15 = vmor %vm403_vm7, %vm404_vm9 }
 0x36c   :  { %v5874_v17 = vmul.f32 0.0078125, %v132_v13  ;;  %v1085_v18 = vpop.f32.mrf.mxu0  ;;  %v2515_v21 = vpack.c.bf16 %v2396_v11, %v2395_v7  ;;  %v399_v40 = vmul.f32 %v5872_v16, %v398_v27  ;;  %vm5940_vm13 = vmor %vm363_vm11, %vm364_vm12 }
 0x36d   :  { %v1886_v23 = vadd.f32 %v1758_v6, %v1083_v1  ;;  %v5879_v25 = vadd.f32 %v5740_v14, %v1085_v18  ;;  %v350_v41 = vmul.f32 0.5, %v349_v28  ;;  %v359_v46 = vmul.f32 %v5876_v22, %v358_v35 }
 0x36e   :  { %v233_v26 = vmul.f32 %v5874_v17, %v5874_v17  ;;  %4679 = vmatmul.msk.bf16.gmra.mxu1 %vm2607_vm10, %v2515_v21  ;;  %v400_v62 = vmul.f32 0.5, %v399_v40 }
 0x36f   :  { %v1375_v30 = vmul.f32 %v5879_v25, %v5879_v25  ;;  %v2014_v32 = vmul.f32 0.7978846, %v1886_v23  ;;  %v5144_v37 = vpop.eup %5143  ;;  %v351_v59 = vsub.f32 1.5, %v350_v41  ;;  %v360_v63 = vmul.f32 0.5, %v359_v46 }
 0x370   :  { %v249_v36 = vsub.f32 %v217_v19, %v233_v26  ;;  %v2269_v54 = vadd.f32 1.0, %v5144_v37  ;;  %v401_v20 = vsub.f32 1.5, %v400_v62  ;;  %v261_v19 = vsub.f32 %v5799_v43, %v5844_v24 }
 0x371   :  { %v1503_v38 = vmul.f32 %v1375_v30, %v5879_v25  ;;  %5145 = vtanh.f32 %v2014_v32  ;;  %v352_v5 = vmul.f32 %v5868_v34, %v351_v59  ;;  %v361_v12 = vsub.f32 1.5, %v360_v63 }
 0x372   :  { %v5892_v39 = vadd.f32 1e-05, %v249_v36  ;;  %v2397_v3 = vmul.f32 %v2269_v54, %v1629_v48  ;;  %v402_v30 = vmul.f32 %v5872_v16, %v401_v20  ;;  %v262_v41 = vsub.f32 %v5804_v61, %v5851_v33  ;;  %v5971_v54 = vld [vmem:[%s7812_s6] ss:$0 sm:$0xff] }
 0x373   :  { %v1759_v42 = vmul.f32 0.044715, %v1503_v38  ;;  %v136_v44 = vpop.xlane.xlu1 %135  ;;  %v356_v43 = vsel %vm5915_vm8, %v5868_v34, %v352_v5  ;;  %v362_v57 = vmul.f32 %v5876_v22, %v361_v12  ;;  %v266_v34 = vsub.f32 %v5794_v58, %v5847_v29 }
 0x374   :  { %5147 = vrsqrt.f32 %v5892_v39  ;;  %v1087_v47 = vpop.f32.mrf.mxu0  ;;  %v5901_v52 = vmul.f32 0.0078125, %v136_v44  ;;  %v453_v40 = vmul.f32 %v356_v43, %v261_v19  ;;  %vm393_vm0 = vweird.f32 %v5892_v39 }
 0x375   :  { %v1887_v50 = vadd.f32 %v1759_v42, %v5879_v25  ;;  %v5899_v51 = vadd.f32 %v5740_v14, %v1087_v47  ;;  %v366_v58 = vsel %vm5940_vm13, %v5876_v22, %v362_v57  ;;  %v265_v29 = vsub.f32 %v5809_v0, %v5874_v17 }
 0x376   :  { %v5911_v1 = vmul.f32 %v5901_v52, %v5901_v52  ;;  %v1631_v47 = vmul.f32 0.5, %v5879_v25  ;;  %v406_v61 = vsel %vm5951_vm15, %v5872_v16, %v402_v30 }
 0x377   :  { %v5146_v55 = vpop.eup %5145  ;;  %v2015_v60 = vmul.f32 0.7978846, %v1887_v50  ;;  %v1376_v45 = vmul.f32 %v5899_v51, %v5899_v51  ;;  %v1632_v17 = vmul.f32 0.5, %v5899_v51  ;;  %v5980_v50 = vld [vmem:[%s7807_s1] ss:$0 sm:$0xff] }
 0x378   :  { %v2270_v2 = vadd.f32 1.0, %v5146_v55  ;;  %v472_v16 = vmul.f32 %v5980_v50, %v453_v40  ;;  %v454_v55 = vmul.f32 %v366_v58, %v262_v41 }
 0x379   :  { %v1504_v49 = vmul.f32 %v1376_v45, %v5899_v51  ;;  %5149 = vtanh.f32 %v2015_v60  ;;  %v458_v45 = vmul.f32 %v406_v61, %v266_v34 }
 0x37a   :  { %v5148_v31 = vpop.eup %5147  ;;  %v2398_v4 = vmul.f32 %v2270_v2, %v1630_v53 }
 0x37b   :  { %v388_v7 = vmul.f32 %v5148_v31, %v5892_v39  ;;  %v1760_v9 = vmul.f32 0.044715, %v1504_v49  ;;  %v200_v10 = vpop.xlane.xlu1 %199  ;;  %vm394_vm14 = vweird.f32 %v5148_v31 }
 0x37c   :  { %v5919_v6 = vmul.f32 0.0078125, %v200_v10  ;;  %v1090_v13 = vpop.f32.mrf.mxu0  ;;  %v2516_v18 = vpack.c.bf16 %v2398_v4, %v2397_v3  ;;  %vm395_vm1 = vmor %vm393_vm0, %vm394_vm14  ;;  %v473_v10 = vmul.f32 %v5980_v50, %v454_v55 }
 0x37d   :  { %v389_v21 = vmul.f32 %v5148_v31, %v388_v7  ;;  %v1888_v23 = vadd.f32 %v1760_v9, %v5899_v51  ;;  %v5925_v26 = vadd.f32 %v5740_v14, %v1090_v13 }
 0x37e   :  { %v251_v27 = vsub.f32 %v5919_v6, %v5911_v1  ;;  %4680 = vmatmul.msk.bf16.gmra.mxu1 %vm2607_vm10, %v2516_v18  ;;  %v477_v18 = vmul.f32 %v5980_v50, %v458_v45 }
 0x37f   :  { %v390_v24 = vmul.f32 0.5, %v389_v21  ;;  %v1377_v14 = vmul.f32 %v5925_v26, %v5925_v26  ;;  %v2016_v28 = vmul.f32 0.7978846, %v1888_v23  ;;  %v5150_v32 = vpop.eup %5149  ;;  %v1633_v38 = vmul.f32 0.5, %v5925_v26 }
 0x380   :  { %v2271_v48 = vadd.f32 1.0, %v5150_v32 }
 0x381   :  { %v391_v36 = vsub.f32 1.5, %v390_v24  ;;  %v1505_v37 = vmul.f32 %v1377_v14, %v5925_v26  ;;  %5151 = vtanh.f32 %v2016_v28  ;;  %v6003_v14 = vpop.f32.mrf.mxu1 }
 0x382   :  { %v2399_v63 = vmul.f32 %v2271_v48, %v1631_v47 }
 0x383   :  { %v392_v42 = vmul.f32 %v5148_v31, %v391_v36  ;;  %v1761_v44 = vmul.f32 0.044715, %v1505_v37  ;;  %v138_v46 = vpop.xlane.xlu1 %137 }
 0x384   :  { %v1092_v56 = vpop.f32.mrf.mxu0  ;;  %v5974_v0 = vmul.f32 0.0078125, %v138_v46 }
 0x385   :  { %v396_v33 = vsel %vm395_vm1, %v5148_v31, %v392_v42  ;;  %v1889_v39 = vadd.f32 %v1761_v44, %v5925_v26  ;;  %v1093_v22 = vadd.f32 %v5971_v54, %v1092_v56  ;;  %v5991_v31 = vld [vmem:[%s7808_s2] ss:$0 sm:$0xff]  ;;  %v6015_v26 = vpop.xlane.xlu0 %191 }
 0x386   :  { %v457_v25 = vmul.f32 %v396_v33, %v265_v29  ;;  %v5986_v51 = vmul.f32 %v5974_v0, %v5974_v0  ;;  %v491_v4 = vadd.f32 %v5991_v31, %v472_v16  ;;  %v492_v28 = vadd.f32 %v5991_v31, %v473_v10 }
 0x387   :  { %v5152_v53 = vpop.eup %5151  ;;  %v2017_v59 = vmul.f32 0.7978846, %v1889_v39  ;;  %v1378_v60 = vmul.f32 %v1093_v22, %v1093_v22  ;;  %v496_v30 = vadd.f32 %v5991_v31, %v477_v18  ;;  %v1634_v44 = vmul.f32 0.5, %v1093_v22 }
 0x388   :  { %v2272_v62 = vadd.f32 1.0, %v5152_v53  ;;  %v476_v2 = vmul.f32 %v5980_v50, %v457_v25 }
 0x389   :  { %v1506_v3 = vmul.f32 %v1378_v60, %v1093_v22  ;;  %5153 = vtanh.f32 %v2017_v59  ;;  %v4916_v34 = vpack.i.bf16 %v492_v28, %v496_v30  ;;  %v6011_v61 = vpop.f32.mrf.mxu1 }
 0x38a   :  { %v2400_v49 = vmul.f32 %v2272_v62, %v1632_v17  ;;  %v495_v5 = vadd.f32 %v5991_v31, %v476_v2 }
 0x38b   :  { %v1762_v7 = vmul.f32 0.044715, %v1506_v3  ;;  %v202_v9 = vpop.xlane.xlu1 %201 }
 0x38c   :  { %v5996_v20 = vmul.f32 0.0078125, %v202_v9  ;;  %v1095_v11 = vpop.f32.mrf.mxu0  ;;  %v2517_v12 = vpack.c.bf16 %v2400_v49, %v2399_v63  ;;  %v4914_v13 = vpack.i.bf16 %v491_v4, %v495_v5 }
 0x38d   :  { %v1890_v19 = vadd.f32 %v1762_v7, %v1093_v22  ;;  %v1096_v21 = vadd.f32 %v5971_v54, %v1095_v11  ;;  %v581_v4 = vpop.trf.xlu0 }
 0x38e   :  { %v252_v23 = vsub.f32 %v5996_v20, %v5986_v51  ;;  %4681 = vmatmul.msk.bf16.gmra.mxu1 %vm2607_vm10, %v2517_v12  ;;  %4915 = vxpose.xlu2.b32.start [1/2] (short) %v4914_v13, 128 }
 0x38f   :  { %v1379_v43 = vmul.f32 %v1096_v21, %v1096_v21  ;;  %v2018_v24 = vmul.f32 0.7978846, %v1890_v19  ;;  %v5154_v57 = vpop.eup %5153  ;;  %v1635_v2 = vmul.f32 0.5, %v1096_v21 }
 0x390   :  { %v2273_v40 = vadd.f32 1.0, %v5154_v57 }
 0x391   :  { %v1507_v32 = vmul.f32 %v1379_v43, %v1096_v21  ;;  %5155 = vtanh.f32 %v2018_v24  ;;  %v6019_v5 = vpop.f32.mrf.mxu1 }
 0x392   :  { %v2401_v47 = vmul.f32 %v2273_v40, %v1633_v38 }
 0x393   :  { %v1763_v35 = vmul.f32 0.044715, %v1507_v32  ;;  %v6007_v36 = vpop.xlane.xlu1 %127 }
 0x394   :  { %v1097_v37 = vpop.f32.mrf.mxu0 }
 0x395   :  { %v1891_v41 = vadd.f32 %v1763_v35, %v1096_v21  ;;  %v1098_v42 = vadd.f32 %v5971_v54, %v1097_v37 }
 0x396   :  { %4917 = vxpose.xlu2.b32.end [2/2] (short) %v4916_v34, 128  ;;  %v582_v34 = vpop.trf.xlu0 }
 0x397   :  { %v5156_v46 = vpop.eup %5155  ;;  %v2019_v58 = vmul.f32 0.7978846, %v1891_v41  ;;  %v1380_v29 = vmul.f32 %v1098_v42, %v1098_v42  ;;  %v1636_v10 = vmul.f32 0.5, %v1098_v42  ;;  %v773_v41 = vpack.c.bf16 %v582_v34, %v581_v4 }
 0x398   :  { %v2274_v56 = vadd.f32 1.0, %v5156_v46 }
 0x399   :  { %v1508_v48 = vmul.f32 %v1380_v29, %v1098_v42  ;;  %5157 = vtanh.f32 %v2019_v58  ;;  %4607 = vmatmul.msk.bf16.gmra.mxu0 %vm833_vm6, %v773_v41 }
 0x39a   :  { %v2402_v33 = vmul.f32 %v2274_v56, %v1634_v44  ;;  %v6030_v44 = vpop.f32.mrf.mxu1 }
 0x39b   :  { %v1764_v39 = vmul.f32 0.044715, %v1508_v48  ;;  %v6013_v17 = vpop.xlane.xlu1 %129 }
 0x39c   :  { %v1100_v25 = vpop.f32.mrf.mxu0  ;;  %v2518_v16 = vpack.c.bf16 %v2402_v33, %v2401_v47 }
 0x39d   :  { %v1892_v53 = vadd.f32 %v1764_v39, %v1098_v42  ;;  %v1101_v22 = vadd.f32 %v5971_v54, %v1100_v25 }
 0x39e   :  { %4682 = vmatmul.msk.bf16.gmra.mxu1 %vm2607_vm10, %v2518_v16 }
 0x39f   :  { %v2020_v55 = vmul.f32 0.7978846, %v1892_v53  ;;  %v1381_v59 = vmul.f32 %v1101_v22, %v1101_v22  ;;  %v5158_v60 = vpop.eup %5157  ;;  %v1637_v39 = vmul.f32 0.5, %v1101_v22  ;;  %v583_v53 = vpop.trf.xlu0 }
 0x3a0   :  { %v2275_v3 = vadd.f32 1.0, %v5158_v60 }
 0x3a1   :  { %5159 = vtanh.f32 %v2020_v55  ;;  %v1509_v45 = vmul.f32 %v1381_v59, %v1101_v22 }
 0x3a2   :  { %v2403_v43 = vmul.f32 %v2275_v3, %v1635_v2 }
 0x3a3   :  { %v1765_v62 = vmul.f32 0.044715, %v1509_v45  ;;  %v140_v63 = vpop.xlane.xlu1 %139 }
 0x3a4   :  { %v1102_v49 = vpop.f32.mrf.mxu0  ;;  %v6022_v11 = vmul.f32 0.0078125, %v140_v63 }
 0x3a5   :  { %v1893_v7 = vadd.f32 %v1765_v62, %v1101_v22  ;;  %v1103_v9 = vadd.f32 %v5971_v54, %v1102_v49 }
 0x3a6   :  { %v237_v21 = vmul.f32 %v6022_v11, %v6022_v11 }
 0x3a7   :  { %v5160_v12 = vpop.eup %5159  ;;  %v2021_v13 = vmul.f32 0.7978846, %v1893_v7  ;;  %v1382_v18 = vmul.f32 %v1103_v9, %v1103_v9  ;;  %v1638_v60 = vmul.f32 0.5, %v1103_v9  ;;  %v6040_v7 = vpop.f32.mrf.mxu1 }
 0x3a8   :  { %v2276_v19 = vadd.f32 1.0, %v5160_v12 }
 0x3a9   :  { %v1510_v24 = vmul.f32 %v1382_v18, %v1103_v9  ;;  %5161 = vtanh.f32 %v2021_v13 }
 0x3aa   :  { %v2404_v28 = vmul.f32 %v2276_v19, %v1636_v10 }
 0x3ab   :  { %v1766_v30 = vmul.f32 0.044715, %v1510_v24  ;;  %v204_v57 = vpop.xlane.xlu1 %203 }
 0x3ac   :  { %v221_v32 = vmul.f32 0.0078125, %v204_v57  ;;  %v1105_v35 = vpop.f32.mrf.mxu0  ;;  %v2519_v37 = vpack.c.bf16 %v2404_v28, %v2403_v43  ;;  %v584_v28 = vpop.trf.xlu0 }
 0x3ad   :  { %v1894_v38 = vadd.f32 %v1766_v30, %v1103_v9  ;;  %v6027_v40 = vadd.f32 %v5971_v54, %v1105_v35  ;;  %v774_v35 = vpack.c.bf16 %v584_v28, %v583_v53 }
 0x3ae   :  { %v253_v42 = vsub.f32 %v221_v32, %v237_v21  ;;  %4683 = vmatmul.msk.bf16.gmra.mxu1 %vm2607_vm10, %v2519_v37 }
 0x3af   :  { %v2022_v46 = vmul.f32 0.7978846, %v1894_v38  ;;  %v1383_v58 = vmul.f32 %v6027_v40, %v6027_v40  ;;  %v5162_v56 = vpop.eup %5161  ;;  %4608 = vmatmul.msk.bf16.gmra.mxu0 %vm833_vm6, %v774_v35 }
 0x3b0   :  { %v285_v29 = vadd.f32 1e-05, %v253_v42  ;;  %v2277_v25 = vadd.f32 1.0, %v5162_v56  ;;  %v269_v42 = vsub.f32 %v5831_v8, %v6022_v11 }
 0x3b1   :  { %5163 = vtanh.f32 %v2022_v46  ;;  %v1511_v47 = vmul.f32 %v1383_v58, %v6027_v40 }
 0x3b2   :  { %5165 = vrsqrt.f32 %v285_v29  ;;  %v2405_v4 = vmul.f32 %v2277_v25, %v1637_v39  ;;  %vm433_vm2 = vweird.f32 %v285_v29  ;;  %v1639_v39 = vmul.f32 0.5, %v6027_v40 }
 0x3b3   :  { %v1767_v48 = vmul.f32 0.044715, %v1511_v47  ;;  %v142_v33 = vpop.xlane.xlu1 %141 }
 0x3b4   :  { %v1107_v16 = vpop.f32.mrf.mxu0  ;;  %v6038_v45 = vmul.f32 0.0078125, %v142_v33 }
 0x3b5   :  { %v1895_v55 = vadd.f32 %v1767_v48, %v6027_v40  ;;  %v1108_v59 = vadd.f32 %v5971_v54, %v1107_v16  ;;  %v6051_v48 = vpop.f32.mrf.mxu1 }
 0x3b6   :  { %v238_v12 = vmul.f32 %v6038_v45, %v6038_v45  ;;  %v270_v35 = vsub.f32 %v5837_v15, %v6038_v45 }
 0x3b7   :  { %v5164_v62 = vpop.eup %5163  ;;  %v2023_v63 = vmul.f32 0.7978846, %v1895_v55  ;;  %v1384_v2 = vmul.f32 %v1108_v59, %v1108_v59  ;;  %v1640_v11 = vmul.f32 0.5, %v1108_v59 }
 0x3b8   :  { %v5166_v3 = vpop.eup %5165  ;;  %v2278_v49 = vadd.f32 1.0, %v5164_v62 }
 0x3b9   :  { %v428_v10 = vmul.f32 %v5166_v3, %v285_v29  ;;  %v1512_v22 = vmul.f32 %v1384_v2, %v1108_v59  ;;  %5167 = vtanh.f32 %v2023_v63  ;;  %vm434_vm3 = vweird.f32 %v5166_v3 }
 0x3ba   :  { %v2406_v13 = vmul.f32 %v2278_v49, %v1638_v60  ;;  %vm435_vm4 = vmor %vm433_vm2, %vm434_vm3  ;;  %v585_v60 = vpop.trf.xlu0 }
 0x3bb   :  { %v429_v18 = vmul.f32 %v5166_v3, %v428_v10  ;;  %v1768_v19 = vmul.f32 0.044715, %v1512_v22  ;;  %v206_v9 = vpop.xlane.xlu1 %205 }
 0x3bc   :  { %v222_v43 = vmul.f32 0.0078125, %v206_v9  ;;  %v1110_v24 = vpop.f32.mrf.mxu0  ;;  %v2520_v21 = vpack.c.bf16 %v2406_v13, %v2405_v4 }
 0x3bd   :  { %v430_v30 = vmul.f32 0.5, %v429_v18  ;;  %v1896_v57 = vadd.f32 %v1768_v19, %v1108_v59  ;;  %v1111_v32 = vadd.f32 %v5971_v54, %v1110_v24 }
 0x3be   :  { %v254_v37 = vsub.f32 %v222_v43, %v238_v12  ;;  %4684 = vmatmul.msk.bf16.gmra.mxu1 %vm2607_vm10, %v2520_v21  ;;  %v6057_v43 = vpop.f32.mrf.mxu1 }
 0x3bf   :  { %v431_v34 = vsub.f32 1.5, %v430_v30  ;;  %v2024_v38 = vmul.f32 0.7978846, %v1896_v57  ;;  %v1385_v41 = vmul.f32 %v1111_v32, %v1111_v32  ;;  %v5168_v58 = vpop.eup %5167 }
 0x3c0   :  { %v286_v46 = vadd.f32 1e-05, %v254_v37  ;;  %v2279_v25 = vadd.f32 1.0, %v5168_v58 }
 0x3c1   :  { %v432_v56 = vmul.f32 %v5166_v3, %v431_v34  ;;  %5169 = vtanh.f32 %v2024_v38  ;;  %v1513_v47 = vmul.f32 %v1385_v41, %v1111_v32  ;;  %v1641_v41 = vmul.f32 0.5, %v1111_v32 }
 0x3c2   :  { %5171 = vrsqrt.f32 %v286_v46  ;;  %v2407_v22 = vmul.f32 %v2279_v25, %v1639_v39  ;;  %vm443_vm5 = vweird.f32 %v286_v46  ;;  %v586_v9 = vpop.trf.xlu0 }
 0x3c3   :  { %v436_v33 = vsel %vm435_vm4, %v5166_v3, %v432_v56  ;;  %v1769_v16 = vmul.f32 0.044715, %v1513_v47  ;;  %v775_v28 = vpack.c.bf16 %v586_v9, %v585_v60 }
 0x3c4   :  { %v1112_v53 = vpop.f32.mrf.mxu0  ;;  %v461_v55 = vmul.f32 %v436_v33, %v269_v42 }
 0x3c5   :  { %v1113_v8 = vadd.f32 %v5971_v54, %v1112_v53  ;;  %v1897_v29 = vadd.f32 %v1769_v16, %v1111_v32  ;;  %4609 = vmatmul.msk.bf16.gmra.mxu0 %vm833_vm6, %v775_v28 }
 0x3c6   :  { %v480_v62 = vmul.f32 %v5980_v50, %v461_v55  ;;  %v6064_v39 = vpop.f32.mrf.mxu1 }
 0x3c7   :  { %v5170_v63 = vpop.eup %5169  ;;  %v1386_v2 = vmul.f32 %v1113_v8, %v1113_v8  ;;  %v2025_v4 = vmul.f32 0.7978846, %v1897_v29  ;;  %v1642_v56 = vmul.f32 0.5, %v1113_v8 }
 0x3c8   :  { %v5172_v49 = vpop.eup %5171  ;;  %v2280_v10 = vadd.f32 1.0, %v5170_v63  ;;  %v499_v3 = vadd.f32 %v5991_v31, %v480_v62 }
 0x3c9   :  { %v438_v40 = vmul.f32 %v5172_v49, %v286_v46  ;;  %v1514_v12 = vmul.f32 %v1386_v2, %v1113_v8  ;;  %5173 = vtanh.f32 %v2025_v4  ;;  %vm444_vm7 = vweird.f32 %v5172_v49 }
 0x3ca   :  { %v2408_v13 = vmul.f32 %v2280_v10, %v1640_v11  ;;  %725 = vxpose.xlu1.b32.start [1/2] (short) %v499_v3, 128  ;;  %vm445_vm8 = vmor %vm443_vm5, %vm444_vm7  ;;  %v587_v58 = vpop.trf.xlu0 }
 0x3cb   :  { %v439_v18 = vmul.f32 %v5172_v49, %v438_v40  ;;  %v1770_v19 = vmul.f32 0.044715, %v1514_v12 }
 0x3cc   :  { %v2521_v59 = vpack.c.bf16 %v2408_v13, %v2407_v22 }
 0x3cd   :  { %v440_v24 = vmul.f32 0.5, %v439_v18  ;;  %v1898_v21 = vadd.f32 %v1770_v19, %v1113_v8 }
 0x3ce   :  { %4685 = vmatmul.msk.bf16.gmra.mxu1 %vm2607_vm10, %v2521_v59  ;;  %v6069_v32 = vpop.f32.mrf.mxu1 }
 0x3cf   :  { %v441_v30 = vsub.f32 1.5, %v440_v24  ;;  %v2026_v57 = vmul.f32 0.7978846, %v1898_v21  ;;  %v5174_v37 = vpop.eup %5173 }
 0x3d0   :  { %v2281_v42 = vadd.f32 1.0, %v5174_v37 }
 0x3d1   :  { %v442_v34 = vmul.f32 %v5172_v49, %v441_v30  ;;  %5175 = vtanh.f32 %v2026_v57 }
 0x3d2   :  { %v2409_v53 = vmul.f32 %v2281_v42, %v1641_v41  ;;  %v588_v55 = vpop.trf.xlu0 }
 0x3d3   :  { %v446_v38 = vsel %vm445_vm8, %v5172_v49, %v442_v34  ;;  %v776_v60 = vpack.c.bf16 %v588_v55, %v587_v58 }
 0x3d4   :  { %v462_v46 = vmul.f32 %v446_v38, %v270_v35 }
 0x3d5   :  { %4610 = vmatmul.msk.bf16.gmra.mxu0 %vm833_vm6, %v776_v60 }
 0x3d6   :  { %v481_v47 = vmul.f32 %v5980_v50, %v462_v46  ;;  %v6071_v50 = vpop.f32.mrf.mxu1 }
 0x3d7   :  { %v5176_v33 = vpop.eup %5175 }
 0x3d8   :  { %v500_v25 = vadd.f32 %v5991_v31, %v481_v47  ;;  %v2282_v16 = vadd.f32 1.0, %v5176_v33 }
 0x3da   :  { %726 = vxpose.xlu1.b32.end [2/2] (short) %v500_v25, 128  ;;  %v2410_v15 = vmul.f32 %v2282_v16, %v1642_v56  ;;  %v589_v8 = vpop.trf.xlu0 }
 0x3dc   :  { %v2522_v45 = vpack.c.bf16 %v2410_v15, %v2409_v53 }
 0x3de   :  { %4686 = vmatmul.msk.bf16.gmra.mxu1 %vm2607_vm10, %v2522_v45  ;;  %v6074_v62 = vpop.f32.mrf.mxu1 }
 0x3e2   :  { %v590_v11 = vpop.trf.xlu0 }
 0x3e3   :  { %v777_v29 = vpack.c.bf16 %v590_v11, %v589_v8 }
 0x3e5   :  { %4611 = vmatmul.msk.bf16.gmra.mxu0 %vm833_vm6, %v777_v29 }
 0x3e6   :  { %v6076_v49 = vpop.f32.mrf.mxu1 }
 0x3ea   :  { %v591_v31 = vpop.trf.xlu0 }
 0x3ee   :  { %v6079_v10 = vpop.f32.mrf.mxu1 }
 0x3f2   :  { %v592_v63 = vpop.trf.xlu0 }
 0x3f3   :  { %v778_v2 = vpack.c.bf16 %v592_v63, %v591_v31 }
 0x3f5   :  { %4612 = vmatmul.msk.bf16.gmra.mxu0 %vm833_vm6, %v778_v2 }
 0x3f6   :  { %v6082_v40 = vpop.f32.mrf.mxu1 }
 0x3fa   :  { %v593_v4 = vpop.trf.xlu0 }
 0x3fe   :  { %v6084_v18 = vpop.f32.mrf.mxu1 }
 0x402   :  { %v594_v22 = vpop.trf.xlu0 }
 0x403   :  { %v779_v3 = vpack.c.bf16 %v594_v22, %v593_v4 }
 0x405   :  { %4613 = vmatmul.msk.bf16.gmra.mxu0 %vm833_vm6, %v779_v3 }
 0x406   :  { %v6087_v59 = vpop.f32.mrf.mxu1 }
 0x40a   :  { %v595_v12 = vpop.trf.xlu0 }
 0x40e   :  { %v6093_v30 = vpop.f32.mrf.mxu1 }
 0x412   :  { %v596_v13 = vpop.trf.xlu0 }
 0x413   :  { %v780_v19 = vpack.c.bf16 %v596_v13, %v595_v12 }
 0x415   :  { %4614 = vmatmul.msk.bf16.gmra.mxu0 %vm833_vm6, %v780_v19 }
 0x416   :  { %v1115_v24 = vpop.f32.mrf.mxu0  ;;  %v6097_v25 = vpop.f32.mrf.mxu1 }
 0x417   :  { %v1116_v21 = vadd.f32 %v5971_v54, %v1115_v24 }
 0x419   :  { %v1387_v35 = vmul.f32 %v1116_v21, %v1116_v21 }
 0x41b   :  { %v1515_v34 = vmul.f32 %v1387_v35, %v1116_v21 }
 0x41d   :  { %v1771_v41 = vmul.f32 0.044715, %v1515_v34 }
 0x41e   :  { %v1117_v42 = vpop.f32.mrf.mxu0  ;;  %v6100_v12 = vpop.f32.mrf.mxu1 }
 0x41f   :  { %v1899_v46 = vadd.f32 %v1771_v41, %v1116_v21  ;;  %v1118_v58 = vadd.f32 %v5971_v54, %v1117_v42 }
 0x421   :  { %v1388_v47 = vmul.f32 %v1118_v58, %v1118_v58  ;;  %v2027_v33 = vmul.f32 0.7978846, %v1899_v46  ;;  %v1644_v41 = vmul.f32 0.5, %v1118_v58 }
 0x423   :  { %v1516_v16 = vmul.f32 %v1388_v47, %v1118_v58  ;;  %5177 = vtanh.f32 %v2027_v33 }
 0x425   :  { %v1772_v53 = vmul.f32 0.044715, %v1516_v16 }
 0x427   :  { %v6089_v9 = vpop.trf.xlu2  ;;  %v1900_v45 = vadd.f32 %v1772_v53, %v1118_v58 }
 0x428   :  { %v4922_v28 = vunpack.i.h.bf16 %v6089_v9 }
 0x429   :  { %v2028_v11 = vmul.f32 0.7978846, %v1900_v45  ;;  %v5178_v22 = vpop.eup %5177 }
 0x42a   :  { %v2283_v35 = vadd.f32 1.0, %v5178_v22 }
 0x42b   :  { %5179 = vtanh.f32 %v2028_v11 }
 0x42c   :  { %v1120_v15 = vpop.f32.mrf.mxu0 }
 0x42d   :  { %v1121_v55 = vadd.f32 %v5971_v54, %v1120_v15 }
 0x42f   :  { %v4923_v57 = vpop.trf.xlu2  ;;  %v1389_v31 = vmul.f32 %v1121_v55, %v1121_v55 }
 0x430   :  { %v4927_v37 = vunpack.i.h.bf16 %v4923_v57  ;;  %v4924_v33 = vunpack.i.l.bf16 %v4923_v57 }
 0x431   :  { %v1517_v4 = vmul.f32 %v1389_v31, %v1121_v55 }
 0x432   :  { %v781_v38 = vpack.c.bf16 %v4927_v37, %v4922_v28  ;;  %v1643_v28 = vmul.f32 0.5, %v1116_v21 }
 0x433   :  { %v1773_v13 = vmul.f32 0.044715, %v1517_v4 }
 0x434   :  { %4615 = vmatmul.msk.bf16.gmra.mxu0 %vm833_vm6, %v781_v38  ;;  %v1122_v24 = vpop.f32.mrf.mxu0  ;;  %v5180_v38 = vpop.eup %5179  ;;  %v2411_v15 = vmul.f32 %v2283_v35, %v1643_v28 }
 0x435   :  { %v1901_v37 = vadd.f32 %v1773_v13, %v1121_v55  ;;  %v1123_v34 = vadd.f32 %v5971_v54, %v1122_v24  ;;  %v2284_v53 = vadd.f32 1.0, %v5180_v38 }
 0x437   :  { %v4928_v56 = vpop.trf.xlu2  ;;  %v1390_v46 = vmul.f32 %v1123_v34, %v1123_v34  ;;  %v2029_v47 = vmul.f32 0.7978846, %v1901_v37 }
 0x438   :  { %v4932_v60 = vunpack.i.h.bf16 %v4928_v56  ;;  %v4929_v8 = vunpack.i.l.bf16 %v4928_v56  ;;  %v4919_v56 = vunpack.i.l.bf16 %v6089_v9  ;;  %v6116_v9 = vld [vmem:[%s7814_s8] ss:$0 sm:$0xff] }
 0x439   :  { %v1518_v16 = vmul.f32 %v1390_v46, %v1123_v34  ;;  %5181 = vtanh.f32 %v2029_v47 }
 0x43a   :  { %v6111_v31 = vpack.c.bf16 %v4924_v33, %v4919_v56 }
 0x43b   :  { %v1774_v45 = vmul.f32 0.044715, %v1518_v16  ;;  %v1646_v16 = vmul.f32 0.5, %v1123_v34 }
 0x43d   :  { %v1902_v11 = vadd.f32 %v1774_v45, %v1123_v34  ;;  %v2852_v45 = vadd.f32 %v6116_v9, %v6097_v25 }
 0x43f   :  { %v4933_v29 = vpop.trf.xlu2  ;;  %v5182_v28 = vpop.eup %5181 }
 0x440   :  { %v4937_v63 = vunpack.i.h.bf16 %v4933_v29  ;;  %v4934_v2 = vunpack.i.l.bf16 %v4933_v29  ;;  %v2285_v46 = vadd.f32 1.0, %v5182_v28 }
 0x442   :  { %v782_v3 = vpack.c.bf16 %v4937_v63, %v4932_v60  ;;  %v798_v19 = vpack.c.bf16 %v4934_v2, %v4929_v8  ;;  %v2412_v60 = vmul.f32 %v2284_v53, %v1644_v41  ;;  %v1125_v21 = vpop.f32.mrf.mxu0  ;;  %v6106_v8 = vpop.f32.mrf.mxu1  ;;  %v2030_v2 = vmul.f32 0.7978846, %v1902_v11 }
 0x443   :  { %v6109_v29 = vadd.f32 %v5971_v54, %v1125_v21 }
 0x444   :  { %4616 = vmatmul.msk.bf16.gmra.mxu0 %vm833_vm6, %v782_v3  ;;  %4632 = vmatmul.msk.bf16.vlgmr.msra.gmra.mxu3 %vm833_vm6, %v798_v19  ;;  %v2523_v58 = vpack.c.bf16 %v2412_v60, %v2411_v15  ;;  %v2850_v3 = vadd.f32 %v6116_v9, %v6093_v30  ;;  %5183 = vtanh.f32 %v2030_v2 }
 0x445   :  { %v1391_v22 = vmul.f32 %v6109_v29, %v6109_v29 }
 0x446   :  { %4687 = vmatmul.msk.bf16.gmra.mxu1 %vm2607_vm10, %v2523_v58 }
 0x447   :  { %v4938_v42 = vpop.trf.xlu2  ;;  %v1519_v24 = vmul.f32 %v1391_v22, %v6109_v29 }
 0x448   :  { %v4942_v57 = vunpack.i.h.bf16 %v4938_v42  ;;  %v4939_v63 = vunpack.i.l.bf16 %v4938_v42  ;;  %v1645_v42 = vmul.f32 0.5, %v1121_v55 }
 0x449   :  { %v1775_v37 = vmul.f32 0.044715, %v1519_v24  ;;  %v2855_v24 = vadd.f32 %v6116_v9, %v6100_v12 }
 0x44a   :  { %v1127_v41 = vpop.f32.mrf.mxu0  ;;  %v5184_v47 = vpop.eup %5183  ;;  %v2413_v55 = vmul.f32 %v2285_v46, %v1645_v42 }
 0x44b   :  { %v1903_v56 = vadd.f32 %v1775_v37, %v6109_v29  ;;  %v1128_v30 = vadd.f32 %v5971_v54, %v1127_v41  ;;  %v6128_v33 = vpop.f32.mrf.mxu1  ;;  %v2286_v11 = vadd.f32 1.0, %v5184_v47 }
 0x44d   :  { %v1392_v15 = vmul.f32 %v1128_v30, %v1128_v30  ;;  %v2031_v60 = vmul.f32 0.7978846, %v1903_v56 }
 0x44f   :  { %v4943_v4 = vpop.trf.xlu2  ;;  %v1520_v21 = vmul.f32 %v1392_v15, %v1128_v30  ;;  %5185 = vtanh.f32 %v2031_v60  ;;  %v1648_v60 = vmul.f32 0.5, %v1128_v30 }
 0x450   :  { %v4947_v13 = vunpack.i.h.bf16 %v4943_v4  ;;  %v4944_v19 = vunpack.i.l.bf16 %v4943_v4 }
 0x451   :  { %v1776_v58 = vmul.f32 0.044715, %v1520_v21 }
 0x452   :  { %3161 = vxpose.xlu1.b32.start [1/16] (narrow) %v2850_v3, 16  ;;  %v783_v35 = vpack.c.bf16 %v4947_v13, %v4942_v57  ;;  %v799_v38 = vpack.c.bf16 %v4944_v19, %v4939_v63  ;;  %v2414_v57 = vmul.f32 %v2286_v11, %v1646_v16  ;;  %v1130_v63 = vpop.f32.mrf.mxu0  ;;  %v1647_v16 = vmul.f32 0.5, %v6109_v29 }
 0x453   :  { %v1904_v2 = vadd.f32 %v1776_v58, %v1128_v30  ;;  %v6133_v4 = vadd.f32 %v5971_v54, %v1130_v63 }
 0x454   :  { %4617 = vmatmul.msk.bf16.gmra.mxu0 %vm833_vm6, %v783_v35  ;;  %4633 = vmatmul.msk.bf16.gmra.mxu3 %vm833_vm6, %v799_v38  ;;  %v2524_v22 = vpack.c.bf16 %v2414_v57, %v2413_v55  ;;  %v6140_v35 = vpop.f32.mrf.mxu1  ;;  %v2857_v55 = vadd.f32 %v6116_v9, %v6106_v8 }
 0x455   :  { %v2032_v13 = vmul.f32 0.7978846, %v1904_v2  ;;  %v1393_v25 = vmul.f32 %v6133_v4, %v6133_v4  ;;  %v5186_v41 = vpop.eup %5185 }
 0x456   :  { %4688 = vmatmul.msk.bf16.gmra.mxu1 %vm2607_vm10, %v2524_v22 }
 0x457   :  { %v4948_v53 = vpop.trf.xlu2  ;;  %5187 = vtanh.f32 %v2032_v13  ;;  %v1521_v38 = vmul.f32 %v1393_v25, %v6133_v4 }
 0x458   :  { %v4952_v34 = vunpack.i.h.bf16 %v4948_v53  ;;  %v4949_v3 = vunpack.i.l.bf16 %v4948_v53  ;;  %v2287_v53 = vadd.f32 1.0, %v5186_v41 }
 0x459   :  { %v1777_v46 = vmul.f32 0.044715, %v1521_v38  ;;  %v2860_v38 = vadd.f32 %v6116_v9, %v6128_v33  ;;  %v1649_v33 = vmul.f32 0.5, %v6133_v4 }
 0x45a   :  { %3162 = vxpose.xlu1.b32.cont [2/16] (narrow) %v2852_v45, 16  ;;  %v1132_v47 = vpop.f32.mrf.mxu0  ;;  %v2415_v2 = vmul.f32 %v2287_v53, %v1647_v16  ;;  %v6161_v16 = vld [vmem:[#allocation2 + $0x48] sm:$0xff] }
 0x45b   :  { %v1905_v12 = vadd.f32 %v1777_v46, %v6133_v4  ;;  %v1133_v15 = vadd.f32 %v5971_v54, %v1132_v47  ;;  %v168_v53 = vmul.f32 %v6161_v16, %v6161_v16 }
 0x45c   :  { %v6150_v29 = vpop.f32.mrf.mxu1 }
 0x45d   :  { %v5188_v45 = vpop.eup %5187  ;;  %v1394_v11 = vmul.f32 %v1133_v15, %v1133_v15  ;;  %v2033_v58 = vmul.f32 0.7978846, %v1905_v12 }
 0x45e   :  { %v2288_v63 = vadd.f32 1.0, %v5188_v45 }
 0x45f   :  { %v4953_v19 = vpop.trf.xlu2  ;;  %v1522_v57 = vmul.f32 %v1394_v11, %v1133_v15  ;;  %5189 = vtanh.f32 %v2033_v58 }
 0x460   :  { %v4957_v28 = vunpack.i.h.bf16 %v4953_v19  ;;  %v4954_v37 = vunpack.i.l.bf16 %v4953_v19 }
 0x461   :  { %v1778_v22 = vmul.f32 0.044715, %v1522_v57 }
 0x462   :  { %3163 = vxpose.xlu1.b32.cont [3/16] (narrow) %v2855_v24, 16  ;;  %v784_v42 = vpack.c.bf16 %v4957_v28, %v4952_v34  ;;  %v800_v56 = vpack.c.bf16 %v4954_v37, %v4949_v3  ;;  %v2416_v34 = vmul.f32 %v2288_v63, %v1648_v60  ;;  %v1135_v3 = vpop.f32.mrf.mxu0  ;;  %v6171_v63 = vmul.f32 0.0078125, %v6007_v36 }
 0x463   :  { %v1906_v13 = vadd.f32 %v1778_v22, %v1133_v15  ;;  %v6153_v19 = vadd.f32 %v5971_v54, %v1135_v3  ;;  %v2862_v3 = vadd.f32 %v6116_v9, %v6140_v35  ;;  %v6184_v35 = vadd.f32 1e-05, %v251_v27 }
 0x464   :  { %4618 = vmatmul.msk.bf16.gmra.mxu0 %vm833_vm6, %v784_v42  ;;  %4634 = vmatmul.msk.bf16.gmra.mxu3 %vm833_vm6, %v800_v56  ;;  %v2525_v30 = vpack.c.bf16 %v2416_v34, %v2415_v2  ;;  %v1650_v2 = vmul.f32 0.5, %v1133_v15 }
 0x465   :  { %v2034_v28 = vmul.f32 0.7978846, %v1906_v13  ;;  %v1395_v37 = vmul.f32 %v6153_v19, %v6153_v19  ;;  %v5190_v56 = vpop.eup %5189  ;;  %vm413_vm9 = vweird.f32 %v6184_v35 }
 0x466   :  { %4689 = vmatmul.msk.bf16.gmra.mxu1 %vm2607_vm10, %v2525_v30  ;;  %v2289_v11 = vadd.f32 1.0, %v5190_v56 }
 0x467   :  { %v4958_v21 = vpop.trf.xlu2  ;;  %5191 = vtanh.f32 %v2034_v28  ;;  %v1523_v46 = vmul.f32 %v1395_v37, %v6153_v19  ;;  %v215_v28 = vmul.f32 0.0078125, %v6015_v26 }
 0x468   :  { %v4962_v25 = vunpack.i.h.bf16 %v4958_v21  ;;  %v4959_v24 = vunpack.i.l.bf16 %v4958_v21  ;;  %v2866_v21 = vpop.f32.mrf.mxu1 }
 0x469   :  { %v1779_v12 = vmul.f32 0.044715, %v1523_v46 }
 0x46a   :  { %3164 = vxpose.xlu1.b32.cont [4/16] (narrow) %v2857_v55, 16  ;;  %v1137_v60 = vpop.f32.mrf.mxu0 }
 0x46b   :  { %v1907_v55 = vadd.f32 %v1779_v12, %v6153_v19  ;;  %v1138_v58 = vadd.f32 %v5971_v54, %v1137_v60 }
 0x46d   :  { %v5192_v57 = vpop.eup %5191  ;;  %v1396_v34 = vmul.f32 %v1138_v58, %v1138_v58  ;;  %v2035_v13 = vmul.f32 0.7978846, %v1907_v55 }
 0x46e   :  { %v2290_v30 = vadd.f32 1.0, %v5192_v57 }
 0x46f   :  { %v4963_v8 = vpop.trf.xlu2  ;;  %v1524_v4 = vmul.f32 %v1396_v34, %v1138_v58  ;;  %5193 = vtanh.f32 %v2035_v13 }
 0x470   :  { %v4967_v41 = vunpack.i.h.bf16 %v4963_v8  ;;  %v4964_v42 = vunpack.i.l.bf16 %v4963_v8  ;;  %v2418_v36 = vmul.f32 %v2290_v30, %v1650_v2  ;;  %v2869_v56 = vpop.f32.mrf.mxu1 }
 0x471   :  { %v1780_v8 = vmul.f32 0.044715, %v1524_v4  ;;  %v1652_v4 = vmul.f32 0.5, %v1138_v58 }
 0x472   :  { %3165 = vxpose.xlu1.b32.cont [5/16] (narrow) %v2860_v38, 16  ;;  %v785_v47 = vpack.c.bf16 %v4967_v41, %v4962_v25  ;;  %v801_v45 = vpack.c.bf16 %v4964_v42, %v4959_v24  ;;  %v2417_v25 = vmul.f32 %v2289_v11, %v1649_v33  ;;  %v231_v24 = vmul.f32 %v6171_v63, %v6171_v63  ;;  %v1140_v37 = vpop.f32.mrf.mxu0 }
 0x473   :  { %v1908_v15 = vadd.f32 %v1780_v8, %v1138_v58  ;;  %v6179_v38 = vadd.f32 %v5971_v54, %v1140_v37  ;;  %v6207_v58 = vld [vmem:[%s7812_s6] ss:$0 sm:$0xff] }
 0x474   :  { %4619 = vmatmul.msk.bf16.gmra.mxu0 %vm833_vm6, %v785_v47  ;;  %4635 = vmatmul.msk.bf16.gmra.mxu3 %vm833_vm6, %v801_v45  ;;  %v2526_v41 = vpack.c.bf16 %v2418_v36, %v2417_v25  ;;  %v247_v46 = vsub.f32 %v215_v28, %v231_v24  ;;  %v2865_v45 = vadd.f32 %v6116_v9, %v6150_v29 }
 0x475   :  { %v1397_v12 = vmul.f32 %v6179_v38, %v6179_v38  ;;  %v5194_v6 = vpop.eup %5193  ;;  %v2867_v24 = vadd.f32 %v6116_v9, %v2866_v21 }
 0x476   :  { %4690 = vmatmul.msk.bf16.gmra.mxu1 %vm2607_vm10, %v2526_v41  ;;  %v6193_v57 = vadd.f32 1e-05, %v247_v46  ;;  %v2291_v29 = vadd.f32 1.0, %v5194_v6 }
 0x477   :  { %193 = vadd.xlane.f32.xlu2 %v168_v53  ;;  %v4968_v22 = vpop.trf.xlu2  ;;  %v2036_v53 = vmul.f32 0.7978846, %v1908_v15  ;;  %v1525_v1 = vmul.f32 %v1397_v12, %v6179_v38 }
 0x478   :  { %v4972_v42 = vunpack.i.h.bf16 %v4968_v22  ;;  %v4969_v47 = vunpack.i.l.bf16 %v4968_v22  ;;  %v1651_v22 = vmul.f32 0.5, %v6153_v19  ;;  %v2871_v8 = vpop.f32.mrf.mxu1  ;;  %vm373_vm12 = vweird.f32 %v6193_v57 }
 0x479   :  { %5195 = vtanh.f32 %v2036_v53  ;;  %v1781_v11 = vmul.f32 0.044715, %v1525_v1 }
 0x47a   :  { %3166 = vxpose.xlu1.b32.cont [6/16] (narrow) %v2862_v3, 16  ;;  %5197 = vrsqrt.f32 %v6184_v35  ;;  %v1142_v2 = vpop.f32.mrf.mxu0  ;;  %v2419_v19 = vmul.f32 %v2291_v29, %v1651_v22 }
 0x47b   :  { %v1909_v34 = vadd.f32 %v1781_v11, %v6179_v38  ;;  %v1143_v3 = vadd.f32 %v5971_v54, %v1142_v2  ;;  %5199 = vrsqrt.f32 %v6193_v57 }
 0x47d   :  { %v1398_v25 = vmul.f32 %v1143_v3, %v1143_v3  ;;  %v2037_v28 = vmul.f32 0.7978846, %v1909_v34 }
 0x47f   :  { %v4973_v26 = vpop.trf.xlu2  ;;  %v5196_v13 = vpop.eup %5195  ;;  %v1526_v36 = vmul.f32 %v1398_v25, %v1143_v3  ;;  %5201 = vtanh.f32 %v2037_v28 }
 0x480   :  { %v4977_v60 = vunpack.i.h.bf16 %v4973_v26  ;;  %v4974_v33 = vunpack.i.l.bf16 %v4973_v26  ;;  %v2292_v37 = vadd.f32 1.0, %v5196_v13  ;;  %v6202_v15 = vpop.eup %5197  ;;  %v2874_v29 = vpop.f32.mrf.mxu1 }
 0x481   :  { %v1782_v41 = vmul.f32 0.044715, %v1526_v36  ;;  %v408_v53 = vmul.f32 %v6202_v15, %v6184_v35  ;;  %v6214_v12 = vpop.eup %5199  ;;  %vm414_vm11 = vweird.f32 %v6202_v15 }
 0x482   :  { %3167 = vxpose.xlu1.b32.cont [7/16] (narrow) %v2865_v45, 16  ;;  %v786_v27 = vpack.c.bf16 %v4977_v60, %v4972_v42  ;;  %v802_v55 = vpack.c.bf16 %v4974_v33, %v4969_v47  ;;  %v2420_v42 = vmul.f32 %v2292_v37, %v1652_v4  ;;  %v1145_v54 = vpop.f32.mrf.mxu0  ;;  %v6219_v45 = vadd.f32 1e-05, %v252_v23  ;;  %vm6263_vm14 = vmor %vm413_vm9, %vm414_vm11 }
 0x483   :  { %v1910_v46 = vadd.f32 %v1782_v41, %v1143_v3  ;;  %v6210_v21 = vadd.f32 %v6207_v58, %v1145_v54  ;;  %v368_v51 = vmul.f32 %v6214_v12, %v6193_v57  ;;  %v409_v23 = vmul.f32 %v6202_v15, %v408_v53 }
 0x484   :  { %4620 = vmatmul.msk.bf16.gmra.mxu0 %vm833_vm6, %v786_v27  ;;  %4636 = vmatmul.msk.bf16.gmra.mxu3 %vm833_vm6, %v802_v55  ;;  %v2527_v47 = vpack.c.bf16 %v2420_v42, %v2419_v19  ;;  %v2870_v27 = vadd.f32 %v6116_v9, %v2869_v56  ;;  %v1653_v4 = vmul.f32 0.5, %v6179_v38  ;;  %v1654_v19 = vmul.f32 0.5, %v1143_v3  ;;  %v5478_v3 = vld [vmem:[#allocation2 + $0x60] sm:$0xff] }
 0x485   :  { %v2038_v33 = vmul.f32 0.7978846, %v1910_v46  ;;  %v1399_v6 = vmul.f32 %v6210_v21, %v6210_v21  ;;  %v5202_v22 = vpop.eup %5201  ;;  %v369_v28 = vmul.f32 %v6214_v12, %v368_v51  ;;  %v410_v37 = vmul.f32 0.5, %v409_v23 }
 0x486   :  { %4691 = vmatmul.msk.bf16.gmra.mxu1 %vm2607_vm10, %v2527_v47  ;;  %v2872_v38 = vadd.f32 %v6116_v9, %v2871_v8  ;;  %vm374_vm13 = vweird.f32 %v6214_v12  ;;  %vm423_vm0 = vweird.f32 %v6219_v45 }
 0x487   :  { %v4978_v30 = vpop.trf.xlu2  ;;  %5203 = vtanh.f32 %v2038_v33  ;;  %v1527_v2 = vmul.f32 %v1399_v6, %v6210_v21  ;;  %v411_v33 = vsub.f32 1.5, %v410_v37  ;;  %v5479_v37 = vld [vmem:[#allocation2 + $0x40] sm:$0xff]  ;;  %vm6271_vm15 = vmor %vm373_vm12, %vm374_vm13 }
 0x488   :  { %v4982_v26 = vunpack.i.h.bf16 %v4978_v30  ;;  %v4979_v60 = vunpack.i.l.bf16 %v4978_v30  ;;  %5205 = vrsqrt.f32 %v6219_v45  ;;  %v2293_v30 = vadd.f32 1.0, %v5202_v22 }
 0x489   :  { %v1783_v34 = vmul.f32 0.044715, %v1527_v2  ;;  %v412_v23 = vmul.f32 %v6202_v15, %v411_v33 }
 0x48a   :  { %3168 = vxpose.xlu1.b32.cont [8/16] (narrow) %v2867_v24, 16  ;;  %v1147_v56 = vpop.f32.mrf.mxu0  ;;  %v2421_v53 = vmul.f32 %v2293_v30, %v1653_v4 }
 0x48b   :  { %v1911_v25 = vadd.f32 %v1783_v34, %v6210_v21  ;;  %v6235_v24 = vadd.f32 %v6207_v58, %v1147_v56  ;;  %v416_v33 = vsel %vm6263_vm14, %v6202_v15, %v412_v23 }
 0x48d   :  { %v5204_v36 = vpop.eup %5203  ;;  %v2039_v41 = vmul.f32 0.7978846, %v1911_v25  ;;  %v1400_v54 = vmul.f32 %v6235_v24, %v6235_v24  ;;  %v2875_v25 = vadd.f32 %v6116_v9, %v2874_v29 }
 0x48e   :  { %v2294_v47 = vadd.f32 1.0, %v5204_v36 }
 0x48f   :  { %v4983_v1 = vpop.trf.xlu2  ;;  %v1528_v46 = vmul.f32 %v1400_v54, %v6235_v24  ;;  %5207 = vtanh.f32 %v2039_v41 }
 0x490   :  { %v4987_v11 = vunpack.i.h.bf16 %v4983_v1  ;;  %v4984_v55 = vunpack.i.l.bf16 %v4983_v1  ;;  %v2422_v6 = vmul.f32 %v2294_v47, %v1654_v19  ;;  %v263_v19 = vsub.f32 %v5479_v37, %v6171_v63 }
 0x491   :  { %v1784_v1 = vmul.f32 0.044715, %v1528_v46  ;;  %v1655_v63 = vmul.f32 0.5, %v6210_v21 }
 0x492   :  { %3169 = vxpose.xlu1.b32.cont [9/16] (narrow) %v2870_v27, 16  ;;  %v787_v20 = vpack.c.bf16 %v4987_v11, %v4982_v26  ;;  %v803_v13 = vpack.c.bf16 %v4984_v55, %v4979_v60  ;;  %v6242_v26 = vpop.eup %5205  ;;  %v370_v60 = vmul.f32 0.5, %v369_v28  ;;  %v267_v27 = vsub.f32 %v5478_v3, %v5901_v52  ;;  %v1150_v8 = vpop.f32.mrf.mxu0 }
 0x493   :  { %v418_v11 = vmul.f32 %v6242_v26, %v6219_v45  ;;  %v2876_v55 = vpop.f32.mrf.mxu1  ;;  %v1912_v2 = vadd.f32 %v1784_v1, %v6235_v24  ;;  %v6251_v22 = vadd.f32 %v6207_v58, %v1150_v8  ;;  %v2528_v51 = vpack.c.bf16 %v2422_v6, %v2421_v53 }
 0x494   :  { %4621 = vmatmul.msk.bf16.gmra.mxu0 %vm833_vm6, %v787_v20  ;;  %4637 = vmatmul.msk.bf16.gmra.mxu3 %vm833_vm6, %v803_v13  ;;  %v371_v20 = vsub.f32 1.5, %v370_v60  ;;  %v459_v21 = vmul.f32 %v416_v33, %v267_v27  ;;  %v2877_v23 = vadd.f32 %v6116_v9, %v2876_v55  ;;  %vm424_vm1 = vweird.f32 %v6242_v26 }
 0x495   :  { %v2040_v13 = vmul.f32 0.7978846, %v1912_v2  ;;  %v1401_v4 = vmul.f32 %v6251_v22, %v6251_v22  ;;  %v5208_v36 = vpop.eup %5207  ;;  %v419_v54 = vmul.f32 %v6242_v26, %v418_v11  ;;  %v1656_v11 = vmul.f32 0.5, %v6235_v24  ;;  %v6301_v24 = vld [vmem:[%s7808_s2] ss:$0 sm:$0xff]  ;;  %vm6308_vm2 = vmor %vm423_vm0, %vm424_vm1 }
 0x496   :  { %4692 = vmatmul.msk.bf16.gmra.mxu1 %vm2607_vm10, %v2528_v51  ;;  %v372_v29 = vmul.f32 %v6214_v12, %v371_v20  ;;  %v2295_v53 = vadd.f32 1.0, %v5208_v36 }
 0x497   :  { %v4988_v42 = vpop.trf.xlu2  ;;  %5209 = vtanh.f32 %v2040_v13  ;;  %v1529_v35 = vmul.f32 %v1401_v4, %v6251_v22  ;;  %v420_v8 = vmul.f32 0.5, %v419_v54 }
 0x498   :  { %v4992_v52 = vunpack.i.h.bf16 %v4988_v42  ;;  %v4989_v34 = vunpack.i.l.bf16 %v4988_v42  ;;  %v376_v60 = vsel %vm6271_vm15, %v6214_v12, %v372_v29  ;;  %v6293_v12 = vld [vmem:[%s7807_s1] ss:$0 sm:$0xff]  ;;  %v2423_v4 = vmul.f32 %v2295_v53, %v1655_v63  ;;  %v5482_v29 = vld [vmem:[#allocation2 + $0x68] sm:$0xff]  ;;  %s4573_s1 = sshll.u32 %s7819_s13, 4  ;;  %s4574_s1 = int_to_ptr.hbm [resolvable:$true] %s4573_s1 }
 0x499   :  { %v1785_v46 = vmul.f32 0.044715, %v1529_v35  ;;  %v455_v3 = vmul.f32 %v376_v60, %v263_v19  ;;  %v421_v30 = vsub.f32 1.5, %v420_v8  ;;  %v268_v45 = vsub.f32 %v5482_v29, %v5974_v0 }
 0x49a   :  { %3170 = vxpose.xlu1.b32.cont [10/16] (narrow) %v2872_v38, 16  ;;  %v1152_v57 = vpop.f32.mrf.mxu0 }
 0x49b   :  { %v1913_v1 = vadd.f32 %v1785_v46, %v6251_v22  ;;  %v1153_v6 = vadd.f32 %v6207_v58, %v1152_v57  ;;  %v2879_v51 = vpop.f32.mrf.mxu1  ;;  %v474_v15 = vmul.f32 %v6293_v12, %v455_v3  ;;  %v422_v41 = vmul.f32 %v6242_v26, %v421_v30 }
 0x49c   :  { %v2880_v54 = vadd.f32 %v6116_v9, %v2879_v51  ;;  %v1657_v57 = vmul.f32 0.5, %v6251_v22 }
 0x49d   :  { %v5210_v2 = vpop.eup %5209  ;;  %v2041_v20 = vmul.f32 0.7978846, %v1913_v1  ;;  %v426_v63 = vsel %vm6308_vm2, %v6242_v26, %v422_v41  ;;  %v1658_v3 = vmul.f32 0.5, %v1153_v6 }
 0x49e   :  { %v2296_v13 = vadd.f32 1.0, %v5210_v2  ;;  %v6320_v1 = vmul.f32 %v426_v63, %v268_v45 }
 0x49f   :  { %v4993_v56 = vpop.trf.xlu2  ;;  %5211 = vtanh.f32 %v2041_v20 }
 0x4a0   :  { %v4997_v28 = vunpack.i.h.bf16 %v4993_v56  ;;  %v4994_v42 = vunpack.i.l.bf16 %v4993_v56  ;;  %v493_v56 = vadd.f32 %v6301_v24, %v474_v15 }
 0x4a2   :  { %3171 = vxpose.xlu1.b32.cont [11/16] (narrow) %v2875_v25, 16  ;;  %v788_v38 = vpack.c.bf16 %v4997_v28, %v4992_v52  ;;  %v804_v47 = vpack.c.bf16 %v4994_v42, %v4989_v34  ;;  %v1402_v52 = vmul.f32 %v1153_v6, %v1153_v6  ;;  %v478_v34 = vmul.f32 %v6293_v12, %v459_v21 }
 0x4a3   :  { %v2424_v28 = vmul.f32 %v2296_v13, %v1656_v11  ;;  %v2881_v46 = vpop.f32.mrf.mxu1 }
 0x4a4   :  { %4622 = vmatmul.msk.bf16.gmra.mxu0 %vm833_vm6, %v788_v38  ;;  %4638 = vmatmul.msk.bf16.gmra.mxu3 %vm833_vm6, %v804_v47  ;;  %v1530_v27 = vmul.f32 %v1402_v52, %v1153_v6  ;;  %v497_v25 = vadd.f32 %v6301_v24, %v478_v34  ;;  %v2882_v0 = vadd.f32 %v6116_v9, %v2881_v46 }
 0x4a5   :  { %v2529_v37 = vpack.c.bf16 %v2424_v28, %v2423_v4  ;;  %v5212_v38 = vpop.eup %5211 }
 0x4a6   :  { %v1786_v36 = vmul.f32 0.044715, %v1530_v27  ;;  %v4998_v55 = vpack.i.bf16 %v493_v56, %v497_v25  ;;  %v2297_v60 = vadd.f32 1.0, %v5212_v38 }
 0x4a7   :  { %4693 = vmatmul.msk.bf16.gmra.mxu1 %vm2607_vm10, %v2529_v37 }
 0x4a8   :  { %v1914_v19 = vadd.f32 %v1786_v36, %v1153_v6  ;;  %4999 = vxpose.xlu0.b32.start [1/2] (short) %v4998_v55, 128  ;;  %v2425_v51 = vmul.f32 %v2297_v60, %v1657_v57 }
 0x4aa   :  { %3172 = vxpose.xlu1.b32.cont [12/16] (narrow) %v2877_v23, 16  ;;  %v2042_v35 = vmul.f32 0.7978846, %v1914_v19 }
 0x4ab   :  { %v2884_v23 = vpop.f32.mrf.mxu1 }
 0x4ac   :  { %5213 = vtanh.f32 %v2042_v35  ;;  %v2885_v6 = vadd.f32 %v6116_v9, %v2884_v23 }
 0x4b1   :  { %v1155_v47 = vpop.f32.mrf.mxu0 }
 0x4b2   :  { %3173 = vxpose.xlu1.b32.cont [13/16] (narrow) %v2880_v54, 16  ;;  %v1156_v53 = vadd.f32 %v6207_v58, %v1155_v47  ;;  %v5214_v8 = vpop.eup %5213 }
 0x4b3   :  { %v2298_v2 = vadd.f32 1.0, %v5214_v8  ;;  %v2886_v55 = vpop.f32.mrf.mxu1 }
 0x4b4   :  { %v1403_v33 = vmul.f32 %v1156_v53, %v1156_v53  ;;  %v2887_v41 = vadd.f32 %v6116_v9, %v2886_v55  ;;  %v1659_v54 = vmul.f32 0.5, %v1156_v53 }
 0x4b5   :  { %v2426_v15 = vmul.f32 %v2298_v2, %v1658_v3 }
 0x4b6   :  { %v1531_v21 = vmul.f32 %v1403_v33, %v1156_v53 }
 0x4b7   :  { %v2530_v13 = vpack.c.bf16 %v2426_v15, %v2425_v51 }
 0x4b8   :  { %v1787_v11 = vmul.f32 0.044715, %v1531_v21 }
 0x4b9   :  { %v1157_v20 = vpop.f32.mrf.mxu0  ;;  %4694 = vmatmul.msk.bf16.gmra.mxu1 %vm2607_vm10, %v2530_v13 }
 0x4ba   :  { %3174 = vxpose.xlu1.b32.cont [14/16] (narrow) %v2882_v0, 16  ;;  %v1915_v26 = vadd.f32 %v1787_v11, %v1156_v53  ;;  %v1158_v52 = vadd.f32 %v6207_v58, %v1157_v20 }
 0x4bc   :  { %v2043_v22 = vmul.f32 0.7978846, %v1915_v26  ;;  %v1404_v34 = vmul.f32 %v1158_v52, %v1158_v52  ;;  %v1660_v63 = vmul.f32 0.5, %v1158_v52 }
 0x4be   :  { %v1532_v27 = vmul.f32 %v1404_v34, %v1158_v52  ;;  %5215 = vtanh.f32 %v2043_v22 }
 0x4c0   :  { %v1788_v56 = vmul.f32 0.044715, %v1532_v27 }
 0x4c1   :  { %v1160_v4 = vpop.f32.mrf.mxu0 }
 0x4c2   :  { %3175 = vxpose.xlu1.b32.cont [15/16] (narrow) %v2885_v6, 16  ;;  %v1916_v30 = vadd.f32 %v1788_v56, %v1158_v52  ;;  %v1161_v25 = vadd.f32 %v6207_v58, %v1160_v4 }
 0x4c4   :  { %v2044_v28 = vmul.f32 0.7978846, %v1916_v30  ;;  %v1405_v36 = vmul.f32 %v1161_v25, %v1161_v25  ;;  %v5216_v37 = vpop.eup %5215  ;;  %v1661_v55 = vmul.f32 0.5, %v1161_v25 }
 0x4c5   :  { %v2299_v38 = vadd.f32 1.0, %v5216_v37 }
 0x4c6   :  { %5217 = vtanh.f32 %v2044_v28  ;;  %v1533_v19 = vmul.f32 %v1405_v36, %v1161_v25 }
 0x4c7   :  { %v1240_v35 = vpop.f32.mrf.mxu3  ;;  %v2427_v0 = vmul.f32 %v2299_v38, %v1659_v54 }
 0x4c8   :  { %v1789_v42 = vmul.f32 0.044715, %v1533_v19  ;;  %v1241_v29 = vadd.f32 %v6207_v58, %v1240_v35 }
 0x4c9   :  { %v1162_v45 = vpop.f32.mrf.mxu0 }
 0x4ca   :  { %3176 = vxpose.xlu1.b32.end [16/16] (narrow) %v2887_v41, 16  ;;  %v1917_v46 = vadd.f32 %v1789_v42, %v1161_v25  ;;  %v1163_v47 = vadd.f32 %v6207_v58, %v1162_v45  ;;  %v1437_v57 = vmul.f32 %v1241_v29, %v1241_v29 }
 0x4cc   :  { %v5218_v60 = vpop.eup %5217  ;;  %v2045_v33 = vmul.f32 0.7978846, %v1917_v46  ;;  %v1406_v3 = vmul.f32 %v1163_v47, %v1163_v47  ;;  %v1565_v21 = vmul.f32 %v1437_v57, %v1241_v29  ;;  %v1662_v38 = vmul.f32 0.5, %v1163_v47 }
 0x4cd   :  { %v2300_v8 = vadd.f32 1.0, %v5218_v60 }
 0x4ce   :  { %v1534_v9 = vmul.f32 %v1406_v3, %v1163_v47  ;;  %v1821_v11 = vmul.f32 0.044715, %v1565_v21  ;;  %5219 = vtanh.f32 %v2045_v33 }
 0x4cf   :  { %v2428_v2 = vmul.f32 %v2300_v8, %v1660_v63  ;;  %v1242_v51 = vpop.f32.mrf.mxu3 }
 0x4d0   :  { %v1790_v53 = vmul.f32 0.044715, %v1534_v9  ;;  %v1949_v20 = vadd.f32 %v1821_v11, %v1241_v29  ;;  %v1243_v26 = vadd.f32 %v6207_v58, %v1242_v51  ;;  %v1693_v11 = vmul.f32 0.5, %v1241_v29 }
 0x4d1   :  { %v1165_v15 = vpop.f32.mrf.mxu0  ;;  %v2531_v23 = vpack.c.bf16 %v2428_v2, %v2427_v0 }
 0x4d2   :  { %v1918_v22 = vadd.f32 %v1790_v53, %v1163_v47  ;;  %v2077_v52 = vmul.f32 0.7978846, %v1949_v20  ;;  %v1438_v34 = vmul.f32 %v1243_v26, %v1243_v26  ;;  %v1166_v27 = vadd.f32 %v6207_v58, %v1165_v15 }
 0x4d3   :  { %4695 = vmatmul.msk.bf16.gmra.mxu1 %vm2607_vm10, %v2531_v23 }
 0x4d4   :  { %v2046_v13 = vmul.f32 0.7978846, %v1918_v22  ;;  %v1566_v6 = vmul.f32 %v1438_v34, %v1243_v26  ;;  %v5220_v56 = vpop.eup %5219  ;;  %v1407_v4 = vmul.f32 %v1166_v27, %v1166_v27 }
 0x4d5   :  { %v2301_v37 = vadd.f32 1.0, %v5220_v56 }
 0x4d6   :  { %5221 = vtanh.f32 %v2046_v13  ;;  %v1822_v30 = vmul.f32 0.044715, %v1566_v6  ;;  %v1535_v28 = vmul.f32 %v1407_v4, %v1166_v27  ;;  %v6345_v13 = vmul.f32 0.0078125, %v6013_v17 }
 0x4d7   :  { %5223 = vtanh.f32 %v2077_v52  ;;  %v1245_v36 = vpop.f32.mrf.mxu3  ;;  %v2429_v25 = vmul.f32 %v2301_v37, %v1661_v55  ;;  %v1694_v52 = vmul.f32 0.5, %v1243_v26 }
 0x4d8   :  { %v1950_v19 = vadd.f32 %v1822_v30, %v1243_v26  ;;  %v1791_v42 = vmul.f32 0.044715, %v1535_v28  ;;  %v6334_v35 = vadd.f32 %v6207_v58, %v1245_v36 }
 0x4d9   :  { %v1167_v41 = vpop.f32.mrf.mxu0 }
 0x4da   :  { %v1168_v54 = vadd.f32 %v6207_v58, %v1167_v41  ;;  %v2078_v45 = vmul.f32 0.7978846, %v1950_v19  ;;  %v1919_v63 = vadd.f32 %v1791_v42, %v1166_v27  ;;  %v1439_v57 = vmul.f32 %v6334_v35, %v6334_v35 }
 0x4db   :  { %v232_v41 = vmul.f32 %v6345_v13, %v6345_v13 }
 0x4dc   :  { %v5222_v46 = vpop.eup %5221  ;;  %v1408_v60 = vmul.f32 %v1168_v54, %v1168_v54  ;;  %5225 = vtanh.f32 %v2078_v45  ;;  %v2047_v21 = vmul.f32 0.7978846, %v1919_v63  ;;  %v1567_v8 = vmul.f32 %v1439_v57, %v6334_v35 }
 0x4dd   :  { %v5224_v33 = vpop.eup %5223  ;;  %v2302_v3 = vadd.f32 1.0, %v5222_v46  ;;  %v1663_v46 = vmul.f32 0.5, %v1166_v27 }
 0x4de   :  { %v1536_v0 = vmul.f32 %v1408_v60, %v1168_v54  ;;  %5227 = vtanh.f32 %v2047_v21  ;;  %v1823_v2 = vmul.f32 0.044715, %v1567_v8  ;;  %v2333_v51 = vadd.f32 1.0, %v5224_v33 }
 0x4df   :  { %v2430_v9 = vmul.f32 %v2302_v3, %v1662_v38  ;;  %v1247_v53 = vpop.f32.mrf.mxu3 }
 0x4e0   :  { %v1792_v47 = vmul.f32 0.044715, %v1536_v0  ;;  %v6341_v20 = vadd.f32 %v6207_v58, %v1247_v53  ;;  %v1951_v22 = vadd.f32 %v1823_v2, %v6334_v35  ;;  %v2461_v28 = vmul.f32 %v2333_v51, %v1693_v11 }
 0x4e1   :  { %v1170_v15 = vpop.f32.mrf.mxu0  ;;  %v2532_v23 = vpack.c.bf16 %v2430_v9, %v2429_v25  ;;  %v1664_v9 = vmul.f32 0.5, %v1168_v54 }
 0x4e2   :  { %v5226_v34 = vpop.eup %5225  ;;  %v1920_v6 = vadd.f32 %v1792_v47, %v1168_v54  ;;  %v1440_v29 = vmul.f32 %v6341_v20, %v6341_v20  ;;  %v2079_v56 = vmul.f32 0.7978846, %v1951_v22  ;;  %v6351_v4 = vadd.f32 %v6207_v58, %v1170_v15 }
 0x4e3   :  { %4696 = vmatmul.msk.bf16.gmra.mxu1 %vm2607_vm10, %v2532_v23  ;;  %v2334_v30 = vadd.f32 1.0, %v5226_v34 }
 0x4e4   :  { %v2048_v36 = vmul.f32 0.7978846, %v1920_v6  ;;  %v1568_v55 = vmul.f32 %v1440_v29, %v6341_v20  ;;  %v5228_v26 = vpop.eup %5227  ;;  %v1409_v17 = vmul.f32 %v6351_v4, %v6351_v4 }
 0x4e5   :  { %v2462_v37 = vmul.f32 %v2334_v30, %v1694_v52  ;;  %v2303_v63 = vadd.f32 1.0, %v5228_v26 }
 0x4e6   :  { %5229 = vtanh.f32 %v2048_v36  ;;  %v1824_v19 = vmul.f32 0.044715, %v1568_v55  ;;  %v1537_v42 = vmul.f32 %v1409_v17, %v6351_v4 }
 0x4e7   :  { %5231 = vtanh.f32 %v2079_v56  ;;  %v1250_v38 = vpop.f32.mrf.mxu3  ;;  %v2548_v45 = vpack.c.bf16 %v2462_v37, %v2461_v28  ;;  %v2431_v15 = vmul.f32 %v2303_v63, %v1663_v46  ;;  %v1695_v28 = vmul.f32 0.5, %v6334_v35 }
 0x4e8   :  { %v1952_v57 = vadd.f32 %v1824_v19, %v6341_v20  ;;  %v6361_v60 = vadd.f32 %v6207_v58, %v1250_v38  ;;  %v1793_v25 = vmul.f32 0.044715, %v1537_v42  ;;  %v1696_v38 = vmul.f32 0.5, %v6341_v20 }
 0x4e9   :  { %v1172_v33 = vpop.f32.mrf.mxu0  ;;  %4712 = vmatmul.msk.bf16.vlgmr.msra.gmra.mxu2 %vm2607_vm10, %v2548_v45 }
 0x4ea   :  { %v194_v3 = vpop.xlane.xlu2 %193  ;;  %v1173_v21 = vadd.f32 %v6207_v58, %v1172_v33  ;;  %v1441_v0 = vmul.f32 %v6361_v60, %v6361_v60  ;;  %v1921_v27 = vadd.f32 %v1793_v25, %v6351_v4  ;;  %v2080_v2 = vmul.f32 0.7978846, %v1952_v57 }
 0x4eb   :  { %v216_v8 = vmul.f32 0.0078125, %v194_v3 }
 0x4ec   :  { %v1410_v11 = vmul.f32 %v1173_v21, %v1173_v21  ;;  %v5230_v47 = vpop.eup %5229  ;;  %v1569_v51 = vmul.f32 %v1441_v0, %v6361_v60  ;;  %v2049_v22 = vmul.f32 0.7978846, %v1921_v27  ;;  %5233 = vtanh.f32 %v2080_v2 }
 0x4ed   :  { %v248_v53 = vsub.f32 %v216_v8, %v232_v41  ;;  %v5232_v23 = vpop.eup %5231  ;;  %v2304_v34 = vadd.f32 1.0, %v5230_v47 }
 0x4ee   :  { %v1538_v52 = vmul.f32 %v1410_v11, %v1173_v21  ;;  %v1825_v29 = vmul.f32 0.044715, %v1569_v51  ;;  %5235 = vtanh.f32 %v2049_v22  ;;  %v2335_v17 = vadd.f32 1.0, %v5232_v23 }
 0x4ef   :  { %v6369_v6 = vadd.f32 1e-05, %v248_v53  ;;  %v1252_v54 = vpop.f32.mrf.mxu3  ;;  %v2432_v30 = vmul.f32 %v2304_v34, %v1664_v9  ;;  %v1665_v11 = vmul.f32 0.5, %v6351_v4 }
 0x4f0   :  { %v1794_v56 = vmul.f32 0.044715, %v1538_v52  ;;  %v1953_v36 = vadd.f32 %v1825_v29, %v6361_v60  ;;  %v6375_v55 = vadd.f32 %v6207_v58, %v1252_v54  ;;  %v2463_v3 = vmul.f32 %v2335_v17, %v1695_v28 }
 0x4f1   :  { %5237 = vrsqrt.f32 %v6369_v6  ;;  %v1175_v26 = vpop.f32.mrf.mxu0  ;;  %v2533_v41 = vpack.c.bf16 %v2432_v30, %v2431_v15  ;;  %vm383_vm4 = vweird.f32 %v6369_v6 }
 0x4f2   :  { %v1922_v37 = vadd.f32 %v1794_v56, %v1173_v21  ;;  %v6378_v19 = vadd.f32 %v6207_v58, %v1175_v26  ;;  %v1442_v42 = vmul.f32 %v6375_v55, %v6375_v55  ;;  %v5234_v35 = vpop.eup %5233  ;;  %v2081_v45 = vmul.f32 0.7978846, %v1953_v36 }
 0x4f3   :  { %4697 = vmatmul.msk.bf16.gmra.mxu1 %vm2607_vm10, %v2533_v41  ;;  %v2336_v33 = vadd.f32 1.0, %v5234_v35  ;;  %v1666_v56 = vmul.f32 0.5, %v1173_v21  ;;  %v6404_v21 = vpop.f32.mrf.mxu1 }
 0x4f4   :  { %v2050_v46 = vmul.f32 0.7978846, %v1922_v37  ;;  %v1411_v63 = vmul.f32 %v6378_v19, %v6378_v19  ;;  %v1570_v57 = vmul.f32 %v1442_v42, %v6375_v55  ;;  %v5236_v25 = vpop.eup %5235 }
 0x4f5   :  { %v2464_v27 = vmul.f32 %v2336_v33, %v1696_v38  ;;  %v2305_v53 = vadd.f32 1.0, %v5236_v25 }
 0x4f6   :  { %5239 = vtanh.f32 %v2050_v46  ;;  %v1539_v8 = vmul.f32 %v1411_v63, %v6378_v19  ;;  %v1826_v9 = vmul.f32 0.044715, %v1570_v57  ;;  %v264_v63 = vsub.f32 %v6161_v16, %v6345_v13 }
 0x4f7   :  { %v5238_v0 = vpop.eup %5237  ;;  %5241 = vtanh.f32 %v2081_v45  ;;  %v1255_v47 = vpop.f32.mrf.mxu3  ;;  %v2549_v22 = vpack.c.bf16 %v2464_v27, %v2463_v3  ;;  %v2433_v41 = vmul.f32 %v2305_v53, %v1665_v11 }
 0x4f8   :  { %v378_v20 = vmul.f32 %v5238_v0, %v6369_v6  ;;  %v1795_v2 = vmul.f32 0.044715, %v1539_v8  ;;  %v1954_v51 = vadd.f32 %v1826_v9, %v6375_v55  ;;  %v6392_v15 = vadd.f32 %v6207_v58, %v1255_v47 }
 0x4f9   :  { %v1177_v23 = vpop.f32.mrf.mxu0  ;;  %4713 = vmatmul.msk.bf16.gmra.mxu2 %vm2607_vm10, %v2549_v22  ;;  %vm384_vm3 = vweird.f32 %v5238_v0  ;;  %v479_v47 = vmul.f32 %v6293_v12, %v6320_v1 }
 0x4fa   :  { %v379_v52 = vmul.f32 %v5238_v0, %v378_v20  ;;  %v1923_v34 = vadd.f32 %v1795_v2, %v6378_v19  ;;  %v6396_v29 = vadd.f32 %v6207_v58, %v1177_v23  ;;  %v1443_v4 = vmul.f32 %v6392_v15, %v6392_v15  ;;  %vm385_vm5 = vmor %vm383_vm4, %vm384_vm3 }
 0x4fb   :  { %v2082_v54 = vmul.f32 0.7978846, %v1954_v51  ;;  %v1697_v20 = vmul.f32 0.5, %v6361_v60  ;;  %v1698_v60 = vmul.f32 0.5, %v6375_v55  ;;  %v1667_v55 = vmul.f32 0.5, %v6378_v19 }
 0x4fc   :  { %v5240_v30 = vpop.eup %5239  ;;  %v380_v28 = vmul.f32 0.5, %v379_v52  ;;  %v2051_v36 = vmul.f32 0.7978846, %v1923_v34  ;;  %v1412_v26 = vmul.f32 %v6396_v29, %v6396_v29  ;;  %v1571_v17 = vmul.f32 %v1443_v4, %v6392_v15 }
 0x4fd   :  { %v2306_v37 = vadd.f32 1.0, %v5240_v30  ;;  %v5242_v42 = vpop.eup %5241  ;;  %v1668_v19 = vmul.f32 0.5, %v6396_v29 }
 0x4fe   :  { %v381_v38 = vsub.f32 1.5, %v380_v28  ;;  %5243 = vtanh.f32 %v2051_v36  ;;  %v1540_v35 = vmul.f32 %v1412_v26, %v6396_v29  ;;  %v1827_v45 = vmul.f32 0.044715, %v1571_v17  ;;  %v6432_v26 = vpop.f32.mrf.mxu1 }
 0x4ff   :  { %v2434_v46 = vmul.f32 %v2306_v37, %v1666_v56  ;;  %5245 = vtanh.f32 %v2082_v54  ;;  %v1257_v3 = vpop.f32.mrf.mxu3  ;;  %v2337_v13 = vadd.f32 1.0, %v5242_v42  ;;  %v498_v28 = vadd.f32 %v6301_v24, %v479_v47 }
 0x500   :  { %v382_v57 = vmul.f32 %v5238_v0, %v381_v38  ;;  %v1796_v33 = vmul.f32 0.044715, %v1540_v35  ;;  %v1955_v25 = vadd.f32 %v1827_v45, %v6392_v15  ;;  %v6412_v8 = vadd.f32 %v6207_v58, %v1257_v3 }
 0x501   :  { %v1180_v9 = vpop.f32.mrf.mxu0  ;;  %v2534_v27 = vpack.c.bf16 %v2434_v46, %v2433_v41  ;;  %v2465_v54 = vmul.f32 %v2337_v13, %v1697_v20 }
 0x502   :  { %v386_v11 = vsel %vm385_vm5, %v5238_v0, %v382_v57  ;;  %v1924_v2 = vadd.f32 %v1796_v33, %v6396_v29  ;;  %v6417_v16 = vadd.f32 %v6207_v58, %v1180_v9  ;;  %v1444_v53 = vmul.f32 %v6412_v8, %v6412_v8 }
 0x503   :  { %v456_v6 = vmul.f32 %v386_v11, %v264_v63  ;;  %4698 = vmatmul.msk.bf16.gmra.mxu1 %vm2607_vm10, %v2534_v27  ;;  %v2083_v34 = vmul.f32 0.7978846, %v1955_v25 }
 0x504   :  { %v5244_v51 = vpop.eup %5243  ;;  %v2052_v23 = vmul.f32 0.7978846, %v1924_v2  ;;  %v1413_v22 = vmul.f32 %v6417_v16, %v6417_v16  ;;  %v1572_v56 = vmul.f32 %v1444_v53, %v6412_v8 }
 0x505   :  { %v5246_v0 = vpop.eup %5245  ;;  %v475_v52 = vmul.f32 %v6293_v12, %v456_v6  ;;  %v2307_v17 = vadd.f32 1.0, %v5244_v51 }
 0x506   :  { %5247 = vtanh.f32 %v2052_v23  ;;  %v1541_v1 = vmul.f32 %v1413_v22, %v6417_v16  ;;  %v2338_v4 = vadd.f32 1.0, %v5246_v0  ;;  %v1828_v36 = vmul.f32 0.044715, %v1572_v56  ;;  %v6450_v0 = vpop.f32.mrf.mxu1 }
 0x507   :  { %v494_v30 = vadd.f32 %v6301_v24, %v475_v52  ;;  %v1260_v12 = vpop.f32.mrf.mxu3  ;;  %5249 = vtanh.f32 %v2083_v34  ;;  %v2435_v11 = vmul.f32 %v2307_v17, %v1667_v55  ;;  %v1699_v56 = vmul.f32 0.5, %v6392_v15 }
 0x508   :  { %v1797_v37 = vmul.f32 0.044715, %v1541_v1  ;;  %v2466_v41 = vmul.f32 %v2338_v4, %v1698_v60  ;;  %v1956_v38 = vadd.f32 %v1828_v36, %v6412_v8  ;;  %v6437_v35 = vadd.f32 %v6207_v58, %v1260_v12 }
 0x509   :  { %v5000_v42 = vpack.i.bf16 %v494_v30, %v498_v28  ;;  %v1182_v45 = vpop.f32.mrf.mxu0  ;;  %v1700_v28 = vmul.f32 0.5, %v6412_v8 }
 0x50a   :  { %v1925_v46 = vadd.f32 %v1797_v37, %v6417_v16  ;;  %v1183_v24 = vadd.f32 %v6207_v58, %v1182_v45  ;;  %v2550_v63 = vpack.c.bf16 %v2466_v41, %v2465_v54  ;;  %v1445_v57 = vmul.f32 %v6437_v35, %v6437_v35 }
 0x50b   :  { %5001 = vxpose.xlu0.b32.end [2/2] (short) %v5000_v42, 128  ;;  %v2084_v33 = vmul.f32 0.7978846, %v1956_v38  ;;  %v1669_v38 = vmul.f32 0.5, %v6417_v16 }
 0x50c   :  { %v5248_v3 = vpop.eup %5247  ;;  %v2053_v25 = vmul.f32 0.7978846, %v1925_v46  ;;  %v1414_v9 = vmul.f32 %v1183_v24, %v1183_v24  ;;  %4714 = vmatmul.msk.bf16.gmra.mxu2 %vm2607_vm10, %v2550_v63  ;;  %v1573_v27 = vmul.f32 %v1445_v57, %v6437_v35 }
 0x50d   :  { %v2308_v20 = vadd.f32 1.0, %v5248_v3  ;;  %v5250_v13 = vpop.eup %5249  ;;  %5251 = vtanh.f32 %v2084_v33 }
 0x50e   :  { %v1542_v2 = vmul.f32 %v1414_v9, %v1183_v24  ;;  %v1829_v6 = vmul.f32 0.044715, %v1573_v27  ;;  %5253 = vtanh.f32 %v2053_v25  ;;  %v2339_v1 = vadd.f32 1.0, %v5250_v13 }
 0x50f   :  { %v2436_v47 = vmul.f32 %v2308_v20, %v1668_v19  ;;  %v1262_v53 = vpop.f32.mrf.mxu3  ;;  %v1670_v27 = vmul.f32 0.5, %v1183_v24 }
 0x510   :  { %v1798_v29 = vmul.f32 0.044715, %v1542_v2  ;;  %v1957_v51 = vadd.f32 %v1829_v6, %v6437_v35  ;;  %v6448_v23 = vadd.f32 %v6207_v58, %v1262_v53  ;;  %v2467_v41 = vmul.f32 %v2339_v1, %v1699_v56  ;;  %v6473_v2 = vpop.f32.mrf.mxu1 }
 0x511   :  { %v1185_v22 = vpop.f32.mrf.mxu0  ;;  %v2535_v60 = vpack.c.bf16 %v2436_v47, %v2435_v11 }
 0x512   :  { %v1926_v52 = vadd.f32 %v1798_v29, %v1183_v24  ;;  %v6453_v34 = vadd.f32 %v6207_v58, %v1185_v22  ;;  %v1446_v4 = vmul.f32 %v6448_v23, %v6448_v23  ;;  %v2085_v55 = vmul.f32 0.7978846, %v1957_v51 }
 0x513   :  { %4699 = vmatmul.msk.bf16.gmra.mxu1 %vm2607_vm10, %v2535_v60  ;;  %v5252_v36 = vpop.eup %5251 }
 0x514   :  { %v2054_v54 = vmul.f32 0.7978846, %v1926_v52  ;;  %v1415_v30 = vmul.f32 %v6453_v34, %v6453_v34  ;;  %v1574_v17 = vmul.f32 %v1446_v4, %v6448_v23  ;;  %v5254_v37 = vpop.eup %5253  ;;  %v2340_v12 = vadd.f32 1.0, %v5252_v36 }
 0x515   :  { %v2309_v19 = vadd.f32 1.0, %v5254_v37 }
 0x516   :  { %5255 = vtanh.f32 %v2054_v54  ;;  %v1543_v15 = vmul.f32 %v1415_v30, %v6453_v34  ;;  %v1830_v42 = vmul.f32 0.044715, %v1574_v17  ;;  %v2468_v63 = vmul.f32 %v2340_v12, %v1700_v28 }
 0x517   :  { %v1265_v46 = vpop.f32.mrf.mxu3  ;;  %5257 = vtanh.f32 %v2085_v55  ;;  %v2437_v53 = vmul.f32 %v2309_v19, %v1669_v38  ;;  %v1701_v55 = vmul.f32 0.5, %v6437_v35 }
 0x518   :  { %v1799_v45 = vmul.f32 0.044715, %v1543_v15  ;;  %v1958_v8 = vadd.f32 %v1830_v42, %v6448_v23  ;;  %v6467_v57 = vadd.f32 %v6207_v58, %v1265_v46  ;;  %v2551_v9 = vpack.c.bf16 %v2468_v63, %v2467_v41  ;;  %v6487_v63 = vpop.f32.mrf.mxu1 }
 0x519   :  { %v1187_v33 = vpop.f32.mrf.mxu0  ;;  %v1702_v42 = vmul.f32 0.5, %v6448_v23 }
 0x51a   :  { %v1927_v3 = vadd.f32 %v1799_v45, %v6453_v34  ;;  %v1188_v25 = vadd.f32 %v6207_v58, %v1187_v33  ;;  %v1447_v16 = vmul.f32 %v6467_v57, %v6467_v57  ;;  %v2086_v20 = vmul.f32 0.7978846, %v1958_v8 }
 0x51c   :  { %v5256_v11 = vpop.eup %5255  ;;  %v2055_v13 = vmul.f32 0.7978846, %v1927_v3  ;;  %v1416_v6 = vmul.f32 %v1188_v25, %v1188_v25  ;;  %4715 = vmatmul.msk.bf16.gmra.mxu2 %vm2607_vm10, %v2551_v9  ;;  %v1575_v29 = vmul.f32 %v1447_v16, %v6467_v57  ;;  %5259 = vtanh.f32 %v2086_v20 }
 0x51d   :  { %v2310_v47 = vadd.f32 1.0, %v5256_v11  ;;  %v5258_v22 = vpop.eup %5257  ;;  %v1671_v16 = vmul.f32 0.5, %v6453_v34 }
 0x51e   :  { %v1544_v51 = vmul.f32 %v1416_v6, %v1188_v25  ;;  %v1831_v60 = vmul.f32 0.044715, %v1575_v29  ;;  %5261 = vtanh.f32 %v2055_v13  ;;  %v2341_v17 = vadd.f32 1.0, %v5258_v22 }
 0x51f   :  { %v2438_v52 = vmul.f32 %v2310_v47, %v1670_v27  ;;  %v1267_v56 = vpop.f32.mrf.mxu3 }
 0x520   :  { %v1800_v24 = vmul.f32 0.044715, %v1544_v51  ;;  %v1959_v1 = vadd.f32 %v1831_v60, %v6467_v57  ;;  %v1268_v4 = vadd.f32 %v6207_v58, %v1267_v56  ;;  %v2469_v8 = vmul.f32 %v2341_v17, %v1701_v55  ;;  %v6495_v17 = vpop.f32.mrf.mxu1 }
 0x521   :  { %v1190_v54 = vpop.f32.mrf.mxu0  ;;  %v2536_v30 = vpack.c.bf16 %v2438_v52, %v2437_v53  ;;  %v1672_v53 = vmul.f32 0.5, %v1188_v25 }
 0x522   :  { %v1928_v28 = vadd.f32 %v1800_v24, %v1188_v25  ;;  %v6480_v36 = vadd.f32 %v6207_v58, %v1190_v54  ;;  %v2087_v37 = vmul.f32 0.7978846, %v1959_v1  ;;  %v1448_v15 = vmul.f32 %v1268_v4, %v1268_v4  ;;  %v5260_v38 = vpop.eup %5259 }
 0x523   :  { %4700 = vmatmul.msk.bf16.gmra.mxu1 %vm2607_vm10, %v2536_v30  ;;  %v2342_v35 = vadd.f32 1.0, %v5260_v38 }
 0x524   :  { %v2056_v12 = vmul.f32 0.7978846, %v1928_v28  ;;  %v1417_v41 = vmul.f32 %v6480_v36, %v6480_v36  ;;  %v1576_v45 = vmul.f32 %v1448_v15, %v1268_v4  ;;  %v5262_v46 = vpop.eup %5261 }
 0x525   :  { %v2470_v27 = vmul.f32 %v2342_v35, %v1702_v42  ;;  %v2311_v20 = vadd.f32 1.0, %v5262_v46  ;;  %v1704_v46 = vmul.f32 0.5, %v1268_v4 }
 0x526   :  { %5263 = vtanh.f32 %v2056_v12  ;;  %v1545_v19 = vmul.f32 %v1417_v41, %v6480_v36  ;;  %v1832_v33 = vmul.f32 0.044715, %v1576_v45  ;;  %v6501_v41 = vld [vmem:[%s7812_s6] ss:$0 sm:$0xff] }
 0x527   :  { %5265 = vtanh.f32 %v2087_v37  ;;  %v1270_v9 = vpop.f32.mrf.mxu3  ;;  %v2552_v29 = vpack.c.bf16 %v2470_v27, %v2469_v8  ;;  %v2439_v54 = vmul.f32 %v2311_v20, %v1671_v16  ;;  %v1703_v37 = vmul.f32 0.5, %v6467_v57 }
 0x528   :  { %v1801_v3 = vmul.f32 0.044715, %v1545_v19  ;;  %v1960_v11 = vadd.f32 %v1832_v33, %v1268_v4  ;;  %v1271_v23 = vadd.f32 %v6207_v58, %v1270_v9  ;;  %v6506_v4 = vpop.f32.mrf.mxu1 }
 0x529   :  { %v1192_v13 = vpop.f32.mrf.mxu0 }
 0x52a   :  { %v1929_v6 = vadd.f32 %v1801_v3, %v6480_v36  ;;  %v1193_v47 = vadd.f32 %v6207_v58, %v1192_v13  ;;  %v1449_v51 = vmul.f32 %v1271_v23, %v1271_v23  ;;  %v2088_v22 = vmul.f32 0.7978846, %v1960_v11 }
 0x52b   :  { %v1673_v13 = vmul.f32 0.5, %v6480_v36 }
 0x52c   :  { %v5264_v60 = vpop.eup %5263  ;;  %v2057_v52 = vmul.f32 0.7978846, %v1929_v6  ;;  %v1418_v24 = vmul.f32 %v1193_v47, %v1193_v47  ;;  %4716 = vmatmul.msk.bf16.gmra.mxu2 %vm2607_vm10, %v2552_v29  ;;  %v1577_v1 = vmul.f32 %v1449_v51, %v1271_v23  ;;  %5267 = vtanh.f32 %v2088_v22 }
 0x52d   :  { %v5266_v56 = vpop.eup %5265  ;;  %v2312_v34 = vadd.f32 1.0, %v5264_v60 }
 0x52e   :  { %v1546_v30 = vmul.f32 %v1418_v24, %v1193_v47  ;;  %v1833_v28 = vmul.f32 0.044715, %v1577_v1  ;;  %5269 = vtanh.f32 %v2057_v52  ;;  %v2343_v15 = vadd.f32 1.0, %v5266_v56 }
 0x52f   :  { %v2440_v55 = vmul.f32 %v2312_v34, %v1672_v53  ;;  %v1272_v25 = vpop.f32.mrf.mxu3  ;;  %v1674_v53 = vmul.f32 0.5, %v1193_v47  ;;  %v1705_v34 = vmul.f32 0.5, %v1271_v23 }
 0x530   :  { %v1802_v58 = vmul.f32 0.044715, %v1546_v30  ;;  %v1961_v12 = vadd.f32 %v1833_v28, %v1271_v23  ;;  %v1273_v42 = vadd.f32 %v6501_v41, %v1272_v25  ;;  %v2471_v57 = vmul.f32 %v2343_v15, %v1703_v37  ;;  %v6509_v36 = vpop.f32.mrf.mxu1  ;;  %v6516_v37 = vld [vmem:[%s7814_s8] ss:$0 sm:$0xff] }
 0x531   :  { %v2537_v38 = vpack.c.bf16 %v2440_v55, %v2439_v54  ;;  %v2810_v23 = vadd.f32 %v6516_v37, %v6003_v14  ;;  %v2812_v15 = vadd.f32 %v6516_v37, %v6011_v61  ;;  %v2822_v14 = vadd.f32 %v6516_v37, %v6051_v48 }
 0x532   :  { %v1930_v45 = vadd.f32 %v1802_v58, %v1193_v47  ;;  %v5268_v19 = vpop.eup %5267  ;;  %v2089_v35 = vmul.f32 0.7978846, %v1961_v12  ;;  %v1450_v8 = vmul.f32 %v1273_v42, %v1273_v42  ;;  %v1706_v30 = vmul.f32 0.5, %v1273_v42 }
 0x533   :  { %4701 = vmatmul.msk.bf16.gmra.mxu1 %vm2607_vm10, %v2537_v38  ;;  %v2344_v3 = vadd.f32 1.0, %v5268_v19  ;;  %v2815_v12 = vadd.f32 %v6516_v37, %v6019_v5  ;;  %v2820_v38 = vadd.f32 %v6516_v37, %v6040_v7  ;;  %v2825_v5 = vadd.f32 %v6516_v37, %v6057_v43 }
 0x534   :  { %v2058_v33 = vmul.f32 0.7978846, %v1930_v45  ;;  %v1578_v9 = vmul.f32 %v1450_v8, %v1273_v42  ;;  %v5270_v27 = vpop.eup %5269  ;;  %v2827_v48 = vadd.f32 %v6516_v37, %v6064_v39  ;;  %v2830_v43 = vadd.f32 %v6516_v37, %v6069_v32 }
 0x535   :  { %v2472_v16 = vmul.f32 %v2344_v3, %v1704_v46  ;;  %v2313_v6 = vadd.f32 1.0, %v5270_v27  ;;  %v2832_v39 = vadd.f32 %v6516_v37, %v6071_v50 }
 0x536   :  { %5271 = vtanh.f32 %v2058_v33  ;;  %v1834_v20 = vmul.f32 0.044715, %v1578_v9 }
 0x537   :  { %5273 = vtanh.f32 %v2089_v35  ;;  %v2553_v11 = vpack.c.bf16 %v2472_v16, %v2471_v57  ;;  %v2441_v24 = vmul.f32 %v2313_v6, %v1673_v13  ;;  %v6540_v6 = vpop.trf.xlu1 }
 0x538   :  { %v1962_v29 = vadd.f32 %v1834_v20, %v1273_v42  ;;  %v2817_v42 = vadd.f32 %v6516_v37, %v6030_v44 }
 0x53a   :  { %v2090_v51 = vmul.f32 0.7978846, %v1962_v29 }
 0x53c   :  { %v5272_v22 = vpop.eup %5271  ;;  %4717 = vmatmul.msk.bf16.gmra.mxu2 %vm2607_vm10, %v2553_v11  ;;  %5275 = vtanh.f32 %v2090_v51 }
 0x53d   :  { %v5274_v60 = vpop.eup %5273  ;;  %v2314_v52 = vadd.f32 1.0, %v5272_v22 }
 0x53e   :  { %v2345_v1 = vadd.f32 1.0, %v5274_v60 }
 0x53f   :  { %v2442_v56 = vmul.f32 %v2314_v52, %v1674_v53  ;;  %v6544_v32 = vpop.trf.xlu1  ;;  %v2835_v52 = vadd.f32 %v6516_v37, %v6074_v62 }
 0x540   :  { %v2473_v47 = vmul.f32 %v2345_v1, %v1705_v34 }
 0x541   :  { %v2538_v54 = vpack.c.bf16 %v2442_v56, %v2441_v24  ;;  %v813_v24 = vpack.c.bf16 %v6544_v32, %v6540_v6 }
 0x542   :  { %v5276_v28 = vpop.eup %5275 }
 0x543   :  { %4702 = vmatmul.msk.bf16.gmra.mxu1 %vm2607_vm10, %v2538_v54  ;;  %v2346_v55 = vadd.f32 1.0, %v5276_v28  ;;  %v2837_v54 = vadd.f32 %v6516_v37, %v6076_v49 }
 0x545   :  { %v2474_v58 = vmul.f32 %v2346_v55, %v1706_v30 }
 0x547   :  { %v2554_v25 = vpack.c.bf16 %v2474_v58, %v2473_v47  ;;  %v6552_v1 = vpop.trf.xlu1 }
 0x54c   :  { %4718 = vmatmul.msk.bf16.gmra.mxu2 %vm2607_vm10, %v2554_v25  ;;  %v2840_v25 = vadd.f32 %v6516_v37, %v6079_v10 }
 0x54f   :  { %v6556_v58 = vpop.trf.xlu1 }
 0x583   :  { %3129 = vxpose.xlu0.b32.start [1/16] (narrow) %v2810_v23, 16  ;;  %v814_v23 = vpack.c.bf16 %v6556_v58, %v6552_v1 }
 0x58b   :  { %3130 = vxpose.xlu0.b32.cont [2/16] (narrow) %v2812_v15, 16 }
 0x593   :  { %3131 = vxpose.xlu0.b32.cont [3/16] (narrow) %v2815_v12, 16 }
 0x59b   :  { %3132 = vxpose.xlu0.b32.cont [4/16] (narrow) %v2817_v42, 16  ;;  %v6564_v42 = vpop.trf.xlu1 }
 0x5a3   :  { %3133 = vxpose.xlu0.b32.cont [5/16] (narrow) %v2820_v38, 16  ;;  %v2842_v38 = vadd.f32 %v6516_v37, %v6082_v40 }
 0x5a7   :  { %v5002_v45 = vpop.trf.xlu0 }
 0x5a8   :  { %v5006_v46 = vunpack.i.h.bf16 %v5002_v45  ;;  %v5003_v61 = vunpack.i.l.bf16 %v5002_v45 }
 0x5ab   :  { %3134 = vxpose.xlu0.b32.cont [6/16] (narrow) %v2822_v14, 16 }
 0x5af   :  { %v5007_v19 = vpop.trf.xlu0 }
 0x5b0   :  { %v5011_v35 = vunpack.i.h.bf16 %v5007_v19  ;;  %v5008_v8 = vunpack.i.l.bf16 %v5007_v19  ;;  %v6568_v19 = vpop.trf.xlu1 }
 0x5b2   :  { %v789_v33 = vpack.c.bf16 %v5011_v35, %v5006_v46  ;;  %v805_v44 = vpack.c.bf16 %v5008_v8, %v5003_v61  ;;  %v2845_v35 = vadd.f32 %v6516_v37, %v6084_v18  ;;  %v815_v8 = vpack.c.bf16 %v6568_v19, %v6564_v42 }
 0x5b3   :  { %3135 = vxpose.xlu0.b32.cont [7/16] (narrow) %v2825_v5, 16 }
 0x5b4   :  { %4623 = vmatmul.msk.bf16.gmra.mxu0 %vm833_vm6, %v789_v33  ;;  %4639 = vmatmul.msk.bf16.gmra.mxu3 %vm833_vm6, %v805_v44 }
 0x5b7   :  { %v5012_v7 = vpop.trf.xlu0 }
 0x5b8   :  { %v5016_v3 = vunpack.i.h.bf16 %v5012_v7  ;;  %v5013_v57 = vunpack.i.l.bf16 %v5012_v7  ;;  %v6576_v44 = vpop.trf.xlu1  ;;  %v2847_v7 = vadd.f32 %v6516_v37, %v6087_v59 }
 0x5bb   :  { %3136 = vxpose.xlu0.b32.cont [8/16] (narrow) %v2827_v48, 16 }
 0x5bf   :  { %v5017_v9 = vpop.trf.xlu0 }
 0x5c0   :  { %v5021_v27 = vunpack.i.h.bf16 %v5017_v9  ;;  %v5018_v16 = vunpack.i.l.bf16 %v5017_v9 }
 0x5c2   :  { %v790_v20 = vpack.c.bf16 %v5021_v27, %v5016_v3  ;;  %v806_v11 = vpack.c.bf16 %v5018_v16, %v5013_v57  ;;  %v6580_v27 = vpop.trf.xlu1 }
 0x5c3   :  { %3137 = vxpose.xlu0.b32.cont [9/16] (narrow) %v2830_v43, 16  ;;  %v816_v16 = vpack.c.bf16 %v6580_v27, %v6576_v44 }
 0x5c4   :  { %4624 = vmatmul.msk.bf16.gmra.mxu0 %vm833_vm6, %v790_v20  ;;  %4640 = vmatmul.msk.bf16.gmra.mxu3 %vm833_vm6, %v806_v11 }
 0x5c7   :  { %v5022_v13 = vpop.trf.xlu0 }
 0x5c8   :  { %v5026_v29 = vunpack.i.h.bf16 %v5022_v13  ;;  %v5023_v53 = vunpack.i.l.bf16 %v5022_v13 }
 0x5ca   :  { %v6586_v13 = vpop.trf.xlu1 }
 0x5cb   :  { %3138 = vxpose.xlu0.b32.cont [10/16] (narrow) %v2832_v39, 16 }
 0x5cf   :  { %v5027_v51 = vpop.trf.xlu0 }
 0x5d0   :  { %v5031_v22 = vunpack.i.h.bf16 %v5027_v51  ;;  %v5028_v60 = vunpack.i.l.bf16 %v5027_v51 }
 0x5d2   :  { %v791_v56 = vpack.c.bf16 %v5031_v22, %v5026_v29  ;;  %v807_v34 = vpack.c.bf16 %v5028_v60, %v5023_v53  ;;  %v6588_v22 = vpop.trf.xlu1 }
 0x5d3   :  { %3139 = vxpose.xlu0.b32.cont [11/16] (narrow) %v2835_v52, 16  ;;  %v817_v60 = vpack.c.bf16 %v6588_v22, %v6586_v13 }
 0x5d4   :  { %4625 = vmatmul.msk.bf16.gmra.mxu0 %vm833_vm6, %v791_v56  ;;  %4641 = vmatmul.msk.bf16.gmra.mxu3 %vm833_vm6, %v807_v34 }
 0x5d7   :  { %v5032_v50 = vpop.trf.xlu0 }
 0x5d8   :  { %v5036_v30 = vunpack.i.h.bf16 %v5032_v50  ;;  %v5033_v28 = vunpack.i.l.bf16 %v5032_v50 }
 0x5da   :  { %v6594_v50 = vpop.trf.xlu1 }
 0x5db   :  { %3140 = vxpose.xlu0.b32.cont [12/16] (narrow) %v2837_v54, 16 }
 0x5df   :  { %v5037_v62 = vpop.trf.xlu0 }
 0x5e0   :  { %v5041_v55 = vunpack.i.h.bf16 %v5037_v62  ;;  %v5038_v47 = vunpack.i.l.bf16 %v5037_v62 }
 0x5e2   :  { %v792_v15 = vpack.c.bf16 %v5041_v55, %v5036_v30  ;;  %v808_v12 = vpack.c.bf16 %v5038_v47, %v5033_v28  ;;  %v6596_v47 = vpop.trf.xlu1 }
 0x5e3   :  { %3141 = vxpose.xlu0.b32.cont [13/16] (narrow) %v2840_v25, 16 }
 0x5e4   :  { %4626 = vmatmul.msk.bf16.gmra.mxu0 %vm833_vm6, %v792_v15  ;;  %4642 = vmatmul.msk.bf16.gmra.mxu3 %vm833_vm6, %v808_v12 }
 0x5e7   :  { %v5042_v49 = vpop.trf.xlu0 }
 0x5e8   :  { %v5046_v45 = vunpack.i.h.bf16 %v5042_v49  ;;  %v5043_v14 = vunpack.i.l.bf16 %v5042_v49  ;;  %v5485_v49 = vld [vmem:[#allocation2] sm:$0xff] }
 0x5eb   :  { %3142 = vxpose.xlu0.b32.cont [14/16] (narrow) %v2842_v38, 16 }
 0x5ef   :  { %v5047_v10 = vpop.trf.xlu0 }
 0x5f0   :  { %v5051_v46 = vunpack.i.h.bf16 %v5047_v10  ;;  %v5048_v61 = vunpack.i.l.bf16 %v5047_v10  ;;  %v818_v10 = vpack.c.bf16 %v6596_v47, %v6594_v50 }
 0x5f2   :  { %v793_v5 = vpack.c.bf16 %v5051_v46, %v5046_v45  ;;  %v809_v33 = vpack.c.bf16 %v5048_v61, %v5043_v14  ;;  %v6602_v45 = vpop.f32.mrf.mxu1  ;;  %v6605_v14 = vpop.trf.xlu1 }
 0x5f3   :  { %3143 = vxpose.xlu0.b32.cont [15/16] (narrow) %v2845_v35, 16 }
 0x5f4   :  { %4627 = vmatmul.msk.bf16.gmra.mxu0 %vm833_vm6, %v793_v5  ;;  %4643 = vmatmul.msk.bf16.gmra.mxu3 %vm833_vm6, %v809_v33 }
 0x5f7   :  { %v5052_v40 = vpop.trf.xlu0 }
 0x5f8   :  { %v5056_v48 = vunpack.i.h.bf16 %v5052_v40  ;;  %v5053_v3 = vunpack.i.l.bf16 %v5052_v40 }
 0x5fa   :  { %v6612_v33 = vpop.trf.xlu1  ;;  %v6614_v40 = vpop.f32.mrf.mxu1 }
 0x5fb   :  { %3144 = vxpose.xlu0.b32.end [16/16] (narrow) %v2847_v7, 16 }
 0x5ff   :  { %v5057_v18 = vpop.trf.xlu0 }
 0x600   :  { %v5061_v57 = vunpack.i.h.bf16 %v5057_v18  ;;  %v5058_v9 = vunpack.i.l.bf16 %v5057_v18 }
 0x602   :  { %v794_v43 = vpack.c.bf16 %v5061_v57, %v5056_v48  ;;  %v810_v20 = vpack.c.bf16 %v5058_v9, %v5053_v3  ;;  %v5486_v3 = vld [vmem:[#allocation2 + $0x8] sm:$0xff] }
 0x604   :  { %4628 = vmatmul.msk.bf16.gmra.mxu0 %vm833_vm6, %v794_v43  ;;  %4644 = vmatmul.msk.bf16.gmra.mxu3 %vm833_vm6, %v810_v20 }
 0x607   :  { %v5062_v11 = vpop.trf.xlu0 }
 0x608   :  { %v5066_v59 = vunpack.i.h.bf16 %v5062_v11  ;;  %v5063_v39 = vunpack.i.l.bf16 %v5062_v11 }
 0x60f   :  { %v5067_v29 = vpop.trf.xlu0 }
 0x610   :  { %v5071_v53 = vunpack.i.h.bf16 %v5067_v29  ;;  %v5068_v51 = vunpack.i.l.bf16 %v5067_v29  ;;  %v6636_v29 = vpop.f32.mrf.mxu1 }
 0x612   :  { %v795_v52 = vpack.c.bf16 %v5071_v53, %v5066_v59  ;;  %v811_v56 = vpack.c.bf16 %v5068_v51, %v5063_v39  ;;  %v6634_v39 = vpop.trf.xlu1 }
 0x614   :  { %4629 = vmatmul.msk.bf16.gmra.mxu0 %vm833_vm6, %v795_v52  ;;  %4645 = vmatmul.msk.bf16.gmra.mxu3 %vm833_vm6, %v811_v56 }
 0x617   :  { %v5072_v34 = vpop.trf.xlu0 }
 0x618   :  { %v5076_v54 = vunpack.i.h.bf16 %v5072_v34  ;;  %v5073_v30 = vunpack.i.l.bf16 %v5072_v34 }
 0x61f   :  { %v5077_v28 = vpop.trf.xlu0 }
 0x620   :  { %v5081_v62 = vunpack.i.h.bf16 %v5077_v28  ;;  %v5078_v55 = vunpack.i.l.bf16 %v5077_v28 }
 0x622   :  { %v796_v25 = vpack.c.bf16 %v5081_v62, %v5076_v54  ;;  %v812_v15 = vpack.c.bf16 %v5078_v55, %v5073_v30 }
 0x624   :  { %4630 = vmatmul.msk.bf16.gmra.mxu0 %vm833_vm6, %v796_v25  ;;  %4646 = vmatmul.msk.bf16.gmra.mxu3 %vm833_vm6, %v812_v15 }
 0x627   :  { %v3145_v12 = vpop.trf.xlu0 }
 0x628   :  { %v6600_v38 = vadd.f32 %v5485_v49, %v3145_v12 }
 0x62a   :  { %3403 = vadd.xlane.f32.xlu2 %v6600_v38  ;;  %v3451_v46 = vmul.f32 %v6600_v38, %v6600_v38 }
 0x62f   :  { %v3146_v5 = vpop.trf.xlu0 }
 0x630   :  { %v6622_v18 = vadd.f32 %v5486_v3, %v3146_v5  ;;  %v6657_v3 = vpop.trf.xlu1 }
 0x631   :  { %v1195_v61 = vpop.f32.mrf.mxu0 }
 0x632   :  { %v1196_v35 = vadd.f32 %v6501_v41, %v1195_v61  ;;  %3467 = vadd.xlane.f32.xlu2 %v3451_v46  ;;  %v3452_v30 = vmul.f32 %v6622_v18, %v6622_v18 }
 0x634   :  { %v1419_v7 = vmul.f32 %v1196_v35, %v1196_v35  ;;  %4631 = vmatmul.msk.bf16.gmra.mxu0 %vm833_vm6, %v6111_v31  ;;  %4647 = vmatmul.msk.bf16.gmra.mxu3 %vm833_vm6, %v813_v24  ;;  %v819_v24 = vpack.c.bf16 %v6612_v33, %v6605_v14 }
 0x636   :  { %v1547_v48 = vmul.f32 %v1419_v7, %v1196_v35 }
 0x637   :  { %v1275_v57 = vpop.f32.mrf.mxu3 }
 0x638   :  { %v1803_v9 = vmul.f32 0.044715, %v1547_v48  ;;  %v6625_v43 = vadd.f32 %v6501_v41, %v1275_v57 }
 0x639   :  { %v1197_v20 = vpop.f32.mrf.mxu0 }
 0x63a   :  { %v1931_v11 = vadd.f32 %v1803_v9, %v1196_v35  ;;  %v1451_v59 = vmul.f32 %v6625_v43, %v6625_v43  ;;  %v1198_v31 = vadd.f32 %v6501_v41, %v1197_v20  ;;  %3405 = vadd.xlane.f32.xlu2 %v6622_v18  ;;  %v6659_v9 = vpop.f32.mrf.mxu1 }
 0x63c   :  { %v1579_v6 = vmul.f32 %v1451_v59, %v6625_v43  ;;  %v1420_v32 = vmul.f32 %v1198_v31, %v1198_v31  ;;  %v2059_v53 = vmul.f32 0.7978846, %v1931_v11 }
 0x63e   :  { %v1835_v51 = vmul.f32 0.044715, %v1579_v6  ;;  %v1548_v52 = vmul.f32 %v1420_v32, %v1198_v31  ;;  %5277 = vtanh.f32 %v2059_v53 }
 0x63f   :  { %v1277_v56 = vpop.f32.mrf.mxu3 }
 0x640   :  { %v1804_v34 = vmul.f32 0.044715, %v1548_v52  ;;  %v6639_v54 = vadd.f32 %v6501_v41, %v1277_v56  ;;  %v1963_v28 = vadd.f32 %v1835_v51, %v6625_v43  ;;  %v1675_v52 = vmul.f32 0.5, %v1196_v35 }
 0x641   :  { %v1200_v62 = vpop.f32.mrf.mxu0 }
 0x642   :  { %v1932_v55 = vadd.f32 %v1804_v34, %v1198_v31  ;;  %v1452_v25 = vmul.f32 %v6639_v54, %v6639_v54  ;;  %v6647_v15 = vadd.f32 %v6501_v41, %v1200_v62  ;;  %3469 = vadd.xlane.f32.xlu2 %v3452_v30  ;;  %v2091_v61 = vmul.f32 0.7978846, %v1963_v28 }
 0x643   :  { %v1676_v30 = vmul.f32 0.5, %v1198_v31  ;;  %v820_v62 = vpack.c.bf16 %v6657_v3, %v6634_v39  ;;  %v4874_v39 = vld [vmem:[#allocation5 + $0x34] sm:$0xf]  ;;  %v4763_v3 = vld [vmem:[#allocation5 + $0x38] sm:$0xf0] }
 0x644   :  { %v2060_v12 = vmul.f32 0.7978846, %v1932_v55  ;;  %v1580_v49 = vmul.f32 %v1452_v25, %v6639_v54  ;;  %v1421_v46 = vmul.f32 %v6647_v15, %v6647_v15  ;;  %4648 = vmatmul.msk.bf16.gmra.mxu3 %vm833_vm6, %v814_v23  ;;  %v5278_v57 = vpop.eup %5277 }
 0x645   :  { %v2315_v53 = vadd.f32 1.0, %v5278_v57 }
 0x646   :  { %5279 = vtanh.f32 %v2060_v12  ;;  %v1836_v5 = vmul.f32 0.044715, %v1580_v49  ;;  %v1549_v7 = vmul.f32 %v1421_v46, %v6647_v15 }
 0x647   :  { %v1280_v48 = vpop.f32.mrf.mxu3  ;;  %5281 = vtanh.f32 %v2091_v61  ;;  %v2443_v61 = vmul.f32 %v2315_v53, %v1675_v52 }
 0x648   :  { %v1964_v20 = vadd.f32 %v1836_v5, %v6639_v54  ;;  %v1805_v11 = vmul.f32 0.044715, %v1549_v7  ;;  %v6663_v59 = vadd.f32 %v6501_v41, %v1280_v48 }
 0x649   :  { %v1202_v1 = vpop.f32.mrf.mxu0 }
 0x64a   :  { %v1933_v58 = vadd.f32 %v1805_v11, %v6647_v15  ;;  %v1453_v23 = vmul.f32 %v6663_v59, %v6663_v59  ;;  %v6669_v6 = vadd.f32 %v6501_v41, %v1202_v1  ;;  %v2092_v32 = vmul.f32 0.7978846, %v1964_v20  ;;  %v6681_v20 = vpop.trf.xlu1  ;;  %v6683_v11 = vpop.f32.mrf.mxu1 }
 0x64c   :  { %v5280_v51 = vpop.eup %5279  ;;  %v1581_v56 = vmul.f32 %v1453_v23, %v6663_v59  ;;  %v1422_v34 = vmul.f32 %v6669_v6, %v6669_v6  ;;  %5283 = vtanh.f32 %v2092_v32  ;;  %v2061_v55 = vmul.f32 0.7978846, %v1933_v58 }
 0x64d   :  { %v2316_v28 = vadd.f32 1.0, %v5280_v51  ;;  %v5282_v49 = vpop.eup %5281 }
 0x64e   :  { %v1837_v25 = vmul.f32 0.044715, %v1581_v56  ;;  %v1550_v12 = vmul.f32 %v1422_v34, %v6669_v6  ;;  %5285 = vtanh.f32 %v2061_v55  ;;  %v2347_v53 = vadd.f32 1.0, %v5282_v49 }
 0x64f   :  { %v1282_v46 = vpop.f32.mrf.mxu3  ;;  %v2444_v5 = vmul.f32 %v2316_v28, %v1676_v30  ;;  %v1707_v30 = vmul.f32 0.5, %v6625_v43  ;;  %v1708_v28 = vmul.f32 0.5, %v6639_v54 }
 0x650   :  { %v1806_v35 = vmul.f32 0.044715, %v1550_v12  ;;  %v6678_v7 = vadd.f32 %v6501_v41, %v1282_v46  ;;  %v1965_v48 = vadd.f32 %v1837_v25, %v6663_v59 }
 0x651   :  { %v1205_v31 = vpop.f32.mrf.mxu0  ;;  %v2539_v57 = vpack.c.bf16 %v2444_v5, %v2443_v61  ;;  %v2475_v46 = vmul.f32 %v2347_v53, %v1707_v30  ;;  %v1677_v30 = vmul.f32 0.5, %v6647_v15 }
 0x652   :  { %v1934_v1 = vadd.f32 %v1806_v35, %v6669_v6  ;;  %v1454_v58 = vmul.f32 %v6678_v7, %v6678_v7  ;;  %v6689_v23 = vadd.f32 %v6501_v41, %v1205_v31  ;;  %v5284_v32 = vpop.eup %5283  ;;  %v2093_v34 = vmul.f32 0.7978846, %v1965_v48  ;;  %v3178_v43 = vpop.trf.xlu1 }
 0x653   :  { %4703 = vmatmul.msk.bf16.gmra.mxu1 %vm2607_vm10, %v2539_v57  ;;  %v2348_v55 = vadd.f32 1.0, %v5284_v32  ;;  %v5487_v32 = vld [vmem:[#allocation2 + $0x18] sm:$0xff] }
 0x654   :  { %v2062_v51 = vmul.f32 0.7978846, %v1934_v1  ;;  %v1582_v52 = vmul.f32 %v1454_v58, %v6678_v7  ;;  %v1423_v56 = vmul.f32 %v6689_v23, %v6689_v23  ;;  %4649 = vmatmul.msk.bf16.gmra.mxu3 %vm833_vm6, %v815_v8  ;;  %v5286_v5 = vpop.eup %5285  ;;  %v6713_v53 = vadd.f32 %v5487_v32, %v3178_v43 }
 0x655   :  { %v2476_v61 = vmul.f32 %v2348_v55, %v1708_v28  ;;  %v2317_v58 = vadd.f32 1.0, %v5286_v5  ;;  %v1678_v28 = vmul.f32 0.5, %v6669_v6 }
 0x656   :  { %5287 = vtanh.f32 %v2062_v51  ;;  %v1838_v25 = vmul.f32 0.044715, %v1582_v52  ;;  %v1551_v12 = vmul.f32 %v1423_v56, %v6689_v23  ;;  %v6715_v52 = vpop.f32.mrf.mxu1  ;;  %3409 = vadd.xlane.f32.xlu1 %v6713_v53  ;;  %v3454_v22 = vmul.f32 %v6713_v53, %v6713_v53 }
 0x657   :  { %v1285_v49 = vpop.f32.mrf.mxu3  ;;  %5289 = vtanh.f32 %v2093_v34  ;;  %v2555_v8 = vpack.c.bf16 %v2476_v61, %v2475_v46  ;;  %v2445_v5 = vmul.f32 %v2317_v58, %v1677_v30  ;;  %v1709_v30 = vmul.f32 0.5, %v6663_v59  ;;  %v5488_v59 = vld [vmem:[#allocation2 + $0x10] sm:$0xff] }
 0x658   :  { %v1966_v35 = vadd.f32 %v1838_v25, %v6678_v7  ;;  %v1807_v31 = vmul.f32 0.044715, %v1551_v12  ;;  %v6704_v42 = vadd.f32 %v6501_v41, %v1285_v49 }
 0x659   :  { %v1207_v19 = vpop.f32.mrf.mxu0  ;;  %4719 = vmatmul.msk.bf16.gmra.mxu2 %vm2607_vm10, %v2555_v8 }
 0x65a   :  { %v1935_v54 = vadd.f32 %v1807_v31, %v6689_v23  ;;  %v1455_v48 = vmul.f32 %v6704_v42, %v6704_v42  ;;  %v6710_v57 = vadd.f32 %v6501_v41, %v1207_v19  ;;  %v2094_v1 = vmul.f32 0.7978846, %v1966_v35 }
 0x65c   :  { %v5288_v51 = vpop.eup %5287  ;;  %v1583_v56 = vmul.f32 %v1455_v48, %v6704_v42  ;;  %v1424_v34 = vmul.f32 %v6710_v57, %v6710_v57  ;;  %5291 = vtanh.f32 %v2094_v1  ;;  %v2063_v25 = vmul.f32 0.7978846, %v1935_v54 }
 0x65d   :  { %v2318_v55 = vadd.f32 1.0, %v5288_v51  ;;  %v5290_v46 = vpop.eup %5289 }
 0x65e   :  { %v1839_v12 = vmul.f32 0.044715, %v1583_v56  ;;  %v1552_v49 = vmul.f32 %v1424_v34, %v6710_v57  ;;  %5293 = vtanh.f32 %v2063_v25  ;;  %v2349_v58 = vadd.f32 1.0, %v5290_v46  ;;  %v6744_v25 = vpop.f32.mrf.mxu1 }
 0x65f   :  { %v1287_v61 = vpop.f32.mrf.mxu3  ;;  %v2446_v35 = vmul.f32 %v2318_v55, %v1678_v28  ;;  %v1710_v28 = vmul.f32 0.5, %v6678_v7  ;;  %v6752_v7 = vadd.f32 %v5488_v59, %v6681_v20 }
 0x660   :  { %v1808_v31 = vmul.f32 0.044715, %v1552_v49  ;;  %v6725_v19 = vadd.f32 %v6501_v41, %v1287_v61  ;;  %v1967_v15 = vadd.f32 %v1839_v12, %v6704_v42  ;;  %v2477_v61 = vmul.f32 %v2349_v58, %v1709_v30 }
 0x661   :  { %v1210_v8 = vpop.f32.mrf.mxu0  ;;  %v2540_v6 = vpack.c.bf16 %v2446_v35, %v2445_v5 }
 0x662   :  { %v1936_v43 = vadd.f32 %v1808_v31, %v6710_v57  ;;  %v1456_v54 = vmul.f32 %v6725_v19, %v6725_v19  ;;  %v6732_v48 = vadd.f32 %v6501_v41, %v1210_v8  ;;  %v5292_v1 = vpop.eup %5291  ;;  %v2095_v34 = vmul.f32 0.7978846, %v1967_v15 }
 0x663   :  { %4704 = vmatmul.msk.bf16.gmra.mxu1 %vm2607_vm10, %v2540_v6  ;;  %v2350_v55 = vadd.f32 1.0, %v5292_v1  ;;  %v2890_v31 = vadd.f32 %v6516_v37, %v6404_v21 }
 0x664   :  { %v2064_v32 = vmul.f32 0.7978846, %v1936_v43  ;;  %v1584_v51 = vmul.f32 %v1456_v54, %v6725_v19  ;;  %v1425_v56 = vmul.f32 %v6732_v48, %v6732_v48  ;;  %4650 = vmatmul.msk.bf16.gmra.mxu3 %vm833_vm6, %v816_v16  ;;  %v5294_v35 = vpop.eup %5293 }
 0x665   :  { %v2478_v5 = vmul.f32 %v2350_v55, %v1710_v28  ;;  %v2319_v58 = vadd.f32 1.0, %v5294_v35 }
 0x666   :  { %5295 = vtanh.f32 %v2064_v32  ;;  %v1840_v12 = vmul.f32 0.044715, %v1584_v51  ;;  %v1553_v49 = vmul.f32 %v1425_v56, %v6732_v48  ;;  %v1679_v51 = vmul.f32 0.5, %v6689_v23 }
 0x667   :  { %v1290_v46 = vpop.f32.mrf.mxu3  ;;  %5297 = vtanh.f32 %v2095_v34  ;;  %v2556_v8 = vpack.c.bf16 %v2478_v5, %v2477_v61  ;;  %v1680_v56 = vmul.f32 0.5, %v6710_v57  ;;  %v6770_v5 = vpop.f32.mrf.mxu1  ;;  %v3453_v23 = vmul.f32 %v6752_v7, %v6752_v7 }
 0x668   :  { %v1968_v44 = vadd.f32 %v1840_v12, %v6725_v19  ;;  %v1809_v27 = vmul.f32 0.044715, %v1553_v49  ;;  %v6749_v16 = vadd.f32 %v6501_v41, %v1290_v46  ;;  %v2447_v46 = vmul.f32 %v2319_v58, %v1679_v51 }
 0x669   :  { %v1212_v15 = vpop.f32.mrf.mxu0  ;;  %4720 = vmatmul.msk.bf16.gmra.mxu2 %vm2607_vm10, %v2556_v8  ;;  %v2892_v57 = vadd.f32 %v6516_v37, %v6432_v26  ;;  %v1711_v51 = vmul.f32 0.5, %v6704_v42 }
 0x66a   :  { %v1937_v6 = vadd.f32 %v1809_v27, %v6732_v48  ;;  %v1457_v43 = vmul.f32 %v6749_v16, %v6749_v16  ;;  %v6760_v54 = vadd.f32 %v6501_v41, %v1212_v15  ;;  %v2096_v1 = vmul.f32 0.7978846, %v1968_v44 }
 0x66b   :  { %3193 = vxpose.xlu2.b32.start [1/16] (narrow) %v2890_v31, 16 }
 0x66c   :  { %v5296_v20 = vpop.eup %5295  ;;  %v1585_v32 = vmul.f32 %v1457_v43, %v6749_v16  ;;  %v1426_v21 = vmul.f32 %v6760_v54, %v6760_v54  ;;  %3407 = vadd.xlane.f32.xlu0 %v6752_v7  ;;  %5299 = vtanh.f32 %v2096_v1  ;;  %v2065_v30 = vmul.f32 0.7978846, %v1937_v6  ;;  %v6786_v1 = vpop.f32.mrf.mxu2 }
 0x66d   :  { %v2320_v34 = vadd.f32 1.0, %v5296_v20  ;;  %v5298_v12 = vpop.eup %5297 }
 0x66e   :  { %v1841_v28 = vmul.f32 0.044715, %v1585_v32  ;;  %v1554_v55 = vmul.f32 %v1426_v21, %v6760_v54  ;;  %5301 = vtanh.f32 %v2065_v30  ;;  %v2351_v26 = vadd.f32 1.0, %v5298_v12 }
 0x66f   :  { %v1292_v49 = vpop.f32.mrf.mxu3  ;;  %v2448_v61 = vmul.f32 %v2320_v34, %v1680_v56  ;;  %v1712_v56 = vmul.f32 0.5, %v6725_v19 }
 0x670   :  { %v1810_v35 = vmul.f32 0.044715, %v1554_v55  ;;  %v6773_v44 = vadd.f32 %v6501_v41, %v1292_v49  ;;  %v1969_v27 = vadd.f32 %v1841_v28, %v6749_v16  ;;  %v2479_v12 = vmul.f32 %v2351_v26, %v1711_v51 }
 0x671   :  { %v1215_v59 = vpop.f32.mrf.mxu0  ;;  %v2541_v31 = vpack.c.bf16 %v2448_v61, %v2447_v46 }
 0x672   :  { %v1938_v15 = vadd.f32 %v1810_v35, %v6760_v54  ;;  %v1458_v8 = vmul.f32 %v6773_v44, %v6773_v44  ;;  %v6784_v6 = vadd.f32 %v6501_v41, %v1215_v59  ;;  %v5300_v43 = vpop.eup %5299  ;;  %v2097_v21 = vmul.f32 0.7978846, %v1969_v27 }
 0x673   :  { %3194 = vxpose.xlu2.b32.cont [2/16] (narrow) %v2892_v57, 16  ;;  %4705 = vmatmul.msk.bf16.gmra.mxu1 %vm2607_vm10, %v2541_v31  ;;  %v2352_v34 = vadd.f32 1.0, %v5300_v43 }
 0x674   :  { %v2066_v58 = vmul.f32 0.7978846, %v1938_v15  ;;  %v1586_v20 = vmul.f32 %v1458_v8, %v6773_v44  ;;  %v1427_v32 = vmul.f32 %v6784_v6, %v6784_v6  ;;  %3471 = vadd.xlane.f32.xlu0 %v3453_v23  ;;  %4651 = vmatmul.msk.bf16.gmra.mxu3 %vm833_vm6, %v817_v60  ;;  %v5302_v46 = vpop.eup %5301  ;;  %v2895_v60 = vadd.f32 %v6516_v37, %v6450_v0  ;;  %v6807_v23 = vpop.f32.mrf.mxu1 }
 0x675   :  { %v2480_v49 = vmul.f32 %v2352_v34, %v1712_v56  ;;  %v2321_v15 = vadd.f32 1.0, %v5302_v46  ;;  %v6819_v26 = vpop.f32.mrf.mxu2  ;;  %v2897_v46 = vadd.f32 %v6516_v37, %v6473_v2 }
 0x676   :  { %5303 = vtanh.f32 %v2066_v58  ;;  %v1842_v30 = vmul.f32 0.044715, %v1586_v20  ;;  %v1555_v28 = vmul.f32 %v1427_v32, %v6784_v6  ;;  %v1681_v58 = vmul.f32 0.5, %v6732_v48 }
 0x677   :  { %v1295_v55 = vpop.f32.mrf.mxu3  ;;  %5305 = vtanh.f32 %v2097_v21  ;;  %v2557_v19 = vpack.c.bf16 %v2480_v49, %v2479_v12  ;;  %v1682_v20 = vmul.f32 0.5, %v6760_v54 }
 0x678   :  { %v1970_v61 = vadd.f32 %v1842_v30, %v6773_v44  ;;  %v1811_v35 = vmul.f32 0.044715, %v1555_v28  ;;  %v6801_v13 = vadd.f32 %v6501_v41, %v1295_v55  ;;  %v2449_v28 = vmul.f32 %v2321_v15, %v1681_v58 }
 0x679   :  { %v1217_v42 = vpop.f32.mrf.mxu0  ;;  %4721 = vmatmul.msk.bf16.gmra.mxu2 %vm2607_vm10, %v2557_v19 }
 0x67a   :  { %v1939_v57 = vadd.f32 %v1811_v35, %v6784_v6  ;;  %v1459_v27 = vmul.f32 %v6801_v13, %v6801_v13  ;;  %v6813_v59 = vadd.f32 %v6501_v41, %v1217_v42  ;;  %v2098_v31 = vmul.f32 0.7978846, %v1970_v61 }
 0x67b   :  { %3195 = vxpose.xlu2.b32.cont [3/16] (narrow) %v2895_v60, 16 }
 0x67c   :  { %v5304_v8 = vpop.eup %5303  ;;  %v1587_v0 = vmul.f32 %v1459_v27, %v6801_v13  ;;  %v1428_v43 = vmul.f32 %v6813_v59, %v6813_v59  ;;  %3473 = vadd.xlane.f32.xlu0 %v3454_v22  ;;  %5307 = vtanh.f32 %v2098_v31  ;;  %v2067_v21 = vmul.f32 0.7978846, %v1939_v57  ;;  %v6837_v57 = vpop.f32.mrf.mxu1 }
 0x67d   :  { %v2322_v32 = vadd.f32 1.0, %v5304_v8  ;;  %v5306_v34 = vpop.eup %5305  ;;  %v1713_v8 = vmul.f32 0.5, %v6749_v16  ;;  %v2900_v16 = vadd.f32 %v6516_v37, %v6487_v63 }
 0x67e   :  { %v1843_v51 = vmul.f32 0.044715, %v1587_v0  ;;  %v1556_v56 = vmul.f32 %v1428_v43, %v6813_v59  ;;  %5309 = vtanh.f32 %v2067_v21  ;;  %v2353_v19 = vadd.f32 1.0, %v5306_v34 }
 0x67f   :  { %v1297_v30 = vpop.f32.mrf.mxu3  ;;  %v2450_v55 = vmul.f32 %v2322_v32, %v1682_v20  ;;  %v1714_v0 = vmul.f32 0.5, %v6773_v44  ;;  %v6849_v32 = vpop.f32.mrf.mxu2 }
 0x680   :  { %v1812_v12 = vmul.f32 0.044715, %v1556_v56  ;;  %v6825_v49 = vadd.f32 %v6501_v41, %v1297_v30  ;;  %v1971_v48 = vadd.f32 %v1843_v51, %v6801_v13  ;;  %v2481_v51 = vmul.f32 %v2353_v19, %v1713_v8 }
 0x681   :  { %v1220_v54 = vpop.f32.mrf.mxu0  ;;  %v2542_v61 = vpack.c.bf16 %v2450_v55, %v2449_v28 }
 0x682   :  { %v1940_v35 = vadd.f32 %v1812_v12, %v6813_v59  ;;  %v1460_v22 = vmul.f32 %v6825_v49, %v6825_v49  ;;  %v6834_v60 = vadd.f32 %v6501_v41, %v1220_v54  ;;  %v5308_v42 = vpop.eup %5307  ;;  %v2099_v15 = vmul.f32 0.7978846, %v1971_v48 }
 0x683   :  { %3196 = vxpose.xlu2.b32.cont [4/16] (narrow) %v2897_v46, 16  ;;  %4706 = vmatmul.msk.bf16.gmra.mxu1 %vm2607_vm10, %v2542_v61  ;;  %v2354_v43 = vadd.f32 1.0, %v5308_v42 }
 0x684   :  { %v2068_v2 = vmul.f32 0.7978846, %v1940_v35  ;;  %v1588_v27 = vmul.f32 %v1460_v22, %v6825_v49  ;;  %v1429_v31 = vmul.f32 %v6834_v60, %v6834_v60  ;;  %4652 = vmatmul.msk.bf16.gmra.mxu3 %vm833_vm6, %v818_v10  ;;  %v5310_v34 = vpop.eup %5309  ;;  %v1683_v35 = vmul.f32 0.5, %v6784_v6  ;;  %v6869_v19 = vpop.f32.mrf.mxu1  ;;  %v6876_v6 = vld [vmem:[%s7812_s6] ss:$0 sm:$0xff] }
 0x685   :  { %v2482_v56 = vmul.f32 %v2354_v43, %v1714_v0  ;;  %v2323_v46 = vadd.f32 1.0, %v5310_v34  ;;  %v1684_v22 = vmul.f32 0.5, %v6813_v59 }
 0x686   :  { %5311 = vtanh.f32 %v2068_v2  ;;  %v1844_v58 = vmul.f32 0.044715, %v1588_v27  ;;  %v1557_v20 = vmul.f32 %v1429_v31, %v6834_v60 }
 0x687   :  { %v1300_v21 = vpop.f32.mrf.mxu3  ;;  %5313 = vtanh.f32 %v2099_v15  ;;  %v2558_v30 = vpack.c.bf16 %v2482_v56, %v2481_v51  ;;  %v2451_v8 = vmul.f32 %v2323_v46, %v1683_v35  ;;  %v4882_v35 = vld [vmem:[#allocation5 + $0x74] sm:$0xf] }
 0x688   :  { %v1972_v50 = vadd.f32 %v1844_v58, %v6825_v49  ;;  %v1813_v47 = vmul.f32 0.044715, %v1557_v20  ;;  %v6853_v10 = vadd.f32 %v6501_v41, %v1300_v21  ;;  %v2902_v20 = vadd.f32 %v6516_v37, %v6495_v17  ;;  %v6883_v21 = vpop.f32.mrf.mxu2 }
 0x689   :  { %v1222_v44 = vpop.f32.mrf.mxu0  ;;  %4722 = vmatmul.msk.bf16.gmra.mxu2 %vm2607_vm10, %v2558_v30  ;;  %v1715_v17 = vmul.f32 0.5, %v6801_v13  ;;  %v4795_v13 = vld [vmem:[#allocation5 + $0x78] sm:$0xf0] }
 0x68a   :  { %v1941_v28 = vadd.f32 %v1813_v47, %v6834_v60  ;;  %v1461_v55 = vmul.f32 %v6853_v10, %v6853_v10  ;;  %v6861_v12 = vadd.f32 %v6501_v41, %v1222_v44  ;;  %v2100_v48 = vmul.f32 0.7978846, %v1972_v50 }
 0x68b   :  { %3197 = vxpose.xlu2.b32.cont [5/16] (narrow) %v2900_v16, 16 }
 0x68c   :  { %v5312_v54 = vpop.eup %5311  ;;  %v1589_v61 = vmul.f32 %v1461_v55, %v6853_v10  ;;  %v1430_v63 = vmul.f32 %v6861_v12, %v6861_v12  ;;  %5315 = vtanh.f32 %v2100_v48  ;;  %v2069_v41 = vmul.f32 0.7978846, %v1941_v28  ;;  %v6902_v33 = vpop.f32.mrf.mxu1 }
 0x68d   :  { %v2324_v42 = vadd.f32 1.0, %v5312_v54  ;;  %v5314_v31 = vpop.eup %5313  ;;  %v1716_v55 = vmul.f32 0.5, %v6825_v49 }
 0x68e   :  { %v1845_v2 = vmul.f32 0.044715, %v1589_v61  ;;  %v1558_v27 = vmul.f32 %v1430_v63, %v6861_v12  ;;  %5317 = vtanh.f32 %v2069_v41  ;;  %v2355_v47 = vadd.f32 1.0, %v5314_v31 }
 0x68f   :  { %v1302_v15 = vpop.f32.mrf.mxu3  ;;  %v2452_v0 = vmul.f32 %v2324_v42, %v1684_v22  ;;  %v4798_v41 = vor.u32 %v4882_v35, %v4795_v13 }
 0x690   :  { %v1973_v43 = vadd.f32 %v1845_v2, %v6853_v10  ;;  %v1814_v58 = vmul.f32 0.044715, %v1558_v27  ;;  %v6879_v59 = vadd.f32 %v6876_v6, %v1302_v15  ;;  %v2483_v61 = vmul.f32 %v2355_v47, %v1715_v17  ;;  %v6911_v27 = vld [vmem:[%s7814_s8] ss:$0 sm:$0xff] }
 0x691   :  { %v1225_v51 = vpop.f32.mrf.mxu0  ;;  %v2543_v56 = vpack.c.bf16 %v2452_v0, %v2451_v8  ;;  %v2905_v31 = vadd.f32 %v6911_v27, %v6506_v4  ;;  %3952 = vmatpush.bf16.msrb.mxu3 %v4798_v41  ;;  %v4787_v4 = vld [vmem:[#allocation5 + $0x68] sm:$0xf0]  ;;  %v1685_v17 = vmul.f32 0.5, %v6834_v60  ;;  %v2907_v41 = vadd.f32 %v6911_v27, %v6509_v36 }
 0x692   :  { %v1942_v34 = vadd.f32 %v1814_v58, %v6861_v12  ;;  %v1462_v50 = vmul.f32 %v6879_v59, %v6879_v59  ;;  %v5316_v16 = vpop.eup %5315  ;;  %v2101_v44 = vmul.f32 0.7978846, %v1973_v43  ;;  %v6889_v30 = vadd.f32 %v6876_v6, %v1225_v51  ;;  %v6920_v51 = vpop.f32.mrf.mxu2 }
 0x693   :  { %3198 = vxpose.xlu2.b32.cont [6/16] (narrow) %v2902_v20, 16  ;;  %4707 = vmatmul.msk.bf16.gmra.mxu1 %vm2607_vm10, %v2543_v56  ;;  %v2356_v46 = vadd.f32 1.0, %v5316_v16  ;;  %v4880_v20 = vld [vmem:[#allocation5 + $0x64] sm:$0xf]  ;;  %v1717_v60 = vmul.f32 0.5, %v6853_v10 }
 0x694   :  { %v2070_v37 = vmul.f32 0.7978846, %v1942_v34  ;;  %v1590_v28 = vmul.f32 %v1462_v50, %v6879_v59  ;;  %4653 = vmatmul.msk.bf16.gmra.mxu3 %vm833_vm6, %v819_v24  ;;  %v1431_v48 = vmul.f32 %v6889_v30, %v6889_v30  ;;  %v5318_v14 = vpop.eup %5317  ;;  %v4876_v10 = vld [vmem:[#allocation5 + $0x44] sm:$0xf] }
 0x695   :  { %v2484_v63 = vmul.f32 %v2356_v46, %v1716_v55  ;;  %v2325_v56 = vadd.f32 1.0, %v5318_v14  ;;  %v4790_v46 = vor.u32 %v4880_v20, %v4787_v4  ;;  %v1718_v4 = vmul.f32 0.5, %v6879_v59 }
 0x696   :  { %5319 = vtanh.f32 %v2070_v37  ;;  %v1846_v54 = vmul.f32 0.044715, %v1590_v28  ;;  %v1559_v22 = vmul.f32 %v1431_v48, %v6889_v30  ;;  %v1686_v37 = vmul.f32 0.5, %v6861_v12 }
 0x697   :  { %5321 = vtanh.f32 %v2101_v44  ;;  %v1305_v42 = vpop.f32.mrf.mxu3  ;;  %v2559_v2 = vpack.c.bf16 %v2484_v63, %v2483_v61  ;;  %v4878_v63 = vld [vmem:[#allocation5 + $0x54] sm:$0xf]  ;;  %v2453_v13 = vmul.f32 %v2325_v56, %v1685_v17  ;;  %3953 = vmatpush.bf16.msrb.mxu3 %v4790_v46 }
 0x698   :  { %v1974_v24 = vadd.f32 %v1846_v54, %v6879_v59  ;;  %v6906_v49 = vadd.f32 %v6876_v6, %v1305_v42  ;;  %v1815_v15 = vmul.f32 0.044715, %v1559_v22  ;;  %v4779_v42 = vld [vmem:[#allocation5 + $0x58] sm:$0xf0] }
 0x699   :  { %v1227_v8 = vpop.f32.mrf.mxu0  ;;  %4723 = vmatmul.msk.bf16.gmra.mxu2 %vm2607_vm10, %v2559_v2 }
 0x69a   :  { %v2102_v0 = vmul.f32 0.7978846, %v1974_v24  ;;  %v1463_v43 = vmul.f32 %v6906_v49, %v6906_v49  ;;  %v6918_v58 = vadd.f32 %v6876_v6, %v1227_v8  ;;  %v1943_v34 = vadd.f32 %v1815_v15, %v6889_v30 }
 0x69b   :  { %3199 = vxpose.xlu2.b32.cont [7/16] (narrow) %v2905_v31, 16  ;;  %v4782_v8 = vor.u32 %v4878_v63, %v4779_v42 }
 0x69c   :  { %v5320_v50 = vpop.eup %5319  ;;  %5323 = vtanh.f32 %v2102_v0  ;;  %v1591_v47 = vmul.f32 %v1463_v43, %v6906_v49  ;;  %v1432_v16 = vmul.f32 %v6918_v58, %v6918_v58  ;;  %v2071_v48 = vmul.f32 0.7978846, %v1943_v34  ;;  %v6937_v43 = vpop.f32.mrf.mxu1  ;;  %v4771_v34 = vld [vmem:[#allocation5 + $0x48] sm:$0xf0] }
 0x69d   :  { %v5322_v44 = vpop.eup %5321  ;;  %v2326_v28 = vadd.f32 1.0, %v5320_v50  ;;  %v3404_v55 = vpop.xlane.xlu2 %3403  ;;  %3954 = vmatpush.bf16.msrb.mxu3 %v4782_v8 }
 0x69e   :  { %v1847_v54 = vmul.f32 0.044715, %v1591_v47  ;;  %v1560_v61 = vmul.f32 %v1432_v16, %v6918_v58  ;;  %v2357_v14 = vadd.f32 1.0, %v5322_v44  ;;  %5325 = vtanh.f32 %v2071_v48 }
 0x69f   :  { %v1307_v35 = vpop.f32.mrf.mxu3  ;;  %v2454_v22 = vmul.f32 %v2326_v28, %v1686_v37  ;;  %v6940_v56 = vmul.f32 0.0078125, %v3404_v55  ;;  %v6955_v37 = vpop.f32.mrf.mxu2  ;;  %v4774_v48 = vor.u32 %v4876_v10, %v4771_v34 }
 0x6a0   :  { %v1816_v12 = vmul.f32 0.044715, %v1560_v61  ;;  %v1975_v24 = vadd.f32 %v1847_v54, %v6906_v49  ;;  %v6935_v2 = vadd.f32 %v6876_v6, %v1307_v35  ;;  %v2485_v17 = vmul.f32 %v2357_v14, %v1717_v60 }
 0x6a1   :  { %v1230_v31 = vpop.f32.mrf.mxu0  ;;  %v2544_v15 = vpack.c.bf16 %v2454_v22, %v2453_v13  ;;  %v3515_v54 = vmul.f32 %v6940_v56, %v6940_v56  ;;  %v2910_v14 = vadd.f32 %v6911_v27, %v6602_v45  ;;  %3955 = vmatpush.bf16.msrb.mxu3 %v4774_v48 }
 0x6a2   :  { %v5324_v0 = vpop.eup %5323  ;;  %v1944_v20 = vadd.f32 %v1816_v12, %v6918_v58  ;;  %v6943_v36 = vadd.f32 %v6876_v6, %v1230_v31  ;;  %v1464_v50 = vmul.f32 %v6935_v2, %v6935_v2  ;;  %v2103_v59 = vmul.f32 0.7978846, %v1975_v24 }
 0x6a3   :  { %3200 = vxpose.xlu2.b32.cont [8/16] (narrow) %v2907_v41, 16  ;;  %4708 = vmatmul.msk.bf16.gmra.mxu1 %vm2607_vm10, %v2544_v15  ;;  %v2358_v47 = vadd.f32 1.0, %v5324_v0  ;;  %v4766_v31 = vor.u32 %v4874_v39, %v4763_v3 }
 0x6a4   :  { %v2072_v16 = vmul.f32 0.7978846, %v1944_v20  ;;  %v1433_v44 = vmul.f32 %v6943_v36, %v6943_v36  ;;  %4654 = vmatmul.msk.bf16.gmra.mxu3 %vm833_vm6, %v820_v62  ;;  %v1592_v28 = vmul.f32 %v1464_v50, %v6935_v2  ;;  %v5326_v22 = vpop.eup %5325  ;;  %v1687_v50 = vmul.f32 0.5, %v6889_v30 }
 0x6a5   :  { %v3468_v55 = vpop.xlane.xlu2 %3467  ;;  %v2486_v46 = vmul.f32 %v2358_v47, %v1718_v4  ;;  %v2327_v20 = vadd.f32 1.0, %v5326_v22  ;;  %v6976_v4 = vpop.f32.mrf.mxu1  ;;  %3956 = vmatpush.bf16.msrb.mxu3 %v4766_v31 }
 0x6a6   :  { %5327 = vtanh.f32 %v2072_v16  ;;  %v1561_v61 = vmul.f32 %v1433_v44, %v6943_v36  ;;  %v3499_v63 = vmul.f32 0.0078125, %v3468_v55  ;;  %v1848_v62 = vmul.f32 0.044715, %v1592_v28  ;;  %v4872_v16 = vld [vmem:[#allocation5 + $0x24] sm:$0xf] }
 0x6a7   :  { %v1310_v35 = vpop.f32.mrf.mxu3  ;;  %v2560_v13 = vpack.c.bf16 %v2486_v46, %v2485_v17  ;;  %5329 = vtanh.f32 %v2103_v59  ;;  %v4755_v44 = vld [vmem:[#allocation5 + $0x28] sm:$0xf0]  ;;  %v1688_v17 = vmul.f32 0.5, %v6918_v58  ;;  %v2455_v39 = vmul.f32 %v2327_v20, %v1687_v50 }
 0x6a8   :  { %v1817_v42 = vmul.f32 0.044715, %v1561_v61  ;;  %v3531_v41 = vsub.f32 %v3499_v63, %v3515_v54  ;;  %v6962_v60 = vadd.f32 %v6876_v6, %v1310_v35  ;;  %v1976_v12 = vadd.f32 %v1848_v62, %v6935_v2  ;;  %v4870_v54 = vld [vmem:[#allocation5 + $0x14] sm:$0xf]  ;;  %v6984_v61 = vpop.f32.mrf.mxu2  ;;  %v4747_v35 = vld [vmem:[#allocation5 + $0x18] sm:$0xf0] }
 0x6a9   :  { %v1232_v24 = vpop.f32.mrf.mxu0  ;;  %4724 = vmatmul.msk.bf16.gmra.mxu2 %vm2607_vm10, %v2560_v13  ;;  %v4758_v62 = vor.u32 %v4872_v16, %v4755_v44  ;;  %v2912_v13 = vadd.f32 %v6911_v27, %v6614_v40  ;;  %v4750_v31 = vor.u32 %v4870_v54, %v4747_v35  ;;  %v4868_v16 = vld [vmem:[#allocation5 + $0x4] sm:$0xf]  ;;  %v4739_v44 = vld [vmem:[#allocation5 + $0x8] sm:$0xf0] }
 0x6aa   :  { %v1945_v15 = vadd.f32 %v1817_v42, %v6943_v36  ;;  %v6968_v8 = vadd.f32 1e-05, %v3531_v41  ;;  %v1465_v0 = vmul.f32 %v6962_v60, %v6962_v60  ;;  %v2104_v10 = vmul.f32 0.7978846, %v1976_v12 }
 0x6ab   :  { %v6973_v34 = vadd.f32 %v6876_v6, %v1232_v24  ;;  %3201 = vxpose.xlu2.b32.cont [9/16] (narrow) %v2910_v14, 16  ;;  %3957 = vmatpush.bf16.msrb.mxu3 %v4758_v62 }
 0x6ac   :  { %v5328_v45 = vpop.eup %5327  ;;  %5331 = vrsqrt.f32 %v6968_v8  ;;  %v1593_v47 = vmul.f32 %v1465_v0, %v6962_v60  ;;  %v2073_v46 = vmul.f32 0.7978846, %v1945_v15  ;;  %vm3585_vm7 = vweird.f32 %v6968_v8 }
 0x6ad   :  { %v2328_v59 = vadd.f32 1.0, %v5328_v45  ;;  %5333 = vtanh.f32 %v2104_v10  ;;  %v1434_v28 = vmul.f32 %v6973_v34, %v6973_v34  ;;  %v3406_v55 = vpop.xlane.xlu2 %3405  ;;  %v5330_v58 = vpop.eup %5329 }
 0x6ae   :  { %v1849_v48 = vmul.f32 0.044715, %v1593_v47  ;;  %v6993_v14 = vmul.f32 0.0078125, %v3406_v55  ;;  %5335 = vtanh.f32 %v2073_v46  ;;  %v2359_v45 = vadd.f32 1.0, %v5330_v58 }
 0x6af   :  { %v1562_v30 = vmul.f32 %v1434_v28, %v6973_v34  ;;  %v1312_v63 = vpop.f32.mrf.mxu3  ;;  %v2456_v3 = vmul.f32 %v2328_v59, %v1688_v17  ;;  %v1719_v17 = vmul.f32 0.5, %v6906_v49  ;;  %v1720_v59 = vmul.f32 0.5, %v6935_v2  ;;  %3958 = vmatpush.bf16.msrb.mxu3 %v4750_v31 }
 0x6b0   :  { %v1977_v22 = vadd.f32 %v1849_v48, %v6962_v60  ;;  %v6991_v42 = vadd.f32 %v6876_v6, %v1312_v63  ;;  %v3516_v48 = vmul.f32 %v6993_v14, %v6993_v14  ;;  %v7013_v63 = vpop.f32.mrf.mxu1  ;;  %v4742_v2 = vor.u32 %v4868_v16, %v4739_v44 }
 0x6b1   :  { %v1818_v41 = vmul.f32 0.044715, %v1562_v30  ;;  %v1235_v12 = vpop.f32.mrf.mxu0  ;;  %v2545_v24 = vpack.c.bf16 %v2456_v3, %v2455_v39  ;;  %v2487_v58 = vmul.f32 %v2359_v45, %v1719_v17 }
 0x6b2   :  { %v6995_v15 = vpop.eup %5331  ;;  %v2105_v0 = vmul.f32 0.7978846, %v1977_v22  ;;  %v1466_v20 = vmul.f32 %v6991_v42, %v6991_v42  ;;  %v7000_v40 = vadd.f32 %v6876_v6, %v1235_v12 }
 0x6b3   :  { %v5334_v10 = vpop.eup %5333  ;;  %v3580_v50 = vmul.f32 %v6995_v15, %v6968_v8  ;;  %v1946_v47 = vadd.f32 %v1818_v41, %v6973_v34  ;;  %3202 = vxpose.xlu2.b32.cont [10/16] (narrow) %v2912_v13, 16  ;;  %4709 = vmatmul.msk.bf16.gmra.mxu1 %vm2607_vm10, %v2545_v24  ;;  %vm3586_vm6 = vweird.f32 %v6995_v15 }
 0x6b4   :  { %v1594_v28 = vmul.f32 %v1466_v20, %v6991_v42  ;;  %v1435_v55 = vmul.f32 %v7000_v40, %v7000_v40  ;;  %5337 = vtanh.f32 %v2105_v0  ;;  %v2360_v30 = vadd.f32 1.0, %v5334_v10  ;;  %v5336_v22 = vpop.eup %5335  ;;  %v7023_v20 = vpop.f32.mrf.mxu2  ;;  %3959 = vmatpush.bf16.msrb.mxu3 %v4742_v2  ;;  %vm7062_vm8 = vmor %vm3585_vm7, %vm3586_vm6 }
 0x6b5   :  { %v2074_v46 = vmul.f32 0.7978846, %v1946_v47  ;;  %v3470_v54 = vpop.xlane.xlu2 %3469  ;;  %v3581_v62 = vmul.f32 %v6995_v15, %v3580_v50  ;;  %v2915_v0 = vadd.f32 %v6911_v27, %v6636_v29  ;;  %v2329_v17 = vadd.f32 1.0, %v5336_v22 }
 0x6b6   :  { %v1850_v39 = vmul.f32 0.044715, %v1594_v28  ;;  %v1563_v49 = vmul.f32 %v1435_v55, %v7000_v40  ;;  %v3500_v3 = vmul.f32 0.0078125, %v3470_v54  ;;  %v2488_v13 = vmul.f32 %v2360_v30, %v1720_v59 }
 0x6b7   :  { %5339 = vtanh.f32 %v2074_v46  ;;  %v1315_v35 = vpop.f32.mrf.mxu3  ;;  %v3582_v29 = vmul.f32 0.5, %v3581_v62  ;;  %v1690_v30 = vmul.f32 0.5, %v6973_v34 }
 0x6b8   :  { %v1978_v41 = vadd.f32 %v1850_v39, %v6991_v42  ;;  %v1819_v12 = vmul.f32 0.044715, %v1563_v49  ;;  %v3532_v24 = vsub.f32 %v3500_v3, %v3516_v48  ;;  %v7019_v31 = vadd.f32 %v6876_v6, %v1315_v35 }
 0x6b9   :  { %v1237_v10 = vpop.f32.mrf.mxu0  ;;  %v2561_v47 = vpack.c.bf16 %v2488_v13, %v2487_v58  ;;  %v1689_v48 = vmul.f32 0.5, %v6943_v36  ;;  %v7041_v58 = vpop.f32.mrf.mxu1  ;;  %v3583_v13 = vsub.f32 1.5, %v3582_v29  ;;  %v1722_v29 = vmul.f32 0.5, %v6991_v42 }
 0x6ba   :  { %v2106_v50 = vmul.f32 0.7978846, %v1978_v41  ;;  %v7025_v16 = vadd.f32 1e-05, %v3532_v24  ;;  %v1467_v45 = vmul.f32 %v7019_v31, %v7019_v31  ;;  %v5338_v44 = vpop.eup %5337  ;;  %v1947_v59 = vadd.f32 %v1819_v12, %v7000_v40 }
 0x6bb   :  { %v7031_v28 = vadd.f32 %v6876_v6, %v1237_v10  ;;  %4725 = vmatmul.msk.bf16.gmra.mxu2 %vm2607_vm10, %v2561_v47  ;;  %3203 = vxpose.xlu2.b32.cont [11/16] (narrow) %v2915_v0, 16  ;;  %v2457_v62 = vmul.f32 %v2329_v17, %v1689_v48  ;;  %v2917_v12 = vadd.f32 %v6911_v27, %v6659_v9  ;;  %v2361_v34 = vadd.f32 1.0, %v5338_v44 }
 0x6bc   :  { %5341 = vtanh.f32 %v2106_v50  ;;  %v1595_v55 = vmul.f32 %v1467_v45, %v7019_v31  ;;  %v2075_v3 = vmul.f32 0.7978846, %v1947_v59  ;;  %v1721_v10 = vmul.f32 0.5, %v6962_v60  ;;  %v7052_v59 = vpop.f32.mrf.mxu2 }
 0x6bd   :  { %v5340_v46 = vpop.eup %5339  ;;  %5343 = vrsqrt.f32 %v7025_v16  ;;  %v1436_v54 = vmul.f32 %v7031_v28, %v7031_v28  ;;  %v3584_v44 = vmul.f32 %v6995_v15, %v3583_v13  ;;  %vm3595_vm11 = vweird.f32 %v7025_v16 }
 0x6be   :  { %v2330_v39 = vadd.f32 1.0, %v5340_v46  ;;  %v1851_v49 = vmul.f32 0.044715, %v1595_v55  ;;  %5345 = vtanh.f32 %v2075_v3 }
 0x6bf   :  { %v1564_v2 = vmul.f32 %v1436_v54, %v7031_v28  ;;  %v1317_v35 = vpop.f32.mrf.mxu3  ;;  %v2489_v54 = vmul.f32 %v2361_v34, %v1721_v10 }
 0x6c0   :  { %v1979_v22 = vadd.f32 %v1851_v49, %v7019_v31  ;;  %v7045_v36 = vadd.f32 %v6876_v6, %v1317_v35  ;;  %v2458_v41 = vmul.f32 %v2330_v39, %v1690_v30  ;;  %v3588_v35 = vsel %vm7062_vm8, %v6995_v15, %v3584_v44 }
 0x6c1   :  { %v1820_v24 = vmul.f32 0.044715, %v1564_v2  ;;  %v7077_v34 = vpop.f32.mrf.mxu1 }
 0x6c2   :  { %v5342_v0 = vpop.eup %5341  ;;  %v2107_v47 = vmul.f32 0.7978846, %v1979_v22  ;;  %v1468_v50 = vmul.f32 %v7045_v36, %v7045_v36  ;;  %v2546_v45 = vpack.c.bf16 %v2458_v41, %v2457_v62  ;;  %v2920_v41 = vadd.f32 %v6911_v27, %v6683_v11  ;;  %v7086_v11 = vld [vmem:[%s7809_s3] ss:$0 sm:$0xff] }
 0x6c3   :  { %v5344_v17 = vpop.eup %5343  ;;  %v1948_v55 = vadd.f32 %v1820_v24, %v7031_v28  ;;  %3204 = vxpose.xlu2.b32.cont [12/16] (narrow) %v2917_v12, 16  ;;  %v2362_v9 = vadd.f32 1.0, %v5342_v0  ;;  %v3547_v12 = vsub.f32 %v6600_v38, %v6940_v56 }
 0x6c4   :  { %v3590_v60 = vmul.f32 %v5344_v17, %v7025_v16  ;;  %v1596_v46 = vmul.f32 %v1468_v50, %v7045_v36  ;;  %4710 = vmatmul.msk.bf16.gmra.mxu1 %vm2607_vm10, %v2546_v45  ;;  %5347 = vtanh.f32 %v2107_v47  ;;  %v5346_v8 = vpop.eup %5345  ;;  %vm3596_vm9 = vweird.f32 %v5344_v17 }
 0x6c5   :  { %v2076_v48 = vmul.f32 0.7978846, %v1948_v55  ;;  %v2490_v30 = vmul.f32 %v2362_v9, %v1722_v29  ;;  %v3739_v10 = vmul.f32 %v3588_v35, %v3547_v12  ;;  %v2331_v47 = vadd.f32 1.0, %v5346_v8  ;;  %v7089_v55 = vpop.f32.mrf.mxu2  ;;  %vm3597_vm12 = vmor %vm3595_vm11, %vm3596_vm9 }
 0x6c6   :  { %v3591_v42 = vmul.f32 %v5344_v17, %v3590_v60  ;;  %v1852_v39 = vmul.f32 0.044715, %v1596_v46  ;;  %v3548_v16 = vsub.f32 %v6622_v18, %v6993_v14  ;;  %v1691_v9 = vmul.f32 0.5, %v7000_v40  ;;  %v7101_v14 = vld [vmem:[%s7810_s4] ss:$0 sm:$0xff] }
 0x6c7   :  { %5349 = vtanh.f32 %v2076_v48  ;;  %v1320_v3 = vpop.f32.mrf.mxu3  ;;  %v2562_v2 = vpack.c.bf16 %v2490_v30, %v2489_v54  ;;  %v1692_v60 = vmul.f32 0.5, %v7031_v28  ;;  %v1723_v30 = vmul.f32 0.5, %v7019_v31 }
 0x6c8   :  { %v3592_v62 = vmul.f32 0.5, %v3591_v42  ;;  %v1980_v13 = vadd.f32 %v1852_v39, %v7045_v36  ;;  %v7071_v22 = vadd.f32 %v6876_v6, %v1320_v3  ;;  %v3758_v49 = vmul.f32 %v7086_v11, %v3739_v10 }
 0x6c9   :  { %v2459_v3 = vmul.f32 %v2331_v47, %v1691_v9  ;;  %v1724_v31 = vmul.f32 0.5, %v7045_v36  ;;  %v7111_v10 = vpop.f32.mrf.mxu1 }
 0x6ca   :  { %v3593_v24 = vsub.f32 1.5, %v3592_v62  ;;  %v2108_v0 = vmul.f32 0.7978846, %v1980_v13  ;;  %v1469_v15 = vmul.f32 %v7071_v22, %v7071_v22  ;;  %v5348_v56 = vpop.eup %5347  ;;  %v3777_v12 = vadd.f32 %v7101_v14, %v3758_v49 }
 0x6cb   :  { %4726 = vmatmul.msk.bf16.gmra.mxu2 %vm2607_vm10, %v2562_v2  ;;  %3205 = vxpose.xlu2.b32.cont [13/16] (narrow) %v2920_v41, 16  ;;  %v2363_v42 = vadd.f32 1.0, %v5348_v56  ;;  %v2922_v2 = vadd.f32 %v6911_v27, %v6715_v52 }
 0x6cc   :  { %v3594_v50 = vmul.f32 %v5344_v17, %v3593_v24  ;;  %5351 = vtanh.f32 %v2108_v0  ;;  %v1597_v45 = vmul.f32 %v1469_v15, %v7071_v22 }
 0x6cd   :  { %v5350_v29 = vpop.eup %5349  ;;  %v2491_v15 = vmul.f32 %v2363_v42, %v1723_v30  ;;  %v1725_v42 = vmul.f32 0.5, %v7071_v22 }
 0x6ce   :  { %v3598_v44 = vsel %vm3597_vm12, %v5344_v17, %v3594_v50  ;;  %v2332_v46 = vadd.f32 1.0, %v5350_v29  ;;  %v1853_v48 = vmul.f32 0.044715, %v1597_v45  ;;  %v7116_v50 = vpop.f32.mrf.mxu2 }
 0x6cf   :  { %v3740_v54 = vmul.f32 %v3598_v44, %v3548_v16  ;;  %v1322_v39 = vpop.f32.mrf.mxu3  ;;  %v2925_v44 = vadd.f32 %v6911_v27, %v6744_v25  ;;  %v2927_v25 = vadd.f32 %v6911_v27, %v6770_v5 }
 0x6d0   :  { %v1981_v40 = vadd.f32 %v1853_v48, %v7071_v22  ;;  %v1323_v17 = vadd.f32 %v6876_v6, %v1322_v39  ;;  %v2460_v28 = vmul.f32 %v2332_v46, %v1692_v60 }
 0x6d1   :  { %v3759_v35 = vmul.f32 %v7086_v11, %v3740_v54 }
 0x6d2   :  { %v5352_v62 = vpop.eup %5351  ;;  %v2109_v13 = vmul.f32 0.7978846, %v1981_v40  ;;  %v1470_v8 = vmul.f32 %v1323_v17, %v1323_v17  ;;  %v2547_v41 = vpack.c.bf16 %v2460_v28, %v2459_v3 }
 0x6d3   :  { %3206 = vxpose.xlu2.b32.cont [14/16] (narrow) %v2922_v2, 16  ;;  %v3778_v24 = vadd.f32 %v7101_v14, %v3759_v35  ;;  %v2364_v0 = vadd.f32 1.0, %v5352_v62 }
 0x6d4   :  { %v1598_v56 = vmul.f32 %v1470_v8, %v1323_v17  ;;  %4711 = vmatmul.msk.bf16.gmra.mxu1 %vm2607_vm10, %v2547_v41  ;;  %5353 = vtanh.f32 %v2109_v13  ;;  %v7131_v41 = vpop.f32.mrf.mxu1 }
 0x6d5   :  { %v7114_v52 = vpack.c.bf16 %v3778_v24, %v3777_v12  ;;  %v2492_v36 = vmul.f32 %v2364_v0, %v1724_v31  ;;  %v1726_v31 = vmul.f32 0.5, %v1323_v17 }
 0x6d6   :  { %v1854_v47 = vmul.f32 0.044715, %v1598_v56  ;;  %v7127_v2 = vpop.f32.mrf.mxu2  ;;  %v3410_v56 = vpop.xlane.xlu1 %3409 }
 0x6d7   :  { %3960 = vmatmul.bf16.vlgmr.msrb.gmra.mxu3 %v7114_v52  ;;  %v1325_v45 = vpop.f32.mrf.mxu3  ;;  %v2563_v29 = vpack.c.bf16 %v2492_v36, %v2491_v15 }
 0x6d8   :  { %v1982_v16 = vadd.f32 %v1854_v47, %v1323_v17  ;;  %v1326_v9 = vadd.f32 %v6876_v6, %v1325_v45 }
 0x6da   :  { %v2110_v60 = vmul.f32 0.7978846, %v1982_v16  ;;  %v1471_v46 = vmul.f32 %v1326_v9, %v1326_v9  ;;  %v5354_v48 = vpop.eup %5353 }
 0x6db   :  { %4727 = vmatmul.msk.bf16.gmra.mxu2 %vm2607_vm10, %v2563_v29  ;;  %3207 = vxpose.xlu2.b32.cont [15/16] (narrow) %v2925_v44, 16  ;;  %v2365_v39 = vadd.f32 1.0, %v5354_v48  ;;  %v2930_v44 = vadd.f32 %v6911_v27, %v6807_v23 }
 0x6dc   :  { %5355 = vtanh.f32 %v2110_v60  ;;  %v1599_v54 = vmul.f32 %v1471_v46, %v1326_v9 }
 0x6dd   :  { %v2493_v12 = vmul.f32 %v2365_v39, %v1725_v42 }
 0x6de   :  { %v1855_v30 = vmul.f32 0.044715, %v1599_v54  ;;  %v7142_v54 = vmul.f32 0.0078125, %v3410_v56 }
 0x6df   :  { %v3408_v49 = vpop.xlane.xlu0 %3407  ;;  %v1327_v40 = vpop.f32.mrf.mxu3 }
 0x6e0   :  { %v1983_v3 = vadd.f32 %v1855_v30, %v1326_v9  ;;  %v1328_v28 = vadd.f32 %v6876_v6, %v1327_v40  ;;  %v7129_v13 = vmul.f32 0.0078125, %v3408_v49  ;;  %v7144_v30 = vpop.f32.mrf.mxu2  ;;  %v7148_v40 = vpop.f32.mrf.mxu1 }
 0x6e2   :  { %v5356_v35 = vpop.eup %5355  ;;  %v2111_v62 = vmul.f32 0.7978846, %v1983_v3  ;;  %v1472_v8 = vmul.f32 %v1328_v28, %v1328_v28  ;;  %v3517_v15 = vmul.f32 %v7129_v13, %v7129_v13  ;;  %v3518_v3 = vmul.f32 %v7142_v54, %v7142_v54 }
 0x6e3   :  { %3208 = vxpose.xlu2.b32.end [16/16] (narrow) %v2927_v25, 16  ;;  %v2366_v22 = vadd.f32 1.0, %v5356_v35  ;;  %v1727_v25 = vmul.f32 0.5, %v1326_v9 }
 0x6e4   :  { %v1600_v24 = vmul.f32 %v1472_v8, %v1328_v28  ;;  %5357 = vtanh.f32 %v2111_v62 }
 0x6e5   :  { %v2494_v0 = vmul.f32 %v2366_v22, %v1726_v31 }
 0x6e6   :  { %v1856_v5 = vmul.f32 0.044715, %v1600_v24  ;;  %v2932_v24 = vadd.f32 %v6911_v27, %v6837_v57 }
 0x6e7   :  { %v3472_v36 = vpop.xlane.xlu0 %3471  ;;  %v1330_v17 = vpop.f32.mrf.mxu3  ;;  %v2564_v47 = vpack.c.bf16 %v2494_v0, %v2493_v12  ;;  %v1728_v0 = vmul.f32 0.5, %v1328_v28 }
 0x6e8   :  { %v1984_v45 = vadd.f32 %v1856_v5, %v1328_v28  ;;  %v3501_v29 = vmul.f32 0.0078125, %v3472_v36  ;;  %v7136_v16 = vadd.f32 %v6876_v6, %v1330_v17 }
 0x6ea   :  { %v2112_v60 = vmul.f32 0.7978846, %v1984_v45  ;;  %v3533_v46 = vsub.f32 %v3501_v29, %v3517_v15  ;;  %v1473_v48 = vmul.f32 %v7136_v16, %v7136_v16  ;;  %v5358_v42 = vpop.eup %5357 }
 0x6eb   :  { %4728 = vmatmul.msk.bf16.gmra.mxu2 %vm2607_vm10, %v2564_v47  ;;  %3225 = vxpose.xlu2.b32.start [1/16] (narrow) %v2930_v44, 16  ;;  %v2367_v31 = vadd.f32 1.0, %v5358_v42  ;;  %v7156_v44 = vpop.f32.mrf.mxu2  ;;  %v7158_v42 = vpop.f32.mrf.mxu1 }
 0x6ec   :  { %5359 = vtanh.f32 %v2112_v60  ;;  %v3565_v39 = vadd.f32 1e-05, %v3533_v46  ;;  %v1601_v49 = vmul.f32 %v1473_v48, %v7136_v16 }
 0x6ed   :  { %v2495_v47 = vmul.f32 %v2367_v31, %v1727_v25  ;;  %v2935_v25 = vadd.f32 %v6911_v27, %v6869_v19 }
 0x6ee   :  { %5361 = vrsqrt.f32 %v3565_v39  ;;  %v1857_v23 = vmul.f32 0.044715, %v1601_v49  ;;  %vm3605_vm13 = vweird.f32 %v3565_v39 }
 0x6ef   :  { %v3474_v35 = vpop.xlane.xlu0 %3473  ;;  %v1332_v62 = vpop.f32.mrf.mxu3 }
 0x6f0   :  { %v1985_v8 = vadd.f32 %v1857_v23, %v7136_v16  ;;  %v3502_v22 = vmul.f32 0.0078125, %v3474_v35  ;;  %v1333_v12 = vadd.f32 %v6876_v6, %v1332_v62 }
 0x6f2   :  { %v5360_v15 = vpop.eup %5359  ;;  %v2113_v5 = vmul.f32 0.7978846, %v1985_v8  ;;  %v3534_v56 = vsub.f32 %v3502_v22, %v3518_v3  ;;  %v1474_v36 = vmul.f32 %v1333_v12, %v1333_v12 }
 0x6f3   :  { %3226 = vxpose.xlu2.b32.cont [2/16] (narrow) %v2932_v24, 16  ;;  %v2368_v17 = vadd.f32 1.0, %v5360_v15  ;;  %v7169_v15 = vpop.f32.mrf.mxu2 }
 0x6f4   :  { %v5362_v9 = vpop.eup %5361  ;;  %v3566_v45 = vadd.f32 1e-05, %v3534_v56  ;;  %v1602_v29 = vmul.f32 %v1474_v36, %v1333_v12  ;;  %5363 = vtanh.f32 %v2113_v5 }
 0x6f5   :  { %v3600_v60 = vmul.f32 %v5362_v9, %v3565_v39  ;;  %v2496_v46 = vmul.f32 %v2368_v17, %v1728_v0  ;;  %vm3606_vm14 = vweird.f32 %v5362_v9  ;;  %v1729_v17 = vmul.f32 0.5, %v7136_v16 }
 0x6f6   :  { %5365 = vrsqrt.f32 %v3566_v45  ;;  %v1858_v48 = vmul.f32 0.044715, %v1602_v29  ;;  %vm7171_vm15 = vmor %vm3605_vm13, %vm3606_vm14  ;;  %vm3615_vm0 = vweird.f32 %v3566_v45 }
 0x6f7   :  { %v3601_v57 = vmul.f32 %v5362_v9, %v3600_v60  ;;  %v1335_v28 = vpop.f32.mrf.mxu3  ;;  %v2565_v49 = vpack.c.bf16 %v2496_v46, %v2495_v47  ;;  %v2937_v60 = vadd.f32 %v6911_v27, %v6902_v33  ;;  %v1730_v46 = vmul.f32 0.5, %v1333_v12 }
 0x6f8   :  { %v1986_v23 = vadd.f32 %v1858_v48, %v1333_v12  ;;  %v7161_v3 = vadd.f32 %v6876_v6, %v1335_v28  ;;  %v7180_v28 = vpop.f32.mrf.mxu1 }
 0x6f9   :  { %v3602_v31 = vmul.f32 0.5, %v3601_v57 }
 0x6fa   :  { %v2114_v35 = vmul.f32 0.7978846, %v1986_v23  ;;  %v1475_v62 = vmul.f32 %v7161_v3, %v7161_v3  ;;  %v5364_v8 = vpop.eup %5363 }
 0x6fb   :  { %v3603_v22 = vsub.f32 1.5, %v3602_v31  ;;  %4729 = vmatmul.msk.bf16.gmra.mxu2 %vm2607_vm10, %v2565_v49  ;;  %3227 = vxpose.xlu2.b32.cont [3/16] (narrow) %v2935_v25, 16  ;;  %v2369_v39 = vadd.f32 1.0, %v5364_v8  ;;  %v3549_v25 = vsub.f32 %v6752_v7, %v7129_v13  ;;  %v3550_v13 = vsub.f32 %v6713_v53, %v7142_v54  ;;  %v5492_v8 = vld [vmem:[#allocation2 + $0x28] sm:$0xff] }
 0x6fc   :  { %v5366_v24 = vpop.eup %5365  ;;  %5367 = vtanh.f32 %v2114_v35  ;;  %v1603_v0 = vmul.f32 %v1475_v62, %v7161_v3  ;;  %v2940_v54 = vadd.f32 %v6911_v27, %v6937_v43 }
 0x6fd   :  { %v3604_v5 = vmul.f32 %v5362_v9, %v3603_v22  ;;  %v3610_v19 = vmul.f32 %v5366_v24, %v3566_v45  ;;  %vm3616_vm1 = vweird.f32 %v5366_v24  ;;  %v2497_v62 = vmul.f32 %v2369_v39, %v1729_v17  ;;  %v5491_v45 = vld [vmem:[#allocation2 + $0x20] sm:$0xff] }
 0x6fe   :  { %v1859_v36 = vmul.f32 0.044715, %v1603_v0  ;;  %vm7186_vm2 = vmor %vm3615_vm0, %vm3616_vm1 }
 0x6ff   :  { %v3611_v47 = vmul.f32 %v5366_v24, %v3610_v19  ;;  %v1337_v29 = vpop.f32.mrf.mxu3  ;;  %v3608_v49 = vsel %vm7171_vm15, %v5362_v9, %v3604_v5 }
 0x700   :  { %v1987_v48 = vadd.f32 %v1859_v36, %v7161_v3  ;;  %v1338_v57 = vadd.f32 %v6876_v6, %v1337_v29  ;;  %v3741_v9 = vmul.f32 %v3608_v49, %v3549_v25  ;;  %v7208_v25 = vpop.f32.mrf.mxu1 }
 0x701   :  { %v3612_v23 = vmul.f32 0.5, %v3611_v47  ;;  %v7194_v47 = vpop.f32.mrf.mxu2 }
 0x702   :  { %v5368_v16 = vpop.eup %5367  ;;  %v2115_v31 = vmul.f32 0.7978846, %v1987_v48  ;;  %v1476_v35 = vmul.f32 %v1338_v57, %v1338_v57 }
 0x703   :  { %v3613_v33 = vsub.f32 1.5, %v3612_v23  ;;  %3228 = vxpose.xlu2.b32.cont [4/16] (narrow) %v2937_v60, 16  ;;  %v2370_v12 = vadd.f32 1.0, %v5368_v16 }
 0x704   :  { %v1604_v22 = vmul.f32 %v1476_v35, %v1338_v57  ;;  %v3209_v0 = vpop.trf.xlu2  ;;  %5369 = vtanh.f32 %v2115_v31 }
 0x705   :  { %v3614_v5 = vmul.f32 %v5366_v24, %v3613_v33  ;;  %v7190_v19 = vadd.f32 %v5491_v45, %v3209_v0  ;;  %v2498_v56 = vmul.f32 %v2370_v12, %v1730_v46  ;;  %v3760_v46 = vmul.f32 %v7086_v11, %v3741_v9 }
 0x706   :  { %v1860_v36 = vmul.f32 0.044715, %v1604_v22 }
 0x707   :  { %v3618_v17 = vsel %vm7186_vm2, %v5366_v24, %v3614_v5  ;;  %3411 = vadd.xlane.f32.xlu0 %v7190_v19  ;;  %v1340_v39 = vpop.f32.mrf.mxu3  ;;  %v2566_v29 = vpack.c.bf16 %v2498_v56, %v2497_v62  ;;  %v3779_v33 = vadd.f32 %v7101_v14, %v3760_v46  ;;  %v3455_v62 = vmul.f32 %v7190_v19, %v7190_v19 }
 0x708   :  { %v1988_v60 = vadd.f32 %v1860_v36, %v1338_v57  ;;  %v7200_v48 = vadd.f32 %v6876_v6, %v1340_v39  ;;  %v3742_v49 = vmul.f32 %v3618_v17, %v3550_v13  ;;  %v1731_v5 = vmul.f32 0.5, %v7161_v3 }
 0x709   :  { %v2942_v39 = vadd.f32 %v6911_v27, %v6976_v4 }
 0x70a   :  { %v2116_v23 = vmul.f32 0.7978846, %v1988_v60  ;;  %v1477_v16 = vmul.f32 %v7200_v48, %v7200_v48  ;;  %v3761_v24 = vmul.f32 %v7086_v11, %v3742_v49  ;;  %v5370_v31 = vpop.eup %5369  ;;  %v1732_v60 = vmul.f32 0.5, %v1338_v57  ;;  %v7236_v57 = vld [vmem:[%s7812_s6] ss:$0 sm:$0xff] }
 0x70b   :  { %4730 = vmatmul.msk.bf16.gmra.mxu2 %vm2607_vm10, %v2566_v29  ;;  %3229 = vxpose.xlu2.b32.cont [5/16] (narrow) %v2940_v54, 16  ;;  %v2371_v45 = vadd.f32 1.0, %v5370_v31  ;;  %v7228_v29 = vpop.f32.mrf.mxu2 }
 0x70c   :  { %5371 = vtanh.f32 %v2116_v23  ;;  %v1605_v35 = vmul.f32 %v1477_v16, %v7200_v48  ;;  %v3780_v12 = vadd.f32 %v7101_v14, %v3761_v24  ;;  %v3210_v43 = vpop.trf.xlu2  ;;  %v7230_v24 = vpop.f32.mrf.mxu1 }
 0x70d   :  { %v7216_v22 = vadd.f32 %v5492_v8, %v3210_v43  ;;  %v2499_v23 = vmul.f32 %v2371_v45, %v1731_v5  ;;  %v2945_v43 = vadd.f32 %v6911_v27, %v7013_v63  ;;  %v4883_v8 = vld [vmem:[#allocation5 + $0x74] sm:$0xf0]  ;;  %v4785_v63 = vld [vmem:[#allocation5 + $0x60] sm:$0xf] }
 0x70e   :  { %v1861_v0 = vmul.f32 0.044715, %v1605_v35  ;;  %v7218_v9 = vpack.c.bf16 %v3780_v12, %v3779_v33 }
 0x70f   :  { %3475 = vadd.xlane.f32.xlu0 %v3455_v62  ;;  %v1342_v56 = vpop.f32.mrf.mxu3  ;;  %v3456_v13 = vmul.f32 %v7216_v22, %v7216_v22  ;;  %v4793_v62 = vld [vmem:[#allocation5 + $0x70] sm:$0xf] }
 0x710   :  { %v1989_v36 = vadd.f32 %v1861_v0, %v7200_v48  ;;  %v1343_v17 = vadd.f32 %v6876_v6, %v1342_v56  ;;  %3965 = vmatmul.bf16.gmra.mxu3 %v7218_v9  ;;  %v4794_v45 = vor.u32 %v4883_v8, %v4793_v62 }
 0x711   :  { %3477 = vadd.xlane.f32.xlu1 %v3456_v13 }
 0x712   :  { %v5372_v3 = vpop.eup %5371  ;;  %v2117_v49 = vmul.f32 0.7978846, %v1989_v36  ;;  %v1478_v46 = vmul.f32 %v1343_v17, %v1343_v17  ;;  %3903 = vmatpush.bf16.msrb.mxu2 %v4794_v45 }
 0x713   :  { %3230 = vxpose.xlu2.b32.cont [6/16] (narrow) %v2942_v39, 16  ;;  %v2372_v54 = vadd.f32 1.0, %v5372_v3  ;;  %v7245_v56 = vpop.f32.mrf.mxu2 }
 0x714   :  { %v1606_v16 = vmul.f32 %v1478_v46, %v1343_v17  ;;  %5373 = vtanh.f32 %v2117_v49  ;;  %v7249_v39 = vpop.f32.mrf.mxu1  ;;  %v1733_v46 = vmul.f32 0.5, %v7200_v48 }
 0x715   :  { %v2500_v31 = vmul.f32 %v2372_v54, %v1732_v60  ;;  %v4881_v60 = vld [vmem:[#allocation5 + $0x64] sm:$0xf0] }
 0x716   :  { %v1862_v6 = vmul.f32 0.044715, %v1606_v16  ;;  %v4786_v49 = vor.u32 %v4881_v60, %v4785_v63  ;;  %v4769_v63 = vld [vmem:[#allocation5 + $0x40] sm:$0xf]  ;;  %v4877_v60 = vld [vmem:[#allocation5 + $0x44] sm:$0xf0] }
 0x717   :  { %3413 = vadd.xlane.f32.xlu0 %v7216_v22  ;;  %v1345_v35 = vpop.f32.mrf.mxu3  ;;  %v2567_v4 = vpack.c.bf16 %v2500_v31, %v2499_v23 }
 0x718   :  { %v1990_v33 = vadd.f32 %v1862_v6, %v1343_v17  ;;  %v7239_v12 = vadd.f32 %v7236_v57, %v1345_v35  ;;  %3904 = vmatpush.bf16.msrb.mxu2 %v4786_v49  ;;  %v2947_v6 = vadd.f32 %v6911_v27, %v7041_v58  ;;  %v1734_v35 = vmul.f32 0.5, %v1343_v17 }
 0x719   :  { %v4770_v27 = vor.u32 %v4877_v60, %v4769_v63 }
 0x71a   :  { %v2118_v0 = vmul.f32 0.7978846, %v1990_v33  ;;  %v1479_v5 = vmul.f32 %v7239_v12, %v7239_v12  ;;  %v5374_v13 = vpop.eup %5373  ;;  %v4879_v33 = vld [vmem:[#allocation5 + $0x54] sm:$0xf0] }
 0x71b   :  { %4731 = vmatmul.msk.bf16.gmra.mxu2 %vm2607_vm10, %v2567_v4  ;;  %3231 = vxpose.xlu2.b32.cont [7/16] (narrow) %v2945_v43, 16  ;;  %v2373_v54 = vadd.f32 1.0, %v5374_v13  ;;  %v4777_v4 = vld [vmem:[#allocation5 + $0x50] sm:$0xf]  ;;  %v7256_v13 = vpop.f32.mrf.mxu2 }
 0x71c   :  { %5375 = vtanh.f32 %v2118_v0  ;;  %v1607_v36 = vmul.f32 %v1479_v5, %v7239_v12  ;;  %v4778_v0 = vor.u32 %v4879_v33, %v4777_v4  ;;  %v7258_v58 = vpop.f32.mrf.mxu1 }
 0x71d   :  { %v2501_v48 = vmul.f32 %v2373_v54, %v1733_v46  ;;  %v7264_v46 = vld [vmem:[%s7814_s8] ss:$0 sm:$0xff] }
 0x71e   :  { %v1863_v3 = vmul.f32 0.044715, %v1607_v36  ;;  %3905 = vmatpush.bf16.msrb.mxu2 %v4778_v0  ;;  %v2950_v54 = vadd.f32 %v7264_v46, %v7077_v34  ;;  %v4753_v0 = vld [vmem:[#allocation5 + $0x20] sm:$0xf]  ;;  %v1735_v34 = vmul.f32 0.5, %v7239_v12 }
 0x71f   :  { %v1347_v23 = vpop.f32.mrf.mxu3 }
 0x720   :  { %v1991_v16 = vadd.f32 %v1863_v3, %v7239_v12  ;;  %v1348_v31 = vadd.f32 %v7236_v57, %v1347_v23 }
 0x722   :  { %v5376_v43 = vpop.eup %5375  ;;  %v2119_v62 = vmul.f32 0.7978846, %v1991_v16  ;;  %v1480_v8 = vmul.f32 %v1348_v31, %v1348_v31  ;;  %3906 = vmatpush.bf16.msrb.mxu2 %v4770_v27 }
 0x723   :  { %3232 = vxpose.xlu2.b32.cont [8/16] (narrow) %v2947_v6, 16  ;;  %v2374_v5 = vadd.f32 1.0, %v5376_v43  ;;  %v4761_v6 = vld [vmem:[#allocation5 + $0x30] sm:$0xf] }
 0x724   :  { %v1608_v45 = vmul.f32 %v1480_v8, %v1348_v31  ;;  %5377 = vtanh.f32 %v2119_v62 }
 0x725   :  { %v2502_v36 = vmul.f32 %v2374_v5, %v1734_v35  ;;  %v4875_v35 = vld [vmem:[#allocation5 + $0x34] sm:$0xf0]  ;;  %v4873_v5 = vld [vmem:[#allocation5 + $0x24] sm:$0xf0] }
 0x726   :  { %v1864_v3 = vmul.f32 0.044715, %v1608_v45  ;;  %v4762_v43 = vor.u32 %v4875_v35, %v4761_v6  ;;  %v4754_v45 = vor.u32 %v4873_v5, %v4753_v0  ;;  %v4871_v6 = vld [vmem:[#allocation5 + $0x14] sm:$0xf0]  ;;  %v4737_v5 = vld [vmem:[#allocation5] sm:$0xf] }
 0x727   :  { %v1350_v17 = vpop.f32.mrf.mxu3  ;;  %v2568_v49 = vpack.c.bf16 %v2502_v36, %v2501_v48  ;;  %v7269_v36 = vpop.f32.mrf.mxu2 }
 0x728   :  { %v1992_v23 = vadd.f32 %v1864_v3, %v1348_v31  ;;  %v1351_v16 = vadd.f32 %v7236_v57, %v1350_v17  ;;  %3907 = vmatpush.bf16.msrb.mxu2 %v4762_v43  ;;  %v2952_v17 = vadd.f32 %v7264_v46, %v7111_v10 }
 0x72a   :  { %v2120_v4 = vmul.f32 0.7978846, %v1992_v23  ;;  %v1481_v33 = vmul.f32 %v1351_v16, %v1351_v16  ;;  %v5378_v62 = vpop.eup %5377  ;;  %v1736_v23 = vmul.f32 0.5, %v1348_v31  ;;  %v2955_v31 = vadd.f32 %v7264_v46, %v7131_v41 }
 0x72b   :  { %4732 = vmatmul.msk.bf16.gmra.mxu2 %vm2607_vm10, %v2568_v49  ;;  %3233 = vxpose.xlu2.b32.cont [9/16] (narrow) %v2950_v54, 16  ;;  %v2375_v63 = vadd.f32 1.0, %v5378_v62  ;;  %v2974_v49 = vpop.f32.mrf.mxu1  ;;  %v4745_v54 = vld [vmem:[#allocation5 + $0x10] sm:$0xf] }
 0x72c   :  { %5379 = vtanh.f32 %v2120_v4  ;;  %v1609_v8 = vmul.f32 %v1481_v33, %v1351_v16  ;;  %3908 = vmatpush.bf16.msrb.mxu2 %v4754_v45  ;;  %v4746_v43 = vor.u32 %v4871_v6, %v4745_v54 }
 0x72d   :  { %v2503_v12 = vmul.f32 %v2375_v63, %v1735_v34  ;;  %v2970_v63 = vadd.f32 %v7264_v46, %v7249_v39  ;;  %v2960_v39 = vadd.f32 %v7264_v46, %v7158_v42  ;;  %v2965_v42 = vadd.f32 %v7264_v46, %v7208_v25 }
 0x72e   :  { %v1865_v48 = vmul.f32 0.044715, %v1609_v8 }
 0x72f   :  { %v1352_v60 = vpop.f32.mrf.mxu3 }
 0x730   :  { %v1993_v3 = vadd.f32 %v1865_v48, %v1351_v16  ;;  %v1353_v27 = vadd.f32 %v7236_v57, %v1352_v60  ;;  %3909 = vmatpush.bf16.msrb.mxu2 %v4746_v43  ;;  %v4869_v57 = vld [vmem:[#allocation5 + $0x4] sm:$0xf0] }
 0x731   :  { %v4738_v45 = vor.u32 %v4869_v57, %v4737_v5  ;;  %v2962_v57 = vadd.f32 %v7264_v46, %v7180_v28 }
 0x732   :  { %v5380_v35 = vpop.eup %5379  ;;  %v2121_v4 = vmul.f32 0.7978846, %v1993_v3  ;;  %v1482_v33 = vmul.f32 %v1353_v27, %v1353_v27  ;;  %v7277_v3 = vpop.f32.mrf.mxu2 }
 0x733   :  { %3234 = vxpose.xlu2.b32.cont [10/16] (narrow) %v2952_v17, 16  ;;  %v2376_v8 = vadd.f32 1.0, %v5380_v35  ;;  %v2976_v17 = vpop.f32.mrf.mxu1  ;;  %v2957_v35 = vadd.f32 %v7264_v46, %v7148_v40 }
 0x734   :  { %v1610_v62 = vmul.f32 %v1482_v33, %v1353_v27  ;;  %5381 = vtanh.f32 %v2121_v4  ;;  %3910 = vmatpush.bf16.msrb.mxu2 %v4738_v45  ;;  %v1738_v4 = vmul.f32 0.5, %v1353_v27 }
 0x735   :  { %v2504_v0 = vmul.f32 %v2376_v8, %v1736_v23  ;;  %v1737_v23 = vmul.f32 0.5, %v1351_v16  ;;  %v2975_v16 = vadd.f32 %v7264_v46, %v2974_v49 }
 0x736   :  { %v1866_v48 = vmul.f32 0.044715, %v1610_v62 }
 0x737   :  { %v2569_v10 = vpack.c.bf16 %v2504_v0, %v2503_v12  ;;  %v2972_v0 = vadd.f32 %v7264_v46, %v7258_v58  ;;  %v2977_v58 = vadd.f32 %v7264_v46, %v2976_v17 }
 0x738   :  { %v1994_v60 = vadd.f32 %v1866_v48, %v1353_v27 }
 0x73a   :  { %v2122_v54 = vmul.f32 0.7978846, %v1994_v60  ;;  %v5382_v34 = vpop.eup %5381  ;;  %v7284_v33 = vpop.f32.mrf.mxu2 }
 0x73b   :  { %4733 = vmatmul.msk.bf16.gmra.mxu2 %vm2607_vm10, %v2569_v10  ;;  %3235 = vxpose.xlu2.b32.cont [11/16] (narrow) %v2955_v31, 16  ;;  %v2377_v6 = vadd.f32 1.0, %v5382_v34  ;;  %v2979_v12 = vpop.f32.mrf.mxu1  ;;  %v2967_v10 = vadd.f32 %v7264_v46, %v7230_v24 }
 0x73c   :  { %5383 = vtanh.f32 %v2122_v54  ;;  %v2980_v49 = vadd.f32 %v7264_v46, %v2979_v12 }
 0x73d   :  { %v2505_v8 = vmul.f32 %v2377_v6, %v1737_v23 }
 0x740   :  { %3257 = vxpose.xlu0.b32.start [1/16] (narrow) %v2970_v63, 16 }
 0x742   :  { %v5384_v41 = vpop.eup %5383  ;;  %v7291_v40 = vpop.f32.mrf.mxu2 }
 0x743   :  { %3236 = vxpose.xlu2.b32.cont [12/16] (narrow) %v2957_v35, 16  ;;  %v2378_v43 = vadd.f32 1.0, %v5384_v41  ;;  %v2981_v27 = vpop.f32.mrf.mxu1 }
 0x744   :  { %v2982_v31 = vadd.f32 %v7264_v46, %v2981_v27 }
 0x745   :  { %v2506_v62 = vmul.f32 %v2378_v43, %v1738_v4 }
 0x747   :  { %v2570_v5 = vpack.c.bf16 %v2506_v62, %v2505_v8 }
 0x748   :  { %3258 = vxpose.xlu0.b32.cont [2/16] (narrow) %v2972_v0, 16 }
 0x74a   :  { %v7297_v48 = vpop.f32.mrf.mxu2 }
 0x74b   :  { %4734 = vmatmul.msk.bf16.gmra.mxu2 %vm2607_vm10, %v2570_v5  ;;  %3237 = vxpose.xlu2.b32.cont [13/16] (narrow) %v2960_v39, 16  ;;  %v2984_v45 = vpop.f32.mrf.mxu1 }
 0x750   :  { %3259 = vxpose.xlu0.b32.cont [3/16] (narrow) %v2975_v16, 16 }
 0x752   :  { %v7305_v28 = vpop.f32.mrf.mxu2 }
 0x753   :  { %3238 = vxpose.xlu2.b32.cont [14/16] (narrow) %v2962_v57, 16  ;;  %v2986_v60 = vpop.f32.mrf.mxu1 }
 0x754   :  { %v2987_v17 = vadd.f32 %v7264_v46, %v2986_v60 }
 0x758   :  { %3260 = vxpose.xlu0.b32.cont [4/16] (narrow) %v2977_v58, 16 }
 0x75a   :  { %v7308_v54 = vpop.f32.mrf.mxu2 }
 0x75b   :  { %3911 = vmatmul.bf16.vlgmr.msrb.gmra.mxu2 %v7114_v52  ;;  %3239 = vxpose.xlu2.b32.cont [15/16] (narrow) %v2965_v42, 16  ;;  %v2989_v25 = vpop.f32.mrf.mxu1  ;;  %v2985_v52 = vadd.f32 %v7264_v46, %v2984_v45 }
 0x75c   :  { %v2990_v63 = vadd.f32 %v7264_v46, %v2989_v25 }
 0x760   :  { %3261 = vxpose.xlu0.b32.cont [5/16] (narrow) %v2980_v49, 16 }
 0x763   :  { %3240 = vxpose.xlu2.b32.end [16/16] (narrow) %v2967_v10, 16  ;;  %v2991_v34 = vpop.f32.mrf.mxu1 }
 0x764   :  { %v2992_v62 = vadd.f32 %v7264_v46, %v2991_v34 }
 0x768   :  { %3262 = vxpose.xlu0.b32.cont [6/16] (narrow) %v2982_v31, 16 }
 0x76b   :  { %3916 = vmatmul.bf16.gmra.mxu2 %v7218_v9  ;;  %v2994_v6 = vpop.f32.mrf.mxu1  ;;  %v5495_v9 = vld [vmem:[#allocation2 + $0x30] sm:$0xff] }
 0x76c   :  { %v2995_v45 = vadd.f32 %v7264_v46, %v2994_v6 }
 0x770   :  { %3263 = vxpose.xlu0.b32.cont [7/16] (narrow) %v2985_v52, 16 }
 0x773   :  { %v2996_v16 = vpop.f32.mrf.mxu1 }
 0x778   :  { %3264 = vxpose.xlu0.b32.cont [8/16] (narrow) %v2987_v17, 16  ;;  %v5496_v17 = vld [vmem:[#allocation2 + $0x38] sm:$0xff] }
 0x77a   :  { %v3412_v24 = vpop.xlane.xlu0 %3411 }
 0x77b   :  { %v3439_v23 = vmul.f32 0.0078125, %v3412_v24 }
 0x77d   :  { %v3519_v4 = vmul.f32 %v3439_v23, %v3439_v23 }
 0x780   :  { %3265 = vxpose.xlu0.b32.cont [9/16] (narrow) %v2990_v63, 16  ;;  %v2999_v63 = vpop.f32.mrf.mxu1 }
 0x782   :  { %v3476_v35 = vpop.xlane.xlu0 %3475 }
 0x783   :  { %v3503_v41 = vmul.f32 0.0078125, %v3476_v35  ;;  %v2997_v35 = vadd.f32 %v7264_v46, %v2996_v16  ;;  %v3551_v16 = vsub.f32 %v7190_v19, %v3439_v23 }
 0x784   :  { %v3241_v43 = vpop.trf.xlu2  ;;  %v3478_v5 = vpop.xlane.xlu1 %3477 }
 0x785   :  { %v3535_v8 = vsub.f32 %v3503_v41, %v3519_v4  ;;  %v7314_v12 = vadd.f32 %v5495_v9, %v3241_v43  ;;  %v3504_v57 = vmul.f32 0.0078125, %v3478_v5 }
 0x787   :  { %v3567_v0 = vadd.f32 1e-05, %v3535_v8  ;;  %3415 = vadd.xlane.f32.xlu1 %v7314_v12  ;;  %v3457_v58 = vmul.f32 %v7314_v12, %v7314_v12 }
 0x788   :  { %3266 = vxpose.xlu0.b32.cont [10/16] (narrow) %v2992_v62, 16  ;;  %v3000_v62 = vadd.f32 %v7264_v46, %v2999_v63 }
 0x789   :  { %5385 = vrsqrt.f32 %v3567_v0  ;;  %vm3625_vm3 = vweird.f32 %v3567_v0 }
 0x78a   :  { %v3414_v39 = vpop.xlane.xlu0 %3413 }
 0x78b   :  { %v3440_v27 = vmul.f32 0.0078125, %v3414_v39 }
 0x78c   :  { %v3242_v31 = vpop.trf.xlu2 }
 0x78d   :  { %v3520_v42 = vmul.f32 %v3440_v27, %v3440_v27  ;;  %v7321_v34 = vadd.f32 %v5496_v17, %v3242_v31 }
 0x78f   :  { %v5386_v49 = vpop.eup %5385  ;;  %v3536_v10 = vsub.f32 %v3504_v57, %v3520_v42  ;;  %3479 = vadd.xlane.f32.xlu1 %v3457_v58  ;;  %v3458_v8 = vmul.f32 %v7321_v34, %v7321_v34  ;;  %v3001_v57 = vpop.f32.mrf.mxu1 }
 0x790   :  { %v3620_v60 = vmul.f32 %v5386_v49, %v3567_v0  ;;  %3267 = vxpose.xlu0.b32.cont [11/16] (narrow) %v2995_v45, 16  ;;  %vm3626_vm10 = vweird.f32 %v5386_v49  ;;  %v3552_v0 = vsub.f32 %v7216_v22, %v3440_v27 }
 0x791   :  { %v3568_v25 = vadd.f32 1e-05, %v3536_v10  ;;  %vm3627_vm4 = vmor %vm3625_vm3, %vm3626_vm10  ;;  %v7329_v10 = vpop.f32.mrf.mxu2 }
 0x792   :  { %v3621_v52 = vmul.f32 %v5386_v49, %v3620_v60 }
 0x793   :  { %5387 = vrsqrt.f32 %v3568_v25  ;;  %vm3635_vm6 = vweird.f32 %v3568_v25 }
 0x794   :  { %v3622_v24 = vmul.f32 0.5, %v3621_v52  ;;  %v3002_v52 = vadd.f32 %v7264_v46, %v3001_v57 }
 0x796   :  { %v3623_v4 = vsub.f32 1.5, %v3622_v24 }
 0x797   :  { %3417 = vadd.xlane.f32.xlu1 %v7321_v34  ;;  %v3004_v17 = vpop.f32.mrf.mxu1 }
 0x798   :  { %3268 = vxpose.xlu0.b32.cont [12/16] (narrow) %v2997_v35, 16  ;;  %v3624_v41 = vmul.f32 %v5386_v49, %v3623_v4  ;;  %v3005_v27 = vadd.f32 %v7264_v46, %v3004_v17 }
 0x799   :  { %v5388_v6 = vpop.eup %5387  ;;  %v7337_v35 = vpop.f32.mrf.mxu2 }
 0x79a   :  { %v3630_v43 = vmul.f32 %v5388_v6, %v3568_v25  ;;  %v3628_v5 = vsel %vm3627_vm4, %v5386_v49, %v3624_v41  ;;  %vm3636_vm5 = vweird.f32 %v5388_v6 }
 0x79b   :  { %v3743_v42 = vmul.f32 %v3628_v5, %v3551_v16  ;;  %vm3637_vm7 = vmor %vm3635_vm6, %vm3636_vm5 }
 0x79c   :  { %v3631_v9 = vmul.f32 %v5388_v6, %v3630_v43 }
 0x79d   :  { %v3762_v49 = vmul.f32 %v7086_v11, %v3743_v42 }
 0x79e   :  { %v3632_v39 = vmul.f32 0.5, %v3631_v9 }
 0x79f   :  { %3481 = vadd.xlane.f32.xlu1 %v3458_v8  ;;  %v3781_v24 = vadd.f32 %v7101_v14, %v3762_v49  ;;  %v3006_v4 = vpop.f32.mrf.mxu1 }
 0x7a0   :  { %v3633_v58 = vsub.f32 1.5, %v3632_v39  ;;  %3269 = vxpose.xlu0.b32.cont [13/16] (narrow) %v3000_v62, 16 }
 0x7a2   :  { %v3634_v45 = vmul.f32 %v5388_v6, %v3633_v58 }
 0x7a4   :  { %v3638_v60 = vsel %vm3637_vm7, %v5388_v6, %v3634_v45  ;;  %v3007_v6 = vadd.f32 %v7264_v46, %v3006_v4 }
 0x7a5   :  { %v3744_v31 = vmul.f32 %v3638_v60, %v3552_v0 }
 0x7a7   :  { %v3763_v23 = vmul.f32 %v7086_v11, %v3744_v31  ;;  %v5497_v11 = vld [vmem:[#allocation2 + $0x40] sm:$0xff] }
 0x7a8   :  { %3270 = vxpose.xlu0.b32.cont [14/16] (narrow) %v3002_v52, 16 }
 0x7a9   :  { %v3782_v63 = vadd.f32 %v7101_v14, %v3763_v23  ;;  %v5498_v14 = vld [vmem:[#allocation2 + $0x48] sm:$0xff] }
 0x7ab   :  { %v3795_v25 = vpack.c.bf16 %v3782_v63, %v3781_v24 }
 0x7ad   :  { %3921 = vmatmul.bf16.gmra.mxu2 %v3795_v25  ;;  %3970 = vmatmul.bf16.gmra.mxu3 %v3795_v25 }
 0x7b0   :  { %3271 = vxpose.xlu0.b32.cont [15/16] (narrow) %v3005_v27, 16  ;;  %v3050_v27 = vadd.f32 %v7264_v46, %v7169_v15 }
 0x7b8   :  { %3272 = vxpose.xlu0.b32.end [16/16] (narrow) %v3007_v6, 16 }
 0x7e4   :  { %v3273_v41 = vpop.trf.xlu0 }
 0x7e5   :  { %v7341_v43 = vadd.f32 %v5497_v11, %v3273_v41  ;;  %v3052_v11 = vadd.f32 %v7264_v46, %v7194_v47 }
 0x7e7   :  { %3419 = vadd.xlane.f32.xlu2 %v7341_v43  ;;  %v3459_v62 = vmul.f32 %v7341_v43, %v7341_v43 }
 0x7ec   :  { %v3274_v8 = vpop.trf.xlu0 }
 0x7ed   :  { %v7344_v9 = vadd.f32 %v5498_v14, %v3274_v8 }
 0x7ef   :  { %3483 = vadd.xlane.f32.xlu2 %v3459_v62  ;;  %v3460_v5 = vmul.f32 %v7344_v9, %v7344_v9 }
 0x7f1   :  { %3485 = vadd.xlane.f32.xlu1 %v3460_v5 }
 0x7fa   :  { %v3416_v39 = vpop.xlane.xlu1 %3415 }
 0x7fb   :  { %v3441_v57 = vmul.f32 0.0078125, %v3416_v39  ;;  %v3009_v39 = vpop.f32.mrf.mxu1 }
 0x7fd   :  { %v3521_v16 = vmul.f32 %v3441_v57, %v3441_v57  ;;  %v3553_v15 = vsub.f32 %v7314_v12, %v3441_v57 }
 0x802   :  { %v3480_v58 = vpop.xlane.xlu1 %3479 }
 0x803   :  { %v3505_v42 = vmul.f32 0.0078125, %v3480_v58 }
 0x805   :  { %v3537_v45 = vsub.f32 %v3505_v42, %v3521_v16  ;;  %v3055_v42 = vadd.f32 %v7264_v46, %v7228_v29  ;;  %v7365_v29 = vld [vmem:[%s7809_s3] ss:$0 sm:$0xff] }
 0x807   :  { %v3569_v0 = vadd.f32 1e-05, %v3537_v45 }
 0x809   :  { %5389 = vrsqrt.f32 %v3569_v0  ;;  %vm3645_vm8 = vweird.f32 %v3569_v0 }
 0x80a   :  { %v3418_v60 = vpop.xlane.xlu1 %3417 }
 0x80b   :  { %v3442_v49 = vmul.f32 0.0078125, %v3418_v60  ;;  %v7357_v60 = vpop.f32.mrf.mxu2 }
 0x80d   :  { %v3522_v23 = vmul.f32 %v3442_v49, %v3442_v49 }
 0x80f   :  { %v5390_v31 = vpop.eup %5389 }
 0x810   :  { %v3640_v52 = vmul.f32 %v5390_v31, %v3569_v0  ;;  %vm3646_vm9 = vweird.f32 %v5390_v31 }
 0x811   :  { %vm3647_vm11 = vmor %vm3645_vm8, %vm3646_vm9 }
 0x812   :  { %v3482_v17 = vpop.xlane.xlu1 %3481  ;;  %v3641_v63 = vmul.f32 %v5390_v31, %v3640_v52  ;;  %v3010_v52 = vadd.f32 %v7264_v46, %v3009_v39 }
 0x813   :  { %v3506_v24 = vmul.f32 0.0078125, %v3482_v17 }
 0x814   :  { %v3642_v6 = vmul.f32 0.5, %v3641_v63  ;;  %v3057_v63 = vadd.f32 %v7264_v46, %v7245_v56  ;;  %v3060_v56 = vadd.f32 %v7264_v46, %v7256_v13  ;;  %v3020_v13 = vadd.f32 %v7264_v46, %v6849_v32 }
 0x815   :  { %v3538_v25 = vsub.f32 %v3506_v24, %v3522_v23  ;;  %v3554_v23 = vsub.f32 %v7321_v34, %v3442_v49  ;;  %v7374_v49 = vld [vmem:[%s7810_s4] ss:$0 sm:$0xff]  ;;  %v3072_v32 = vadd.f32 %v7264_v46, %v7297_v48  ;;  %v3032_v48 = vadd.f32 %v7264_v46, %v7023_v20 }
 0x816   :  { %v3643_v41 = vsub.f32 1.5, %v3642_v6 }
 0x817   :  { %v3570_v4 = vadd.f32 1e-05, %v3538_v25  ;;  %v3011_v25 = vpop.f32.mrf.mxu1 }
 0x818   :  { %3321 = vxpose.xlu2.b32.start [1/16] (narrow) %v3050_v27, 16  ;;  %v3644_v14 = vmul.f32 %v5390_v31, %v3643_v41  ;;  %v3012_v6 = vadd.f32 %v7264_v46, %v3011_v25 }
 0x819   :  { %5391 = vrsqrt.f32 %v3570_v4  ;;  %vm3655_vm12 = vweird.f32 %v3570_v4 }
 0x81a   :  { %v3648_v16 = vsel %vm3647_vm11, %v5390_v31, %v3644_v14  ;;  %v3062_v14 = vadd.f32 %v7264_v46, %v7269_v36  ;;  %v3022_v36 = vadd.f32 %v7264_v46, %v6883_v21  ;;  %v3075_v21 = vadd.f32 %v7264_v46, %v7305_v28 }
 0x81b   :  { %v3745_v47 = vmul.f32 %v3648_v16, %v3553_v15  ;;  %v3035_v28 = vadd.f32 %v7264_v46, %v7052_v59  ;;  %v3040_v59 = vadd.f32 %v7264_v46, %v7116_v50 }
 0x81d   :  { %v3764_v57 = vmul.f32 %v7365_v29, %v3745_v47 }
 0x81f   :  { %v5392_v8 = vpop.eup %5391  ;;  %v3783_v27 = vadd.f32 %v7374_v49, %v3764_v57 }
 0x820   :  { %v3650_v62 = vmul.f32 %v5392_v8, %v3570_v4  ;;  %3322 = vxpose.xlu2.b32.cont [2/16] (narrow) %v3052_v11, 16  ;;  %vm3656_vm13 = vweird.f32 %v5392_v8  ;;  %v3086_v11 = vpop.f32.mrf.mxu2 }
 0x821   :  { %vm3657_vm14 = vmor %vm3655_vm12, %vm3656_vm13 }
 0x822   :  { %v3651_v5 = vmul.f32 %v5392_v8, %v3650_v62  ;;  %v3017_v62 = vadd.f32 %v7264_v46, %v6819_v26  ;;  %v3070_v26 = vadd.f32 %v7264_v46, %v7291_v40  ;;  %v3030_v40 = vadd.f32 %v7264_v46, %v6984_v61 }
 0x823   :  { %v3082_v61 = vadd.f32 %v7264_v46, %v7337_v35  ;;  %v3087_v35 = vadd.f32 %v7264_v46, %v3086_v11 }
 0x824   :  { %v3652_v58 = vmul.f32 0.5, %v3651_v5  ;;  %v3065_v5 = vadd.f32 %v7264_v46, %v7277_v3  ;;  %v3025_v3 = vadd.f32 %v7264_v46, %v6920_v51  ;;  %v3077_v51 = vadd.f32 %v7264_v46, %v7308_v54 }
 0x825   :  { %v3037_v54 = vadd.f32 %v7264_v46, %v7089_v55  ;;  %v3042_v55 = vadd.f32 %v7264_v46, %v7127_v2 }
 0x826   :  { %v3653_v45 = vsub.f32 1.5, %v3652_v58  ;;  %v3085_v58 = vadd.f32 %v7264_v46, %v7357_v60 }
 0x828   :  { %v3654_v0 = vmul.f32 %v5392_v8, %v3653_v45  ;;  %3323 = vxpose.xlu2.b32.cont [3/16] (narrow) %v3055_v42, 16 }
 0x829   :  { %3421 = vadd.xlane.f32.xlu0 %v7344_v9 }
 0x82a   :  { %v3658_v31 = vsel %vm3657_vm14, %v5392_v8, %v3654_v0  ;;  %v3015_v8 = vadd.f32 %v7264_v46, %v6786_v1  ;;  %v3067_v1 = vadd.f32 %v7264_v46, %v7284_v33  ;;  %v3027_v33 = vadd.f32 %v7264_v46, %v6955_v37 }
 0x82b   :  { %3289 = vxpose.xlu1.b32.start [1/16] (narrow) %v3010_v52, 16  ;;  %v3746_v17 = vmul.f32 %v3658_v31, %v3554_v23  ;;  %v3080_v37 = vadd.f32 %v7264_v46, %v7329_v10  ;;  %v3045_v0 = vadd.f32 %v7264_v46, %v7144_v30 }
 0x82d   :  { %v3765_v24 = vmul.f32 %v7365_v29, %v3746_v17 }
 0x82f   :  { %v3784_v4 = vadd.f32 %v7374_v49, %v3765_v24  ;;  %v3047_v24 = vadd.f32 %v7264_v46, %v7156_v44 }
 0x830   :  { %3324 = vxpose.xlu2.b32.cont [4/16] (narrow) %v3057_v63, 16 }
 0x831   :  { %v3796_v41 = vpack.c.bf16 %v3784_v4, %v3783_v27 }
 0x833   :  { %3290 = vxpose.xlu1.b32.cont [2/16] (narrow) %v3012_v6, 16  ;;  %3926 = vmatmul.bf16.gmra.mxu2 %v3796_v41 }
 0x834   :  { %3975 = vmatmul.bf16.gmra.mxu3 %v3796_v41 }
 0x838   :  { %3325 = vxpose.xlu2.b32.cont [5/16] (narrow) %v3060_v56, 16 }
 0x83b   :  { %3291 = vxpose.xlu1.b32.cont [3/16] (narrow) %v3015_v8, 16 }
 0x840   :  { %3326 = vxpose.xlu2.b32.cont [6/16] (narrow) %v3062_v14, 16 }
 0x843   :  { %3292 = vxpose.xlu1.b32.cont [4/16] (narrow) %v3017_v62, 16 }
 0x848   :  { %3327 = vxpose.xlu2.b32.cont [7/16] (narrow) %v3065_v5, 16  ;;  %v3089_v5 = vpop.f32.mrf.mxu2 }
 0x84b   :  { %3293 = vxpose.xlu1.b32.cont [5/16] (narrow) %v3020_v13, 16 }
 0x850   :  { %3328 = vxpose.xlu2.b32.cont [8/16] (narrow) %v3067_v1, 16 }
 0x853   :  { %3294 = vxpose.xlu1.b32.cont [6/16] (narrow) %v3022_v36, 16 }
 0x858   :  { %3329 = vxpose.xlu2.b32.cont [9/16] (narrow) %v3070_v26, 16 }
 0x85a   :  { %v3420_v39 = vpop.xlane.xlu2 %3419 }
 0x85b   :  { %3295 = vxpose.xlu1.b32.cont [7/16] (narrow) %v3025_v3, 16  ;;  %v3443_v20 = vmul.f32 0.0078125, %v3420_v39 }
 0x85d   :  { %v3523_v15 = vmul.f32 %v3443_v20, %v3443_v20  ;;  %v3555_v8 = vsub.f32 %v7341_v43, %v3443_v20 }
 0x860   :  { %3330 = vxpose.xlu2.b32.cont [10/16] (narrow) %v3072_v32, 16 }
 0x862   :  { %v3484_v16 = vpop.xlane.xlu2 %3483 }
 0x863   :  { %3296 = vxpose.xlu1.b32.cont [8/16] (narrow) %v3027_v33, 16  ;;  %v3507_v10 = vmul.f32 0.0078125, %v3484_v16 }
 0x864   :  { %v3486_v52 = vpop.xlane.xlu1 %3485 }
 0x865   :  { %v3539_v42 = vsub.f32 %v3507_v10, %v3523_v15  ;;  %v3508_v31 = vmul.f32 0.0078125, %v3486_v52 }
 0x867   :  { %v3571_v45 = vadd.f32 1e-05, %v3539_v42  ;;  %v5504_v42 = vld [vmem:[#allocation2 + $0x68] sm:$0xff] }
 0x868   :  { %3331 = vxpose.xlu2.b32.cont [11/16] (narrow) %v3075_v21, 16 }
 0x869   :  { %5393 = vrsqrt.f32 %v3571_v45  ;;  %vm3665_vm0 = vweird.f32 %v3571_v45 }
 0x86b   :  { %3297 = vxpose.xlu1.b32.cont [9/16] (narrow) %v3030_v40, 16  ;;  %v3091_v40 = vpop.f32.mrf.mxu2 }
 0x86f   :  { %v5394_v47 = vpop.eup %5393 }
 0x870   :  { %3332 = vxpose.xlu2.b32.cont [12/16] (narrow) %v3077_v51, 16  ;;  %v3660_v60 = vmul.f32 %v5394_v47, %v3571_v45  ;;  %vm3666_vm15 = vweird.f32 %v5394_v47 }
 0x871   :  { %vm3667_vm1 = vmor %vm3665_vm0, %vm3666_vm15 }
 0x872   :  { %v3661_v57 = vmul.f32 %v5394_v47, %v3660_v60  ;;  %v3092_v60 = vadd.f32 %v7264_v46, %v3091_v40 }
 0x873   :  { %3298 = vxpose.xlu1.b32.cont [10/16] (narrow) %v3032_v48, 16  ;;  %v5501_v48 = vld [vmem:[#allocation2 + $0x50] sm:$0xff]  ;;  %v3094_v15 = vpop.f32.mrf.mxu2 }
 0x874   :  { %v3662_v2 = vmul.f32 0.5, %v3661_v57 }
 0x876   :  { %v3663_v27 = vsub.f32 1.5, %v3662_v2 }
 0x878   :  { %3333 = vxpose.xlu2.b32.cont [13/16] (narrow) %v3080_v37, 16  ;;  %v3664_v6 = vmul.f32 %v5394_v47, %v3663_v27 }
 0x87a   :  { %v3668_v11 = vsel %vm3667_vm1, %v5394_v47, %v3664_v6  ;;  %v3090_v47 = vadd.f32 %v7264_v46, %v3089_v5 }
 0x87b   :  { %3299 = vxpose.xlu1.b32.cont [11/16] (narrow) %v3035_v28, 16  ;;  %v3747_v44 = vmul.f32 %v3668_v11, %v3555_v8 }
 0x87d   :  { %v3766_v26 = vmul.f32 %v7365_v29, %v3747_v44 }
 0x87f   :  { %v3785_v32 = vadd.f32 %v7374_v49, %v3766_v26 }
 0x880   :  { %3334 = vxpose.xlu2.b32.cont [14/16] (narrow) %v3082_v61, 16  ;;  %v5502_v61 = vld [vmem:[#allocation2 + $0x58] sm:$0xff] }
 0x883   :  { %3300 = vxpose.xlu1.b32.cont [12/16] (narrow) %v3037_v54, 16 }
 0x888   :  { %3335 = vxpose.xlu2.b32.cont [15/16] (narrow) %v3085_v58, 16  ;;  %v5503_v58 = vld [vmem:[#allocation2 + $0x60] sm:$0xff] }
 0x88b   :  { %3301 = vxpose.xlu1.b32.cont [13/16] (narrow) %v3040_v59, 16 }
 0x890   :  { %3336 = vxpose.xlu2.b32.end [16/16] (narrow) %v3087_v35, 16 }
 0x893   :  { %3302 = vxpose.xlu1.b32.cont [14/16] (narrow) %v3042_v55, 16  ;;  %v3096_v55 = vpop.f32.mrf.mxu2 }
 0x89b   :  { %3303 = vxpose.xlu1.b32.cont [15/16] (narrow) %v3045_v0, 16  ;;  %v3099_v52 = vpop.f32.mrf.mxu2 }
 0x89c   :  { %v3422_v50 = vpop.xlane.xlu0 %3421  ;;  %v3100_v57 = vadd.f32 %v7264_v46, %v3099_v52 }
 0x89d   :  { %v3444_v23 = vmul.f32 0.0078125, %v3422_v50  ;;  %v3095_v50 = vadd.f32 %v7264_v46, %v3094_v15 }
 0x89f   :  { %v3524_v17 = vmul.f32 %v3444_v23, %v3444_v23  ;;  %v3556_v13 = vsub.f32 %v7344_v9, %v3444_v23 }
 0x8a1   :  { %v3540_v63 = vsub.f32 %v3508_v31, %v3524_v17  ;;  %v3097_v31 = vadd.f32 %v7264_v46, %v3096_v55 }
 0x8a3   :  { %v3572_v25 = vadd.f32 1e-05, %v3540_v63  ;;  %3304 = vxpose.xlu1.b32.end [16/16] (narrow) %v3047_v24, 16  ;;  %v3101_v23 = vpop.f32.mrf.mxu2 }
 0x8a4   :  { %v3102_v63 = vadd.f32 %v7264_v46, %v3101_v23 }
 0x8a5   :  { %5395 = vrsqrt.f32 %v3572_v25  ;;  %vm3675_vm10 = vweird.f32 %v3572_v25 }
 0x8ab   :  { %v5396_v4 = vpop.eup %5395  ;;  %v3104_v17 = vpop.f32.mrf.mxu2 }
 0x8ac   :  { %v3670_v30 = vmul.f32 %v5396_v4, %v3572_v25  ;;  %vm3676_vm2 = vweird.f32 %v5396_v4  ;;  %v3105_v25 = vadd.f32 %v7264_v46, %v3104_v17 }
 0x8ad   :  { %vm3677_vm3 = vmor %vm3675_vm10, %vm3676_vm2 }
 0x8ae   :  { %v3671_v41 = vmul.f32 %v5396_v4, %v3670_v30 }
 0x8b0   :  { %v3672_v56 = vmul.f32 0.5, %v3671_v41 }
 0x8b1   :  { %v3337_v20 = vpop.trf.xlu2 }
 0x8b2   :  { %v3673_v14 = vsub.f32 1.5, %v3672_v56  ;;  %v7446_v10 = vadd.f32 %v5503_v58, %v3337_v20 }
 0x8b3   :  { %v3106_v24 = vpop.f32.mrf.mxu2 }
 0x8b4   :  { %v3674_v62 = vmul.f32 %v5396_v4, %v3673_v14  ;;  %v3463_v45 = vmul.f32 %v7446_v10, %v7446_v10 }
 0x8b6   :  { %v3678_v1 = vsel %vm3677_vm3, %v5396_v4, %v3674_v62  ;;  %v3107_v4 = vadd.f32 %v7264_v46, %v3106_v24 }
 0x8b7   :  { %v3748_v36 = vmul.f32 %v3678_v1, %v3556_v13 }
 0x8b9   :  { %v3767_v3 = vmul.f32 %v7365_v29, %v3748_v36  ;;  %v3338_v59 = vpop.trf.xlu2 }
 0x8ba   :  { %v7449_v35 = vadd.f32 %v5504_v42, %v3338_v59 }
 0x8bb   :  { %v3786_v33 = vadd.f32 %v7374_v49, %v3767_v3  ;;  %v3109_v2 = vpop.f32.mrf.mxu2 }
 0x8bc   :  { %v3464_v0 = vmul.f32 %v7449_v35, %v7449_v35  ;;  %v3110_v14 = vadd.f32 %v7264_v46, %v3109_v2 }
 0x8bd   :  { %v3797_v21 = vpack.c.bf16 %v3786_v33, %v3785_v32 }
 0x8bf   :  { %3931 = vmatmul.bf16.gmra.mxu2 %v3797_v21  ;;  %3980 = vmatmul.bf16.gmra.mxu3 %v3797_v21 }
 0x8c3   :  { %v3111_v30 = vpop.f32.mrf.mxu2 }
 0x8c4   :  { %v3112_v13 = vadd.f32 %v7264_v46, %v3111_v30 }
 0x8cb   :  { %v3114_v5 = vpop.f32.mrf.mxu2 }
 0x8cf   :  { %v3305_v51 = vpop.trf.xlu1 }
 0x8d0   :  { %v7436_v37 = vadd.f32 %v5501_v48, %v3305_v51  ;;  %v3115_v48 = vadd.f32 %v7264_v46, %v3114_v5 }
 0x8d2   :  { %3423 = vadd.xlane.f32.xlu0 %v7436_v37  ;;  %v3461_v28 = vmul.f32 %v7436_v37, %v7436_v37 }
 0x8d3   :  { %v3116_v40 = vpop.f32.mrf.mxu2 }
 0x8d7   :  { %v3306_v39 = vpop.trf.xlu1 }
 0x8d8   :  { %v7441_v54 = vadd.f32 %v5502_v61, %v3306_v39 }
 0x8da   :  { %3487 = vadd.xlane.f32.xlu0 %v3461_v28  ;;  %v3462_v16 = vmul.f32 %v7441_v54, %v7441_v54 }
 0x8db   :  { %v3119_v58 = vpop.f32.mrf.mxu2 }
 0x8e2   :  { %3425 = vadd.xlane.f32.xlu0 %v7441_v54 }
 0x8e3   :  { %v3121_v23 = vpop.f32.mrf.mxu2 }
 0x8e4   :  { %v3122_v2 = vadd.f32 %v7264_v46, %v3121_v23 }
 0x8ea   :  { %3489 = vadd.xlane.f32.xlu0 %v3462_v16  ;;  %v3117_v16 = vadd.f32 %v7264_v46, %v3116_v40 }
 0x8eb   :  { %v3124_v30 = vpop.f32.mrf.mxu2 }
 0x903   :  { %3427 = vadd.xlane.f32.xlu1 %v7446_v10 }
 0x90b   :  { %3429 = vadd.xlane.f32.xlu1 %v7449_v35 }
 0x913   :  { %3353 = vxpose.xlu0.b32.start [1/16] (narrow) %v3090_v47, 16  ;;  %3491 = vadd.xlane.f32.xlu1 %v3463_v45 }
 0x91b   :  { %3354 = vxpose.xlu0.b32.cont [2/16] (narrow) %v3092_v60, 16  ;;  %3493 = vadd.xlane.f32.xlu1 %v3464_v0  ;;  %v3120_v0 = vadd.f32 %v7264_v46, %v3119_v58 }
 0x923   :  { %3355 = vxpose.xlu0.b32.cont [3/16] (narrow) %v3095_v50, 16 }
 0x92b   :  { %3356 = vxpose.xlu0.b32.cont [4/16] (narrow) %v3097_v31, 16 }
 0x933   :  { %3357 = vxpose.xlu0.b32.cont [5/16] (narrow) %v3100_v57, 16 }
 0x93b   :  { %3358 = vxpose.xlu0.b32.cont [6/16] (narrow) %v3102_v63, 16 }
 0x943   :  { %3359 = vxpose.xlu0.b32.cont [7/16] (narrow) %v3105_v25, 16 }
 0x945   :  { %v3424_v27 = vpop.xlane.xlu0 %3423 }
 0x946   :  { %v3445_v6 = vmul.f32 0.0078125, %v3424_v27 }
 0x948   :  { %v3525_v11 = vmul.f32 %v3445_v6, %v3445_v6  ;;  %v3557_v47 = vsub.f32 %v7436_v37, %v3445_v6 }
 0x94b   :  { %3360 = vxpose.xlu0.b32.cont [8/16] (narrow) %v3107_v4, 16 }
 0x94d   :  { %v3488_v41 = vpop.xlane.xlu0 %3487 }
 0x94e   :  { %v3509_v56 = vmul.f32 0.0078125, %v3488_v41 }
 0x950   :  { %v3541_v8 = vsub.f32 %v3509_v56, %v3525_v11  ;;  %v3125_v11 = vadd.f32 %v7264_v46, %v3124_v30  ;;  %v4891_v30 = vld [vmem:[#allocation7 + $0x38] sm:$0xff] }
 0x951   :  { %4437 = vmatpush.bf16.msra.mxu2 %v4891_v30 }
 0x952   :  { %v3573_v44 = vadd.f32 1e-05, %v3541_v8 }
 0x953   :  { %3361 = vxpose.xlu0.b32.cont [9/16] (narrow) %v3110_v14, 16 }
 0x954   :  { %5397 = vrsqrt.f32 %v3573_v44  ;;  %vm3685_vm5 = vweird.f32 %v3573_v44 }
 0x955   :  { %v3426_v62 = vpop.xlane.xlu0 %3425 }
 0x956   :  { %v3446_v36 = vmul.f32 0.0078125, %v3426_v62  ;;  %v3126_v62 = vpop.f32.mrf.mxu2 }
 0x957   :  { %v3127_v5 = vadd.f32 %v7264_v46, %v3126_v62 }
 0x958   :  { %v3526_v32 = vmul.f32 %v3446_v36, %v3446_v36  ;;  %v3558_v31 = vsub.f32 %v7441_v54, %v3446_v36 }
 0x95a   :  { %v5398_v1 = vpop.eup %5397 }
 0x95b   :  { %v3680_v26 = vmul.f32 %v5398_v1, %v3573_v44  ;;  %3362 = vxpose.xlu0.b32.cont [10/16] (narrow) %v3112_v13, 16  ;;  %vm3686_vm4 = vweird.f32 %v5398_v1 }
 0x95c   :  { %vm3687_vm6 = vmor %vm3685_vm5, %vm3686_vm4 }
 0x95d   :  { %v3490_v3 = vpop.xlane.xlu0 %3489  ;;  %v3681_v21 = vmul.f32 %v5398_v1, %v3680_v26 }
 0x95e   :  { %v3510_v33 = vmul.f32 0.0078125, %v3490_v3  ;;  %v3912_v62 = vpop.f32.mrf.mxu2 }
 0x95f   :  { %v3682_v39 = vmul.f32 0.5, %v3681_v21 }
 0x960   :  { %v3542_v51 = vsub.f32 %v3510_v33, %v3526_v32 }
 0x961   :  { %v3683_v61 = vsub.f32 1.5, %v3682_v39 }
 0x962   :  { %v3574_v28 = vadd.f32 1e-05, %v3542_v51 }
 0x963   :  { %3363 = vxpose.xlu0.b32.cont [11/16] (narrow) %v3115_v48, 16  ;;  %v3684_v59 = vmul.f32 %v5398_v1, %v3683_v61 }
 0x964   :  { %5399 = vrsqrt.f32 %v3574_v28  ;;  %vm3695_vm8 = vweird.f32 %v3574_v28 }
 0x965   :  { %v3688_v45 = vsel %vm3687_vm6, %v5398_v1, %v3684_v59 }
 0x966   :  { %v3749_v52 = vmul.f32 %v3688_v45, %v3557_v47 }
 0x968   :  { %v3768_v63 = vmul.f32 %v7365_v29, %v3749_v52 }
 0x96a   :  { %v5400_v20 = vpop.eup %5399  ;;  %v3787_v27 = vadd.f32 %v7374_v49, %v3768_v63 }
 0x96b   :  { %v3690_v15 = vmul.f32 %v5400_v20, %v3574_v28  ;;  %3364 = vxpose.xlu0.b32.cont [12/16] (narrow) %v3117_v16, 16  ;;  %vm3696_vm7 = vweird.f32 %v5400_v20 }
 0x96c   :  { %vm3697_vm9 = vmor %vm3695_vm8, %vm3696_vm7 }
 0x96d   :  { %v3691_v42 = vmul.f32 %v5400_v20, %v3690_v15 }
 0x96f   :  { %v3692_v55 = vmul.f32 0.5, %v3691_v42 }
 0x971   :  { %v3693_v60 = vsub.f32 1.5, %v3692_v55 }
 0x973   :  { %v3694_v50 = vmul.f32 %v5400_v20, %v3693_v60  ;;  %3365 = vxpose.xlu0.b32.cont [13/16] (narrow) %v3120_v0, 16 }
 0x975   :  { %v3698_v17 = vsel %vm3697_vm9, %v5400_v20, %v3694_v50 }
 0x976   :  { %v3428_v57 = vpop.xlane.xlu1 %3427  ;;  %v3750_v24 = vmul.f32 %v3698_v17, %v3558_v31 }
 0x977   :  { %v3447_v56 = vmul.f32 0.0078125, %v3428_v57 }
 0x978   :  { %v3769_v25 = vmul.f32 %v7365_v29, %v3750_v24  ;;  %v5505_v24 = vld [vmem:[#allocation2 + $0x70] sm:$0xff] }
 0x979   :  { %v3527_v8 = vmul.f32 %v3447_v56, %v3447_v56  ;;  %v3559_v15 = vsub.f32 %v7446_v10, %v3447_v56  ;;  %v4898_v56 = vld [vmem:[#allocation7 + $0x70] sm:$0xff] }
 0x97a   :  { %v3788_v4 = vadd.f32 %v7374_v49, %v3769_v25 }
 0x97b   :  { %3366 = vxpose.xlu0.b32.cont [14/16] (narrow) %v3122_v2, 16  ;;  %v5506_v2 = vld [vmem:[#allocation2 + $0x78] sm:$0xff] }
 0x97c   :  { %v3798_v6 = vpack.c.bf16 %v3788_v4, %v3787_v27 }
 0x97e   :  { %3936 = vmatmul.bf16.gmra.mxu2 %v3798_v6  ;;  %3985 = vmatmul.bf16.gmra.mxu3 %v3798_v6  ;;  %v3430_v41 = vpop.xlane.xlu1 %3429 }
 0x97f   :  { %v3448_v13 = vmul.f32 0.0078125, %v3430_v41  ;;  %v4899_v41 = vld [vmem:[#allocation7 + $0x78] sm:$0xff] }
 0x980   :  { %4486 = vmatpush.bf16.msra.mxu3 %v4899_v41 }
 0x981   :  { %v3528_v26 = vmul.f32 %v3448_v13, %v3448_v13  ;;  %v3560_v47 = vsub.f32 %v7449_v35, %v3448_v13 }
 0x983   :  { %3367 = vxpose.xlu0.b32.cont [15/16] (narrow) %v3125_v11, 16  ;;  %v4890_v11 = vld [vmem:[#allocation7 + $0x30] sm:$0xff] }
 0x984   :  { %4438 = vmatpush.bf16.msra.mxu2 %v4890_v11  ;;  %4487 = vmatpush.bf16.msra.mxu3 %v4898_v56 }
 0x986   :  { %v3492_v14 = vpop.xlane.xlu1 %3491 }
 0x987   :  { %v3511_v44 = vmul.f32 0.0078125, %v3492_v14  ;;  %v4897_v14 = vld [vmem:[#allocation7 + $0x68] sm:$0xff] }
 0x988   :  { %4488 = vmatpush.bf16.msra.mxu3 %v4897_v14 }
 0x989   :  { %v3543_v1 = vsub.f32 %v3511_v44, %v3527_v8  ;;  %v4889_v8 = vld [vmem:[#allocation7 + $0x28] sm:$0xff] }
 0x98a   :  { %4439 = vmatpush.bf16.msra.mxu2 %v4889_v8 }
 0x98b   :  { %v3575_v36 = vadd.f32 1e-05, %v3543_v1  ;;  %3368 = vxpose.xlu0.b32.end [16/16] (narrow) %v3127_v5, 16  ;;  %v3961_v5 = vpop.f32.mrf.mxu3  ;;  %v3914_v1 = vpop.f32.mrf.mxu2 }
 0x98d   :  { %5401 = vrsqrt.f32 %v3575_v36  ;;  %vm3705_vm11 = vweird.f32 %v3575_v36 }
 0x98e   :  { %v3494_v3 = vpop.xlane.xlu1 %3493 }
 0x98f   :  { %v3512_v32 = vmul.f32 0.0078125, %v3494_v3 }
 0x991   :  { %v3544_v33 = vsub.f32 %v3512_v32, %v3528_v26  ;;  %v4888_v32 = vld [vmem:[#allocation7 + $0x20] sm:$0xff] }
 0x992   :  { %4440 = vmatpush.bf16.msra.mxu2 %v4888_v32 }
 0x993   :  { %v5402_v21 = vpop.eup %5401  ;;  %v3576_v40 = vadd.f32 1e-05, %v3544_v33  ;;  %v3963_v26 = vpop.f32.mrf.mxu3  ;;  %v4896_v33 = vld [vmem:[#allocation7 + $0x60] sm:$0xff] }
 0x994   :  { %v3700_v51 = vmul.f32 %v5402_v21, %v3575_v36  ;;  %vm3706_vm12 = vweird.f32 %v5402_v21  ;;  %4489 = vmatpush.bf16.msra.mxu3 %v4896_v33 }
 0x995   :  { %5403 = vrsqrt.f32 %v3576_v40  ;;  %vm3707_vm13 = vmor %vm3705_vm11, %vm3706_vm12  ;;  %vm3715_vm14 = vweird.f32 %v3576_v40 }
 0x996   :  { %v3701_v48 = vmul.f32 %v5402_v21, %v3700_v51  ;;  %v4887_v51 = vld [vmem:[#allocation7 + $0x18] sm:$0xff] }
 0x997   :  { %4441 = vmatpush.bf16.msra.mxu2 %v4887_v51 }
 0x998   :  { %v3702_v28 = vmul.f32 0.5, %v3701_v48  ;;  %v4895_v48 = vld [vmem:[#allocation7 + $0x58] sm:$0xff] }
 0x999   :  { %4490 = vmatpush.bf16.msra.mxu3 %v4895_v48 }
 0x99a   :  { %v3703_v39 = vsub.f32 1.5, %v3702_v28 }
 0x99b   :  { %v5404_v61 = vpop.eup %5403 }
 0x99c   :  { %v3704_v46 = vmul.f32 %v5402_v21, %v3703_v39  ;;  %v3710_v16 = vmul.f32 %v5404_v61, %v3576_v40  ;;  %vm3716_vm15 = vweird.f32 %v5404_v61 }
 0x99d   :  { %vm3717_vm0 = vmor %vm3715_vm14, %vm3716_vm15 }
 0x99e   :  { %v3711_v20 = vmul.f32 %v5404_v61, %v3710_v16  ;;  %v3708_v58 = vsel %vm3707_vm13, %v5402_v21, %v3704_v46  ;;  %v7500_v46 = vpop.f32.mrf.mxu2  ;;  %v7502_v16 = vpop.f32.mrf.mxu3 }
 0x99f   :  { %v3751_v45 = vmul.f32 %v3708_v58, %v3559_v15 }
 0x9a0   :  { %v3712_v59 = vmul.f32 0.5, %v3711_v20  ;;  %v3817_v20 = vld [vmem:[%s7816_s10] sm:$0x3] }
 0x9a1   :  { %v3770_v52 = vmul.f32 %v7365_v29, %v3751_v45  ;;  %v4894_v45 = vld [vmem:[#allocation7 + $0x50] sm:$0xff] }
 0x9a2   :  { %v3713_v42 = vsub.f32 1.5, %v3712_v59  ;;  %4491 = vmatpush.bf16.msra.mxu3 %v4894_v45 }
 0x9a3   :  { %v3789_v23 = vadd.f32 %v7374_v49, %v3770_v52  ;;  %v7511_v52 = vperm.slane %v3817_v20, 0 }
 0x9a4   :  { %v3714_v55 = vmul.f32 %v5404_v61, %v3713_v42  ;;  %v4886_v42 = vld [vmem:[#allocation7 + $0x10] sm:$0xff] }
 0x9a5   :  { %4442 = vmatpush.bf16.msra.mxu2 %v4886_v42 }
 0x9a6   :  { %v3718_v0 = vsel %vm3717_vm0, %v5404_v61, %v3714_v55  ;;  %v7509_v55 = vperm.slane %v3817_v20, 1  ;;  %v3968_v11 = vpop.f32.mrf.mxu3 }
 0x9a7   :  { %v3752_v60 = vmul.f32 %v3718_v0, %v3560_v47  ;;  %v4885_v0 = vld [vmem:[#allocation7 + $0x8] sm:$0xff] }
 0x9a9   :  { %v3771_v50 = vmul.f32 %v7365_v29, %v3752_v60  ;;  %v4893_v60 = vld [vmem:[#allocation7 + $0x48] sm:$0xff]  ;;  %4443 = vmatpush.bf16.msra.mxu2 %v4885_v0  ;;  %v7545_v0 = vadd.f32 %v3968_v11, %v7509_v55 }
 0x9aa   :  { %4492 = vmatpush.bf16.msra.mxu3 %v4893_v60 }
 0x9ab   :  { %v3790_v31 = vadd.f32 %v7374_v49, %v3771_v50 }
 0x9ad   :  { %v3799_v17 = vpack.c.bf16 %v3790_v31, %v3789_v23  ;;  %v7514_v23 = vadd.f32 %v3963_v26, %v7509_v55 }
 0x9ae   :  { %v7539_v48 = vpop.f32.mrf.mxu3 }
 0x9af   :  { %3941 = vmatmul.bf16.gmra.mxu2 %v3799_v17  ;;  %3990 = vmatmul.bf16.gmra.mxu3 %v3799_v17  ;;  %v7517_v17 = vadd.f32 %v3914_v1, %v7511_v52  ;;  %v4004_v41 = vmul.f32 %v7514_v23, %v7514_v23 }
 0x9b1   :  { %v4003_v56 = vmul.f32 %v7517_v17, %v7517_v17 }
 0x9b3   :  { %v4035_v1 = vmul.f32 %v4003_v56, %v7517_v17 }
 0x9b7   :  { %v3369_v57 = vpop.trf.xlu0 }
 0x9b8   :  { %v7484_v63 = vadd.f32 %v5505_v24, %v3369_v57  ;;  %v7520_v24 = vadd.f32 %v3961_v5, %v7509_v55 }
 0x9ba   :  { %3431 = vadd.xlane.f32.xlu1 %v7484_v63  ;;  %v3465_v4 = vmul.f32 %v7484_v63, %v7484_v63  ;;  %v4002_v14 = vmul.f32 %v7520_v24, %v7520_v24 }
 0x9bc   :  { %v4034_v32 = vmul.f32 %v4002_v14, %v7520_v24 }
 0x9bf   :  { %v3370_v25 = vpop.trf.xlu0 }
 0x9c0   :  { %v7487_v27 = vadd.f32 %v5506_v2, %v3370_v25  ;;  %v4884_v25 = vld [vmem:[#allocation7] sm:$0xff] }
 0x9c1   :  { %v4892_v2 = vld [vmem:[#allocation7 + $0x40] sm:$0xff]  ;;  %4444 = vmatpush.bf16.msra.mxu2 %v4884_v25 }
 0x9c2   :  { %3433 = vadd.xlane.f32.xlu1 %v7487_v27  ;;  %v3466_v6 = vmul.f32 %v7487_v27, %v7487_v27  ;;  %4493 = vmatpush.bf16.msra.mxu3 %v4892_v2 }
 0x9ca   :  { %3495 = vadd.xlane.f32.xlu1 %v3465_v4  ;;  %v7523_v4 = vadd.f32 %v3912_v62, %v7511_v52 }
 0x9d2   :  { %3497 = vadd.xlane.f32.xlu1 %v3466_v6  ;;  %v3919_v6 = vpop.f32.mrf.mxu2 }
 0xa2d   :  { %v3432_v44 = vpop.xlane.xlu1 %3431 }
 0xa2e   :  { %v7494_v36 = vmul.f32 0.0078125, %v3432_v44  ;;  %v4001_v44 = vmul.f32 %v7523_v4, %v7523_v4 }
 0xa30   :  { %v3529_v21 = vmul.f32 %v7494_v36, %v7494_v36  ;;  %v4033_v33 = vmul.f32 %v4001_v44, %v7523_v4 }
 0xa32   :  { %v4097_v42 = vmul.f32 0.044715, %v4033_v33 }
 0xa35   :  { %v3434_v13 = vpop.xlane.xlu1 %3433 }
 0xa36   :  { %v7498_v39 = vmul.f32 0.0078125, %v3434_v13  ;;  %v4036_v13 = vmul.f32 %v4004_v41, %v7514_v23  ;;  %v7561_v41 = vadd.f32 %v7500_v46, %v7511_v52 }
 0xa38   :  { %v3530_v59 = vmul.f32 %v7498_v39, %v7498_v39  ;;  %v4100_v51 = vmul.f32 0.044715, %v4036_v13  ;;  %v3562_v2 = vsub.f32 %v7487_v27, %v7498_v39  ;;  %v3973_v13 = vpop.f32.mrf.mxu3 }
 0xa3d   :  { %v3496_v3 = vpop.xlane.xlu1 %3495 }
 0xa3e   :  { %v3513_v40 = vmul.f32 0.0078125, %v3496_v3 }
 0xa40   :  { %v3545_v28 = vsub.f32 %v3513_v40, %v3529_v21  ;;  %v7537_v21 = vpop.f32.mrf.mxu2 }
 0xa42   :  { %v3577_v61 = vadd.f32 1e-05, %v3545_v28  ;;  %v4099_v28 = vmul.f32 0.044715, %v4035_v1  ;;  %v4005_v1 = vmul.f32 %v7561_v41, %v7561_v41 }
 0xa44   :  { %5405 = vrsqrt.f32 %v3577_v61  ;;  %vm3725_vm2 = vweird.f32 %v3577_v61  ;;  %v4131_v60 = vadd.f32 %v4099_v28, %v7517_v17 }
 0xa45   :  { %v3498_v58 = vpop.xlane.xlu1 %3497 }
 0xa46   :  { %v3514_v15 = vmul.f32 0.0078125, %v3498_v58 }
 0xa48   :  { %v3546_v47 = vsub.f32 %v3514_v15, %v3530_v59  ;;  %v4098_v59 = vmul.f32 0.044715, %v4034_v32  ;;  %v3561_v15 = vsub.f32 %v7484_v63, %v7494_v36  ;;  %v7554_v36 = vadd.f32 %v7502_v16, %v7509_v55  ;;  %v3924_v39 = vpop.f32.mrf.mxu2 }
 0xa49   :  { %v4163_v16 = vmul.f32 0.7978846, %v4131_v60  ;;  %v7585_v60 = vadd.f32 %v3924_v39, %v7511_v52 }
 0xa4a   :  { %v5406_v50 = vpop.eup %5405  ;;  %v3578_v31 = vadd.f32 1e-05, %v3546_v47  ;;  %v4132_v47 = vadd.f32 %v4100_v51, %v7514_v23  ;;  %v4130_v25 = vadd.f32 %v4098_v59, %v7520_v24 }
 0xa4b   :  { %v3720_v57 = vmul.f32 %v5406_v50, %v3577_v61  ;;  %vm3726_vm1 = vweird.f32 %v5406_v50 }
 0xa4c   :  { %5407 = vrsqrt.f32 %v3578_v31  ;;  %vm3727_vm10 = vmor %vm3725_vm2, %vm3726_vm1  ;;  %vm3735_vm4 = vweird.f32 %v3578_v31  ;;  %v4164_v11 = vmul.f32 0.7978846, %v4132_v47  ;;  %v4162_v44 = vmul.f32 0.7978846, %v4130_v25 }
 0xa4d   :  { %v3721_v30 = vmul.f32 %v5406_v50, %v3720_v57  ;;  %v7549_v57 = vadd.f32 %v3919_v6, %v7511_v52 }
 0xa4e   :  { %5409 = vtanh.f32 %v4164_v11 }
 0xa4f   :  { %v3722_v8 = vmul.f32 0.5, %v3721_v30  ;;  %v4129_v30 = vadd.f32 %v4097_v42, %v7523_v4  ;;  %v4007_v14 = vmul.f32 %v7549_v57, %v7549_v57  ;;  %5411 = vtanh.f32 %v4163_v16  ;;  %v7581_v42 = vpop.f32.mrf.mxu3 }
 0xa50   :  { %5413 = vtanh.f32 %v4162_v44  ;;  %v4067_v44 = vmul.f32 0.5, %v7517_v17 }
 0xa51   :  { %v3723_v62 = vsub.f32 1.5, %v3722_v8  ;;  %v4039_v33 = vmul.f32 %v4007_v14, %v7549_v57  ;;  %v7600_v14 = vadd.f32 %v7539_v48, %v7509_v55 }
 0xa52   :  { %v5408_v5 = vpop.eup %5407 }
 0xa53   :  { %v3724_v26 = vmul.f32 %v5406_v50, %v3723_v62  ;;  %v3730_v3 = vmul.f32 %v5408_v5, %v3578_v31  ;;  %vm3736_vm3 = vweird.f32 %v5408_v5  ;;  %v4008_v31 = vmul.f32 %v7545_v0, %v7545_v0 }
 0xa54   :  { %vm3737_vm5 = vmor %vm3735_vm4, %vm3736_vm3  ;;  %v4006_v62 = vmul.f32 %v7554_v36, %v7554_v36  ;;  %v5410_v59 = vpop.eup %5409  ;;  %v4010_v17 = vmul.f32 %v7600_v14, %v7600_v14 }
 0xa55   :  { %v3731_v40 = vmul.f32 %v5408_v5, %v3730_v3  ;;  %v3728_v20 = vsel %vm3727_vm10, %v5406_v50, %v3724_v26  ;;  %v4040_v26 = vmul.f32 %v4008_v31, %v7545_v0  ;;  %v4228_v25 = vadd.f32 1.0, %v5410_v59 }
 0xa56   :  { %v3753_v61 = vmul.f32 %v3728_v20, %v3561_v15  ;;  %v4103_v20 = vmul.f32 0.044715, %v4039_v33  ;;  %v7594_v31 = vadd.f32 %v7537_v21, %v7511_v52 }
 0xa57   :  { %v3732_v58 = vmul.f32 0.5, %v3731_v40  ;;  %v4038_v40 = vmul.f32 %v4006_v62, %v7554_v36  ;;  %v4104_v28 = vmul.f32 0.044715, %v4040_v26  ;;  %v4011_v62 = vmul.f32 %v7585_v60, %v7585_v60 }
 0xa58   :  { %v3772_v8 = vmul.f32 %v7365_v29, %v3753_v61  ;;  %v4065_v26 = vmul.f32 0.5, %v7523_v4  ;;  %v4009_v48 = vmul.f32 %v7594_v31, %v7594_v31 }
 0xa59   :  { %v3733_v45 = vsub.f32 1.5, %v3732_v58  ;;  %v7579_v58 = vpop.f32.mrf.mxu2  ;;  %v4102_v15 = vmul.f32 0.044715, %v4038_v40  ;;  %v4136_v61 = vadd.f32 %v4104_v28, %v7545_v0 }
 0xa5a   :  { %v3791_v3 = vadd.f32 %v7374_v49, %v3772_v8  ;;  %v4068_v8 = vmul.f32 0.5, %v7514_v23  ;;  %v4041_v4 = vmul.f32 %v4009_v48, %v7594_v31  ;;  %v4071_v48 = vmul.f32 0.5, %v7549_v57 }
 0xa5b   :  { %v3734_v50 = vmul.f32 %v5408_v5, %v3733_v45 }
 0xa5c   :  { %v4260_v21 = vmul.f32 %v4228_v25, %v4068_v8 }
 0xa5d   :  { %v3738_v6 = vsel %vm3737_vm5, %v5408_v5, %v3734_v50  ;;  %v4161_v5 = vmul.f32 0.7978846, %v4129_v30  ;;  %v7589_v30 = vadd.f32 %v3973_v13, %v7509_v55  ;;  %v4168_v13 = vmul.f32 0.7978846, %v4136_v61 }
 0xa5e   :  { %v3754_v56 = vmul.f32 %v3738_v6, %v3562_v2  ;;  %v4135_v2 = vadd.f32 %v4103_v20, %v7549_v57  ;;  %v4134_v6 = vadd.f32 %v4102_v15, %v7554_v36  ;;  %v4042_v15 = vmul.f32 %v4010_v17, %v7600_v14 }
 0xa5f   :  { %5415 = vtanh.f32 %v4161_v5  ;;  %v4012_v5 = vmul.f32 %v7589_v30, %v7589_v30  ;;  %v4105_v61 = vmul.f32 0.044715, %v4041_v4 }
 0xa60   :  { %v3773_v46 = vmul.f32 %v7365_v29, %v3754_v56  ;;  %v4037_v29 = vmul.f32 %v4005_v1, %v7561_v41  ;;  %v4167_v23 = vmul.f32 0.7978846, %v4135_v2  ;;  %v4166_v1 = vmul.f32 0.7978846, %v4134_v6 }
 0xa61   :  { %v3929_v33 = vpop.f32.mrf.mxu2  ;;  %5417 = vtanh.f32 %v4168_v13  ;;  %v4044_v28 = vmul.f32 %v4012_v5, %v7589_v30  ;;  %v4106_v25 = vmul.f32 0.044715, %v4042_v15  ;;  %v4137_v13 = vadd.f32 %v4105_v61, %v7594_v31 }
 0xa62   :  { %v3792_v32 = vadd.f32 %v7374_v49, %v3773_v46  ;;  %v5412_v49 = vpop.eup %5411  ;;  %v4101_v45 = vmul.f32 0.044715, %v4037_v29  ;;  %v4066_v46 = vmul.f32 0.5, %v7520_v24  ;;  %v4043_v24 = vmul.f32 %v4011_v62, %v7585_v60  ;;  %v3978_v29 = vpop.f32.mrf.mxu3 }
 0xa63   :  { %v5414_v47 = vpop.eup %5413  ;;  %v4227_v11 = vadd.f32 1.0, %v5412_v49  ;;  %5419 = vtanh.f32 %v4167_v23  ;;  %v4138_v5 = vadd.f32 %v4106_v25, %v7600_v14  ;;  %v7633_v23 = vadd.f32 %v7581_v42, %v7509_v55 }
 0xa64   :  { %v3800_v51 = vpack.c.bf16 %v3792_v32, %v3791_v3  ;;  %v4226_v56 = vadd.f32 1.0, %v5414_v47  ;;  %v4133_v16 = vadd.f32 %v4101_v45, %v7561_v41  ;;  %5421 = vtanh.f32 %v4166_v1 }
 0xa65   :  { %v5416_v50 = vpop.eup %5415  ;;  %v4259_v3 = vmul.f32 %v4227_v11, %v4067_v44  ;;  %v4107_v49 = vmul.f32 0.044715, %v4043_v24  ;;  %v4108_v45 = vmul.f32 0.044715, %v4044_v28  ;;  %v7623_v44 = vadd.f32 %v3978_v29, %v7509_v55 }
 0xa66   :  { %3946 = vmatmul.bf16.gmra.mxu2 %v3800_v51  ;;  %3995 = vmatmul.bf16.gmra.mxu3 %v3800_v51  ;;  %v4225_v39 = vadd.f32 1.0, %v5416_v50  ;;  %v4165_v32 = vmul.f32 0.7978846, %v4133_v16  ;;  %v4258_v40 = vmul.f32 %v4226_v56, %v4066_v46  ;;  %v7619_v56 = vadd.f32 %v3929_v33, %v7511_v52 }
 0xa67   :  { %v5418_v47 = vpop.eup %5417  ;;  %v4139_v11 = vadd.f32 %v4107_v49, %v7585_v60  ;;  %v7628_v46 = vadd.f32 %v7579_v58, %v7511_v52  ;;  %v4072_v1 = vmul.f32 0.5, %v7545_v0  ;;  %v4016_v58 = vmul.f32 %v7623_v44, %v7623_v44 }
 0xa68   :  { %v4257_v51 = vmul.f32 %v4225_v39, %v4065_v26  ;;  %v4290_v59 = vpack.c.bf16 %v4260_v21, %v4258_v40  ;;  %5423 = vtanh.f32 %v4165_v32  ;;  %v4140_v39 = vadd.f32 %v4108_v45, %v7589_v30 }
 0xa69   :  { %v5420_v50 = vpop.eup %5419  ;;  %v3932_v2 = vpop.f32.mrf.mxu2  ;;  %v4232_v62 = vadd.f32 1.0, %v5418_v47  ;;  %v4171_v17 = vmul.f32 0.7978846, %v4139_v11  ;;  %v4070_v33 = vmul.f32 0.5, %v7554_v36  ;;  %v4169_v24 = vmul.f32 0.7978846, %v4137_v13 }
 0xa6a   :  { %v4289_v20 = vpack.c.bf16 %v4259_v3, %v4257_v51  ;;  %v5422_v6 = vpop.eup %5421  ;;  %v3981_v8 = vpop.f32.mrf.mxu3  ;;  %v4231_v21 = vadd.f32 1.0, %v5420_v50  ;;  %v4015_v3 = vmul.f32 %v7619_v56, %v7619_v56  ;;  %v4172_v51 = vmul.f32 0.7978846, %v4140_v39 }
 0xa6b   :  { %v4230_v26 = vadd.f32 1.0, %v5422_v6  ;;  %v4264_v40 = vmul.f32 %v4232_v62, %v4072_v1  ;;  %v4013_v42 = vmul.f32 %v7628_v46, %v7628_v46  ;;  %v4069_v0 = vmul.f32 0.5, %v7561_v41 }
 0xa6c   :  { %v4263_v29 = vmul.f32 %v4231_v21, %v4071_v48  ;;  %v4170_v28 = vmul.f32 0.7978846, %v4138_v5  ;;  %v4014_v57 = vmul.f32 %v7633_v23, %v7633_v23  ;;  %v4047_v4 = vmul.f32 %v4015_v3, %v7619_v56 }
 0xa6d   :  { %5425 = vtanh.f32 %v4171_v17  ;;  %v4048_v36 = vmul.f32 %v4016_v58, %v7623_v44  ;;  %v4045_v49 = vmul.f32 %v4013_v42, %v7628_v46  ;;  %v4076_v42 = vmul.f32 0.5, %v7589_v30 }
 0xa6e   :  { %v5424_v16 = vpop.eup %5423  ;;  %5427 = vtanh.f32 %v4172_v51  ;;  %v4046_v61 = vmul.f32 %v4014_v57, %v7633_v23  ;;  %v4111_v50 = vmul.f32 0.044715, %v4047_v4  ;;  %v7665_v51 = vadd.f32 %v3981_v8, %v7509_v55 }
 0xa6f   :  { %v4229_v32 = vadd.f32 1.0, %v5424_v16  ;;  %5429 = vtanh.f32 %v4169_v24  ;;  %v4112_v25 = vmul.f32 0.044715, %v4048_v36  ;;  %v4109_v11 = vmul.f32 0.044715, %v4045_v49 }
 0xa70   :  { %5431 = vtanh.f32 %v4170_v28  ;;  %v4110_v39 = vmul.f32 0.044715, %v4046_v61  ;;  %v4143_v13 = vadd.f32 %v4111_v50, %v7619_v56  ;;  %v4075_v24 = vmul.f32 0.5, %v7585_v60 }
 0xa71   :  { %v3934_v15 = vpop.f32.mrf.mxu2  ;;  %v4144_v1 = vadd.f32 %v4112_v25, %v7623_v44  ;;  %v4141_v48 = vadd.f32 %v4109_v11, %v7628_v46  ;;  %v4073_v4 = vmul.f32 0.5, %v7594_v31  ;;  %v4018_v49 = vmul.f32 %v7665_v51, %v7665_v51 }
 0xa72   :  { %v3983_v45 = vpop.f32.mrf.mxu3  ;;  %v7653_v21 = vadd.f32 %v3934_v15, %v7511_v52  ;;  %v4175_v57 = vmul.f32 0.7978846, %v4143_v13 }
 0xa73   :  { %v5426_v6 = vpop.eup %5425  ;;  %v4173_v8 = vmul.f32 0.7978846, %v4141_v48  ;;  %v4050_v25 = vmul.f32 %v4018_v49, %v7665_v51 }
 0xa74   :  { %v5428_v16 = vpop.eup %5427  ;;  %v4235_v58 = vadd.f32 1.0, %v5426_v6  ;;  %5433 = vtanh.f32 %v4175_v57 }
 0xa75   :  { %v5430_v62 = vpop.eup %5429 }
 0xa76   :  { %4445 = vmatmul.bf16.vlgmr.msra.gmra.mxu2 %v4289_v20  ;;  %4494 = vmatmul.bf16.vlgmr.msra.gmra.mxu3 %v4290_v59  ;;  %v4261_v20 = vmul.f32 %v4229_v32, %v4069_v0  ;;  %v4262_v59 = vmul.f32 %v4230_v26, %v4070_v33  ;;  %v5432_v5 = vpop.eup %5431  ;;  %v7657_v26 = vadd.f32 %v3983_v45, %v7509_v55  ;;  %v4236_v33 = vadd.f32 1.0, %v5428_v16 }
 0xa77   :  { %v7661_v32 = vadd.f32 %v3932_v2, %v7511_v52  ;;  %v4019_v0 = vmul.f32 %v7653_v21, %v7653_v21  ;;  %v4234_v28 = vadd.f32 1.0, %v5432_v5  ;;  %v4267_v36 = vmul.f32 %v4235_v58, %v4075_v24 }
 0xa78   :  { %v4291_v47 = vpack.c.bf16 %v4263_v29, %v4261_v20  ;;  %v4292_v41 = vpack.c.bf16 %v4264_v40, %v4262_v59  ;;  %v4142_v40 = vadd.f32 %v4110_v39, %v7633_v23  ;;  %v4233_v29 = vadd.f32 1.0, %v5430_v62 }
 0xa79   :  { %v3937_v3 = vpop.f32.mrf.mxu2  ;;  %v4020_v2 = vmul.f32 %v7657_v26, %v7657_v26  ;;  %v4074_v20 = vmul.f32 0.5, %v7600_v14  ;;  %v4176_v59 = vmul.f32 0.7978846, %v4144_v1  ;;  %v4017_v60 = vmul.f32 %v7661_v32, %v7661_v32 }
 0xa7a   :  { %v3986_v17 = vpop.f32.mrf.mxu3  ;;  %v4268_v30 = vmul.f32 %v4236_v33, %v4076_v42  ;;  %v4174_v15 = vmul.f32 0.7978846, %v4142_v40  ;;  %v4051_v45 = vmul.f32 %v4019_v0, %v7653_v21  ;;  %v5434_v62 = vpop.eup %5433  ;;  %v4114_v1 = vmul.f32 0.044715, %v4050_v25 }
 0xa7b   :  { %v4052_v31 = vmul.f32 %v4020_v2, %v7657_v26  ;;  %5435 = vtanh.f32 %v4176_v59  ;;  %v4049_v14 = vmul.f32 %v4017_v60, %v7661_v32  ;;  %v4079_v59 = vmul.f32 0.5, %v7619_v56 }
 0xa7c   :  { %5437 = vtanh.f32 %v4173_v8  ;;  %v4115_v11 = vmul.f32 0.044715, %v4051_v45  ;;  %v4146_v2 = vadd.f32 %v4114_v1, %v7665_v51  ;;  %v4080_v8 = vmul.f32 0.5, %v7623_v44 }
 0xa7d   :  { %5439 = vtanh.f32 %v4174_v15  ;;  %v4116_v39 = vmul.f32 0.044715, %v4052_v31  ;;  %v4113_v13 = vmul.f32 0.044715, %v4049_v14 }
 0xa7e   :  { %v4147_v58 = vadd.f32 %v4115_v11, %v7653_v21  ;;  %v4178_v14 = vmul.f32 0.7978846, %v4146_v2 }
 0xa7f   :  { %v4148_v24 = vadd.f32 %v4116_v39, %v7657_v26  ;;  %v4145_v0 = vadd.f32 %v4113_v13, %v7661_v32 }
 0xa80   :  { %v4179_v60 = vmul.f32 0.7978846, %v4147_v58 }
 0xa81   :  { %v3939_v6 = vpop.f32.mrf.mxu2  ;;  %v5436_v5 = vpop.eup %5435  ;;  %v4180_v49 = vmul.f32 0.7978846, %v4148_v24 }
 0xa82   :  { %v3988_v16 = vpop.f32.mrf.mxu3  ;;  %v5438_v48 = vpop.eup %5437  ;;  %v7685_v33 = vadd.f32 %v3939_v6, %v7511_v52  ;;  %v4240_v57 = vadd.f32 1.0, %v5436_v5  ;;  %5441 = vtanh.f32 %v4179_v60 }
 0xa83   :  { %v5440_v40 = vpop.eup %5439  ;;  %v7689_v42 = vadd.f32 %v3988_v16, %v7509_v55  ;;  %v4237_v15 = vadd.f32 1.0, %v5438_v48  ;;  %5443 = vtanh.f32 %v4180_v49 }
 0xa84   :  { %v4272_v31 = vmul.f32 %v4240_v57, %v4080_v8 }
 0xa85   :  { %v4024_v45 = vmul.f32 %v7689_v42, %v7689_v42 }
 0xa86   :  { %4450 = vmatmul.bf16.gmra.mxu2 %v4291_v47  ;;  %4499 = vmatmul.bf16.gmra.mxu3 %v4292_v41  ;;  %v4265_v47 = vmul.f32 %v4233_v29, %v4073_v4  ;;  %v4266_v41 = vmul.f32 %v4234_v28, %v4074_v20  ;;  %v7693_v29 = vadd.f32 %v3937_v3, %v7511_v52  ;;  %v4239_v28 = vadd.f32 1.0, %v5434_v62 }
 0xa87   :  { %v7697_v4 = vadd.f32 %v3986_v17, %v7509_v55  ;;  %v4238_v3 = vadd.f32 1.0, %v5440_v40  ;;  %v4078_v17 = vmul.f32 0.5, %v7633_v23 }
 0xa88   :  { %v4293_v61 = vpack.c.bf16 %v4267_v36, %v4265_v47  ;;  %v4294_v50 = vpack.c.bf16 %v4268_v30, %v4266_v41  ;;  %v4023_v36 = vmul.f32 %v7685_v33, %v7685_v33  ;;  %v4077_v47 = vmul.f32 0.5, %v7628_v46  ;;  %v5442_v1 = vpop.eup %5441 }
 0xa89   :  { %v3942_v20 = vpop.f32.mrf.mxu2  ;;  %v4177_v41 = vmul.f32 0.7978846, %v4145_v0  ;;  %v4021_v56 = vmul.f32 %v7693_v29, %v7693_v29  ;;  %v4271_v44 = vmul.f32 %v4239_v28, %v4079_v59  ;;  %v4270_v6 = vmul.f32 %v4238_v3, %v4078_v17  ;;  %v5444_v40 = vpop.eup %5443 }
 0xa8a   :  { %v3991_v30 = vpop.f32.mrf.mxu3  ;;  %v4269_v25 = vmul.f32 %v4237_v15, %v4077_v47  ;;  %v4056_v46 = vmul.f32 %v4024_v45, %v7689_v42  ;;  %v4243_v15 = vadd.f32 1.0, %v5442_v1  ;;  %v4244_v3 = vadd.f32 1.0, %v5444_v40 }
 0xa8b   :  { %5445 = vtanh.f32 %v4177_v41  ;;  %v4053_v23 = vmul.f32 %v4021_v56, %v7693_v29  ;;  %v4296_v16 = vpack.c.bf16 %v4272_v31, %v4270_v6  ;;  %v7729_v45 = vadd.f32 %v3991_v30, %v7509_v55 }
 0xa8c   :  { %v4295_v11 = vpack.c.bf16 %v4271_v44, %v4269_v25  ;;  %5447 = vtanh.f32 %v4178_v14  ;;  %v4120_v13 = vmul.f32 0.044715, %v4056_v46  ;;  %v4083_v47 = vmul.f32 0.5, %v7653_v21 }
 0xa8d   :  { %v4117_v48 = vmul.f32 0.044715, %v4053_v23  ;;  %v4084_v17 = vmul.f32 0.5, %v7657_v26  ;;  %v4026_v46 = vmul.f32 %v7729_v45, %v7729_v45 }
 0xa8e   :  { %v4152_v59 = vadd.f32 %v4120_v13, %v7689_v42  ;;  %v4275_v25 = vmul.f32 %v4243_v15, %v4083_v47  ;;  %v4087_v47 = vmul.f32 0.5, %v7685_v33 }
 0xa8f   :  { %v4149_v60 = vadd.f32 %v4117_v48, %v7693_v29  ;;  %v4276_v26 = vmul.f32 %v4244_v3, %v4084_v17  ;;  %v4058_v13 = vmul.f32 %v4026_v46, %v7729_v45 }
 0xa90   :  { %v4184_v14 = vmul.f32 0.7978846, %v4152_v59 }
 0xa91   :  { %v3944_v5 = vpop.f32.mrf.mxu2  ;;  %v5446_v0 = vpop.eup %5445  ;;  %v4181_v30 = vmul.f32 0.7978846, %v4149_v60 }
 0xa92   :  { %v3993_v58 = vpop.f32.mrf.mxu3  ;;  %v7717_v57 = vadd.f32 %v3944_v5, %v7511_v52  ;;  %v5448_v2 = vpop.eup %5447  ;;  %v4241_v44 = vadd.f32 1.0, %v5446_v0 }
 0xa93   :  { %v7721_v8 = vadd.f32 %v3993_v58, %v7509_v55  ;;  %v4242_v31 = vadd.f32 1.0, %v5448_v2 }
 0xa94   :  { %v4027_v56 = vmul.f32 %v7717_v57, %v7717_v57 }
 0xa96   :  { %4455 = vmatmul.bf16.gmra.mxu2 %v4293_v61  ;;  %4504 = vmatmul.bf16.gmra.mxu3 %v4294_v50  ;;  %v4022_v61 = vmul.f32 %v7697_v4, %v7697_v4  ;;  %v4055_v50 = vmul.f32 %v4023_v36, %v7685_v33  ;;  %v7725_v36 = vadd.f32 %v3942_v20, %v7511_v52 }
 0xa97   :  { %v4028_v20 = vmul.f32 %v7721_v8, %v7721_v8  ;;  %v4059_v23 = vmul.f32 %v4027_v56, %v7717_v57  ;;  %v4088_v56 = vmul.f32 0.5, %v7689_v42 }
 0xa98   :  { %v4054_v39 = vmul.f32 %v4022_v61, %v7697_v4  ;;  %v4119_v62 = vmul.f32 0.044715, %v4055_v50  ;;  %v4081_v61 = vmul.f32 0.5, %v7661_v32  ;;  %v4082_v50 = vmul.f32 0.5, %v7665_v51 }
 0xa99   :  { %v4025_v21 = vmul.f32 %v7725_v36, %v7725_v36  ;;  %v4060_v32 = vmul.f32 %v4028_v20, %v7721_v8  ;;  %v4123_v5 = vmul.f32 0.044715, %v4059_v23 }
 0xa9a   :  { %v4118_v24 = vmul.f32 0.044715, %v4054_v39  ;;  %v4151_v28 = vadd.f32 %v4119_v62, %v7685_v33 }
 0xa9b   :  { %v4057_v51 = vmul.f32 %v4025_v21, %v7725_v36  ;;  %v4124_v1 = vmul.f32 0.044715, %v4060_v32 }
 0xa9c   :  { %v4150_v49 = vadd.f32 %v4118_v24, %v7697_v4  ;;  %v4183_v41 = vmul.f32 0.7978846, %v4151_v28  ;;  %v4122_v24 = vmul.f32 0.044715, %v4058_v13  ;;  %v4155_v28 = vadd.f32 %v4123_v5, %v7717_v57 }
 0xa9d   :  { %v4121_v58 = vmul.f32 0.044715, %v4057_v51  ;;  %v4156_v59 = vadd.f32 %v4124_v1, %v7721_v8  ;;  %v4092_v51 = vmul.f32 0.5, %v7721_v8  ;;  %v4090_v5 = vmul.f32 0.5, %v7729_v45 }
 0xa9e   :  { %v4182_v6 = vmul.f32 0.7978846, %v4150_v49  ;;  %5449 = vtanh.f32 %v4183_v41  ;;  %v4154_v49 = vadd.f32 %v4122_v24, %v7729_v45  ;;  %v4187_v17 = vmul.f32 0.7978846, %v4155_v28 }
 0xa9f   :  { %5451 = vtanh.f32 %v4184_v14  ;;  %v4153_v60 = vadd.f32 %v4121_v58, %v7725_v36  ;;  %v4085_v14 = vmul.f32 0.5, %v7693_v29 }
 0xaa0   :  { %5453 = vtanh.f32 %v4181_v30  ;;  %v4186_v21 = vmul.f32 0.7978846, %v4154_v49 }
 0xaa1   :  { %5455 = vtanh.f32 %v4182_v6  ;;  %v4185_v20 = vmul.f32 0.7978846, %v4153_v60 }
 0xaa2   :  { %5457 = vtanh.f32 %v4187_v17 }
 0xaa4   :  { %v5450_v48 = vpop.eup %5449 }
 0xaa5   :  { %v5452_v40 = vpop.eup %5451  ;;  %v4247_v15 = vadd.f32 1.0, %v5450_v48 }
 0xaa6   :  { %4460 = vmatmul.bf16.gmra.mxu2 %v4295_v11  ;;  %4509 = vmatmul.bf16.gmra.mxu3 %v4296_v16  ;;  %v4273_v11 = vmul.f32 %v4241_v44, %v4081_v61  ;;  %v4274_v16 = vmul.f32 %v4242_v31, %v4082_v50  ;;  %v5454_v0 = vpop.eup %5453  ;;  %v4248_v3 = vadd.f32 1.0, %v5452_v40  ;;  %v4188_v31 = vmul.f32 0.7978846, %v4156_v59 }
 0xaa7   :  { %v5456_v2 = vpop.eup %5455  ;;  %v4245_v41 = vadd.f32 1.0, %v5454_v0  ;;  %v4279_v61 = vmul.f32 %v4247_v15, %v4087_v47  ;;  %v4086_v50 = vmul.f32 0.5, %v7697_v4  ;;  %v4091_v4 = vmul.f32 0.5, %v7717_v57 }
 0xaa8   :  { %v4297_v39 = vpack.c.bf16 %v4275_v25, %v4273_v11  ;;  %v4298_v62 = vpack.c.bf16 %v4276_v26, %v4274_v16  ;;  %v4246_v44 = vadd.f32 1.0, %v5456_v2  ;;  %v4280_v30 = vmul.f32 %v4248_v3, %v4088_v56  ;;  %v5458_v42 = vpop.eup %5457 }
 0xaa9   :  { %v4277_v25 = vmul.f32 %v4245_v41, %v4085_v14  ;;  %5459 = vtanh.f32 %v4188_v31  ;;  %v4251_v11 = vadd.f32 1.0, %v5458_v42 }
 0xaaa   :  { %v4278_v26 = vmul.f32 %v4246_v44, %v4086_v50  ;;  %5461 = vtanh.f32 %v4185_v20  ;;  %v7766_v50 = vld [vmem:[%s7818_s12] ss:$0 sm:$0xff]  ;;  %s5616_s12 = smov [#allocation8]  }
 0xaab   :  { %v4299_v33 = vpack.c.bf16 %v4279_v61, %v4277_v25  ;;  %5463 = vtanh.f32 %v4186_v21  ;;  %v4283_v13 = vmul.f32 %v4251_v11, %v4091_v4  ;;  %s4571_s30 = sshll.u32 %s5616_s12, 4  ;;  %s4572_s30 = int_to_ptr.vmem [resolvable:$true] %s4571_s30 }
 0xaac   :  { %v4300_v6 = vpack.c.bf16 %v4280_v30, %v4278_v26 }
 0xaaf   :  { %v5460_v46 = vpop.eup %5459 }
 0xab0   :  { %v5462_v23 = vpop.eup %5461  ;;  %v4252_v16 = vadd.f32 1.0, %v5460_v46 }
 0xab1   :  { %v5464_v29 = vpop.eup %5463  ;;  %v4249_v32 = vadd.f32 1.0, %v5462_v23 }
 0xab2   :  { %v4284_v1 = vmul.f32 %v4252_v16, %v4092_v51 }
 0xab6   :  { %4465 = vmatmul.bf16.gmra.mxu2 %v4297_v39  ;;  %4514 = vmatmul.bf16.gmra.mxu3 %v4298_v62  ;;  %v4250_v39 = vadd.f32 1.0, %v5464_v29  ;;  %v4089_v62 = vmul.f32 0.5, %v7725_v36 }
 0xab8   :  { %v4281_v48 = vmul.f32 %v4249_v32, %v4089_v62  ;;  %v4282_v58 = vmul.f32 %v4250_v39, %v4090_v5 }
 0xaba   :  { %v4301_v40 = vpack.c.bf16 %v4283_v13, %v4281_v48  ;;  %v4302_v24 = vpack.c.bf16 %v4284_v1, %v4282_v58 }
 0xac6   :  { %4470 = vmatmul.bf16.gmra.mxu2 %v4299_v33  ;;  %4519 = vmatmul.bf16.gmra.mxu3 %v4300_v6 }
 0xad6   :  { %4475 = vmatmul.bf16.gmra.mxu2 %v4301_v40  ;;  %4524 = vmatmul.bf16.gmra.mxu3 %v4302_v24 }
 0xae9   :  { %v3947_v0 = vpop.f32.mrf.mxu2  ;;  %v3996_v28 = vpop.f32.mrf.mxu3 }
 0xaea   :  { %v3948_v57 = vadd.f32 %v3947_v0, %v7511_v52  ;;  %v3997_v2 = vadd.f32 %v3996_v28, %v7509_v55 }
 0xaec   :  { %v4029_v8 = vmul.f32 %v3948_v57, %v3948_v57  ;;  %v4030_v59 = vmul.f32 %v3997_v2, %v3997_v2  ;;  %v4093_v48 = vmul.f32 0.5, %v3948_v57  ;;  %v4094_v0 = vmul.f32 0.5, %v3997_v2 }
 0xaee   :  { %v4061_v60 = vmul.f32 %v4029_v8, %v3948_v57  ;;  %v4062_v36 = vmul.f32 %v4030_v59, %v3997_v2 }
 0xaf0   :  { %v4125_v15 = vmul.f32 0.044715, %v4061_v60  ;;  %v4126_v3 = vmul.f32 0.044715, %v4062_v36 }
 0xaf1   :  { %v3949_v45 = vpop.f32.mrf.mxu2  ;;  %v3998_v49 = vpop.f32.mrf.mxu3 }
 0xaf2   :  { %v4157_v47 = vadd.f32 %v4125_v15, %v3948_v57  ;;  %v3950_v17 = vadd.f32 %v3949_v45, %v7511_v52  ;;  %v3999_v41 = vadd.f32 %v3998_v49, %v7509_v55  ;;  %v4158_v56 = vadd.f32 %v4126_v3, %v3997_v2 }
 0xaf4   :  { %v4031_v44 = vmul.f32 %v3950_v17, %v3950_v17  ;;  %v4032_v31 = vmul.f32 %v3999_v41, %v3999_v41  ;;  %v4189_v14 = vmul.f32 0.7978846, %v4157_v47  ;;  %v4190_v30 = vmul.f32 0.7978846, %v4158_v56 }
 0xaf5   :  { %v4095_v58 = vmul.f32 0.5, %v3950_v17 }
 0xaf6   :  { %v4063_v20 = vmul.f32 %v4031_v44, %v3950_v17  ;;  %v4064_v61 = vmul.f32 %v4032_v31, %v3999_v41  ;;  %5465 = vtanh.f32 %v4189_v14 }
 0xaf7   :  { %5467 = vtanh.f32 %v4190_v30 }
 0xaf8   :  { %v4127_v21 = vmul.f32 0.044715, %v4063_v20  ;;  %v4128_v25 = vmul.f32 0.044715, %v4064_v61 }
 0xaf9   :  { %v4446_v26 = vpop.f32.mrf.mxu2  ;;  %v4495_v33 = vpop.f32.mrf.mxu3 }
 0xafa   :  { %v4159_v52 = vadd.f32 %v4127_v21, %v3950_v17  ;;  %v4160_v6 = vadd.f32 %v4128_v25, %v3999_v41  ;;  %v4447_v55 = vadd.f32 %v7766_v50, %v4446_v26 }
 0xafc   :  { %v4191_v42 = vmul.f32 0.7978846, %v4159_v52  ;;  %v4192_v46 = vmul.f32 0.7978846, %v4160_v6  ;;  %v4496_v23 = vadd.f32 %v4495_v33, %v4447_v55  ;;  %v5466_v11 = vpop.eup %5465 }
 0xafd   :  { %v5468_v16 = vpop.eup %5467  ;;  %v4253_v39 = vadd.f32 1.0, %v5466_v11 }
 0xafe   :  { %5469 = vtanh.f32 %v4191_v42  ;;  %v4535_v29 = vadd.f32 %v4496_v23, %v6600_v38  ;;  %v4254_v5 = vadd.f32 1.0, %v5468_v16  ;;  %v4096_v38 = vmul.f32 0.5, %v3999_v41 }
 0xaff   :  { %5471 = vtanh.f32 %v4192_v46  ;;  %v4285_v8 = vmul.f32 %v4253_v39, %v4093_v48 }
 0xb00   :  { %4551 = vst [vmem:[#allocation8] sm:$0xff] %v4535_v29  ;;  %v4286_v60 = vmul.f32 %v4254_v5, %v4094_v0 }
 0xb01   :  { %v4448_v4 = vpop.f32.mrf.mxu2  ;;  %v4497_v32 = vpop.f32.mrf.mxu3 }
 0xb02   :  { %v4449_v51 = vadd.f32 %v7766_v50, %v4448_v4 }
 0xb04   :  { %v5470_v62 = vpop.eup %5469  ;;  %v4498_v13 = vadd.f32 %v4497_v32, %v4449_v51 }
 0xb05   :  { %v5472_v1 = vpop.eup %5471  ;;  %v4255_v40 = vadd.f32 1.0, %v5470_v62 }
 0xb06   :  { %v4536_v24 = vadd.f32 %v4498_v13, %v6622_v18  ;;  %v4256_v28 = vadd.f32 1.0, %v5472_v1 }
 0xb07   :  { %v4287_v59 = vmul.f32 %v4255_v40, %v4095_v58 }
 0xb08   :  { %4552 = vst [vmem:[#allocation8 + $0x8] sm:$0xff] %v4536_v24  ;;  %v4288_v36 = vmul.f32 %v4256_v28, %v4096_v38 }
 0xb09   :  { %v4451_v15 = vpop.f32.mrf.mxu2  ;;  %v4500_v3 = vpop.f32.mrf.mxu3  ;;  %v4303_v45 = vpack.c.bf16 %v4287_v59, %v4285_v8 }
 0xb0a   :  { %v4452_v49 = vadd.f32 %v7766_v50, %v4451_v15  ;;  %v4304_v47 = vpack.c.bf16 %v4288_v36, %v4286_v60 }
 0xb0b   :  { %4480 = vmatmul.bf16.gmra.mxu2 %v4303_v45 }
 0xb0c   :  { %v4501_v57 = vadd.f32 %v4500_v3, %v4452_v49  ;;  %4529 = vmatmul.bf16.gmra.mxu3 %v4304_v47 }
 0xb0e   :  { %v4537_v17 = vadd.f32 %v4501_v57, %v6752_v7 }
 0xb10   :  { %4553 = vst [vmem:[#allocation8 + $0x10] sm:$0xff] %v4537_v17 }
 0xb11   :  { %v4453_v18 = vpop.f32.mrf.mxu2  ;;  %v4502_v2 = vpop.f32.mrf.mxu3 }
 0xb12   :  { %v4454_v41 = vadd.f32 %v7766_v50, %v4453_v18 }
 0xb14   :  { %v4503_v56 = vadd.f32 %v4502_v2, %v4454_v41 }
 0xb16   :  { %v4538_v44 = vadd.f32 %v4503_v56, %v6713_v53 }
 0xb18   :  { %4554 = vst [vmem:[#allocation8 + $0x18] sm:$0xff] %v4538_v44 }
 0xb19   :  { %v4456_v31 = vpop.f32.mrf.mxu2  ;;  %v4505_v14 = vpop.f32.mrf.mxu3 }
 0xb1a   :  { %v4457_v20 = vadd.f32 %v7766_v50, %v4456_v31 }
 0xb1c   :  { %v4506_v61 = vadd.f32 %v4505_v14, %v4457_v20 }
 0xb1e   :  { %v4539_v30 = vadd.f32 %v4506_v61, %v7190_v19 }
 0xb20   :  { %4555 = vst [vmem:[#allocation8 + $0x20] sm:$0xff] %v4539_v30 }
 0xb21   :  { %v4458_v21 = vpop.f32.mrf.mxu2  ;;  %v4507_v25 = vpop.f32.mrf.mxu3 }
 0xb22   :  { %v4459_v7 = vadd.f32 %v7766_v50, %v4458_v21 }
 0xb24   :  { %v4508_v26 = vadd.f32 %v4507_v25, %v4459_v7 }
 0xb26   :  { %v4540_v33 = vadd.f32 %v4508_v26, %v7216_v22 }
 0xb28   :  { %4556 = vst [vmem:[#allocation8 + $0x28] sm:$0xff] %v4540_v33 }
 0xb29   :  { %v4461_v52 = vpop.f32.mrf.mxu2  ;;  %v4510_v6 = vpop.f32.mrf.mxu3 }
 0xb2a   :  { %v4462_v53 = vadd.f32 %v7766_v50, %v4461_v52 }
 0xb2c   :  { %v4511_v55 = vadd.f32 %v4510_v6, %v4462_v53 }
 0xb2e   :  { %v4541_v42 = vadd.f32 %v4511_v55, %v7314_v12 }
 0xb30   :  { %4557 = vst [vmem:[#allocation8 + $0x30] sm:$0xff] %v4541_v42 }
 0xb31   :  { %v4463_v46 = vpop.f32.mrf.mxu2  ;;  %v4512_v23 = vpop.f32.mrf.mxu3 }
 0xb32   :  { %v4464_v19 = vadd.f32 %v7766_v50, %v4463_v46 }
 0xb34   :  { %v4513_v29 = vadd.f32 %v4512_v23, %v4464_v19 }
 0xb36   :  { %v4542_v11 = vadd.f32 %v4513_v29, %v7321_v34 }
 0xb38   :  { %4558 = vst [vmem:[#allocation8 + $0x38] sm:$0xff] %v4542_v11 }
 0xb39   :  { %v4466_v16 = vpop.f32.mrf.mxu2  ;;  %v4515_v4 = vpop.f32.mrf.mxu3 }
 0xb3a   :  { %v4467_v22 = vadd.f32 %v7766_v50, %v4466_v16 }
 0xb3c   :  { %v4516_v32 = vadd.f32 %v4515_v4, %v4467_v22 }
 0xb3e   :  { %v4543_v51 = vadd.f32 %v4516_v32, %v7341_v43 }
 0xb40   :  { %4559 = vst [vmem:[#allocation8 + $0x40] sm:$0xff] %v4543_v51 }
 0xb41   :  { %v4468_v39 = vpop.f32.mrf.mxu2  ;;  %v4517_v62 = vpop.f32.mrf.mxu3 }
 0xb42   :  { %v4469_v12 = vadd.f32 %v7766_v50, %v4468_v39 }
 0xb44   :  { %v4518_v13 = vadd.f32 %v4517_v62, %v4469_v12 }
 0xb46   :  { %v4544_v5 = vadd.f32 %v4518_v13, %v7344_v9 }
 0xb48   :  { %4560 = vst [vmem:[#allocation8 + $0x48] sm:$0xff] %v4544_v5 }
 0xb49   :  { %v4471_v1 = vpop.f32.mrf.mxu2  ;;  %v4520_v48 = vpop.f32.mrf.mxu3 }
 0xb4a   :  { %v4472_v34 = vadd.f32 %v7766_v50, %v4471_v1 }
 0xb4c   :  { %v4521_v58 = vadd.f32 %v4520_v48, %v4472_v34 }
 0xb4e   :  { %v4545_v40 = vadd.f32 %v4521_v58, %v7436_v37 }
 0xb50   :  { %4561 = vst [vmem:[#allocation8 + $0x50] sm:$0xff] %v4545_v40 }
 0xb51   :  { %v4473_v24 = vpop.f32.mrf.mxu2  ;;  %v4522_v0 = vpop.f32.mrf.mxu3 }
 0xb52   :  { %v4474_v43 = vadd.f32 %v7766_v50, %v4473_v24 }
 0xb54   :  { %v4523_v38 = vadd.f32 %v4522_v0, %v4474_v43 }
 0xb56   :  { %v4546_v28 = vadd.f32 %v4523_v38, %v7441_v54 }
 0xb58   :  { %4562 = vst [vmem:[#allocation8 + $0x58] sm:$0xff] %v4546_v28 }
 0xb59   :  { %v4476_v8 = vpop.f32.mrf.mxu2  ;;  %v4525_v59 = vpop.f32.mrf.mxu3 }
 0xb5a   :  { %v4477_v9 = vadd.f32 %v7766_v50, %v4476_v8 }
 0xb5c   :  { %v4526_v60 = vadd.f32 %v4525_v59, %v4477_v9 }
 0xb5e   :  { %v4547_v36 = vadd.f32 %v4526_v60, %v7446_v10 }
 0xb60   :  { %4563 = vst [vmem:[#allocation8 + $0x60] sm:$0xff] %v4547_v36 }
 0xb61   :  { %v4478_v15 = vpop.f32.mrf.mxu2  ;;  %v4527_v3 = vpop.f32.mrf.mxu3 }
 0xb62   :  { %v4479_v37 = vadd.f32 %v7766_v50, %v4478_v15 }
 0xb64   :  { %v4528_v45 = vadd.f32 %v4527_v3, %v4479_v37 }
 0xb66   :  { %v4548_v49 = vadd.f32 %v4528_v45, %v7449_v35 }
 0xb68   :  { %4564 = vst [vmem:[#allocation8 + $0x68] sm:$0xff] %v4548_v49 }
 0xb8e   :  { %v4481_v47 = vpop.f32.mrf.mxu2 }
 0xb8f   :  { %v4482_v54 = vadd.f32 %v7766_v50, %v4481_v47  ;;  %v4530_v57 = vpop.f32.mrf.mxu3 }
 0xb91   :  { %v4531_v17 = vadd.f32 %v4530_v57, %v4482_v54 }
 0xb93   :  { %v4549_v18 = vadd.f32 %v4531_v17, %v7484_v63 }
 0xb95   :  { %4565 = vst [vmem:[#allocation8 + $0x70] sm:$0xff] %v4549_v18 }
 0xb96   :  { %v4483_v2 = vpop.f32.mrf.mxu2 }
 0xb97   :  { %v4484_v10 = vadd.f32 %v7766_v50, %v4483_v2  ;;  %v4532_v41 = vpop.f32.mrf.mxu3 }
 0xb99   :  { %v4533_v35 = vadd.f32 %v4532_v41, %v4484_v10 }
 0xb9b   :  { %v4550_v56 = vadd.f32 %v4533_v35, %v7487_v27 }
 0xb9d   :  { %4566 = vst [vmem:[#allocation8 + $0x78] sm:$0xff] %v4550_v56 }
 0xb9e   :  { %4579 = dma.vmem_to_hbm [thread:$0]  %s4572_s30, 2048, %s4574_s1, [#allocation4], %s5610_s16, %s5610_s16, %s5611_s17  }
 0xb9f   :  { %5607 = dma.done.wait [#allocation4], 2048  }
 0xba0   :  { %5608 = vsyncadd [#allocation4], 4294965248 }
 0xba1   :  { %4584 = vsyncpa [#allocation3], 1 }
 0xba2   :  { %4585 = vsyncpa [#allocation6], 1 }
 0xba3   :  { %4586 = vsyncpa [#allocation4], 1 }

</bundles_post_ra>
